<compile_context>
chip_gen: v7x
topology: tpu7x:2x2x1
jax: 0.10.0
libtpu: 0.0.40
codegen_flags: <defaults>
</compile_context>

<pallas_src>
import math
import functools

import numpy as np
import jax
import jax.numpy as jnp
from jax import lax
from jax.experimental import pallas as pl
from jax.experimental.pallas import tpu as pltpu


def tdr_config(in_channels, out_channels, kernel_size=3, stride=1, in_ratio=0.5,
               out_ratio=0.5, exp_times=2, reduction=16, base_g=1):
    """Re-derive the channel bookkeeping from TDRConv.__init__."""
    base_out = int(math.ceil(out_channels * out_ratio))
    div_out = out_channels - base_out
    exp_out = div_out * exp_times
    main_in = int(math.ceil(in_channels * in_ratio))
    exp_in = in_channels - main_in
    div_in = main_in + exp_out
    base_groups = base_g if (base_out % base_g == 0 and main_in % base_g == 0) else 1
    if exp_out == 0:
        exp_out = out_channels
    if exp_in == 0:
        div_in = main_in
    need_match = exp_out != out_channels
    div_groups = math.gcd(div_out, main_in) if div_out != 0 else 1
    se_hidden = max(2, out_channels // reduction)
    return dict(in_channels=in_channels, out_channels=out_channels, k=kernel_size,
                stride=stride, base_out=base_out, div_out=div_out, exp_out=exp_out,
                main_in=main_in, exp_in=exp_in, div_in=div_in,
                base_groups=base_groups, div_groups=div_groups,
                need_match=need_match, se_hidden=se_hidden)


def _tdrconv_kernel(cfg,
                    x_ref, mask_ref, wbase_ref, wexp_ref, wdiv_ref,
                    bn1_g_ref, bn1_b_ref, bn2_g_ref, bn2_b_ref,
                    fc1_wT_ref, fc1_b_ref, fc2_wT_ref, fc2_b_ref,
                    y_ref,
                    bn1_sum, bn1_ss, bn2_sum, bn2_ss):
    f32 = jnp.float32
    H, W = cfg["H"], cfg["W"]
    HW = H * W
    TB = cfg["tile_b"]                 # images per tile (tile = whole images)
    TP = TB * HW                       # lane-dense tile width
    n_total = cfg["B"] * HW            # element count behind the BN statistics
    K = cfg["k"]
    r = K // 2
    main_in = cfg["main_in"]
    exp_in = cfg["exp_in"]
    exp_out = cfg["exp_out"]
    base_out = cfg["base_out"]
    div_out = cfg["div_out"]
    out_ch = cfg["out_channels"]
    eps = 1e-5

    ph = pl.program_id(0)              # 0: bn1 stats, 1: bn2 stats, 2: emit
    t = pl.program_id(1)               # batch-tile index

    # static channel split of the (C_in, TP) input tile
    x_m = x_ref[0:main_in, :]          # (main_in, TP)
    x_e = x_ref[main_in:, :]           # (exp_in,  TP)

    # ---- zero the cross-tile stat accumulators once -------------------------
    @pl.when(jnp.logical_and(ph == 0, t == 0))
    def _():
        bn1_sum[...] = jnp.zeros_like(bn1_sum)
        bn1_ss[...] = jnp.zeros_like(bn1_ss)
        bn2_sum[...] = jnp.zeros_like(bn2_sum)
        bn2_ss[...] = jnp.zeros_like(bn2_ss)

    # ---- helpers -------------------------------------------------------------
    def accum_stats(sum_ref, ss_ref, lo, v):
        hi = lo + v.shape[0]
        sum_ref[lo:hi, :] += jnp.sum(v, axis=1, keepdims=True)
        ss_ref[lo:hi, :] += jnp.sum(v * v, axis=1, keepdims=True)

    def bn_fold(sum_ref, ss_ref, g_ref, b_ref, lo, hi):
        # training-mode BN (biased variance), folded to one FMA per element
        inv_n = 1.0 / n_total
        mu = sum_ref[lo:hi, :] * inv_n
        var = ss_ref[lo:hi, :] * inv_n - mu * mu
        scale = g_ref[lo:hi, :] * lax.rsqrt(var + eps)
        shift = b_ref[lo:hi, :] - mu * scale
        return scale, shift

    def expand_1x1():
        # 1x1 conv, contraction depth exp_in (=2): VPU broadcast-FMA, exact f32
        acc = wexp_ref[:, 0:1] * x_e[0:1, :]
        for j in range(1, exp_in):
            acc = acc + wexp_ref[:, j:j + 1] * x_e[j:j + 1, :]
        return acc                                             # (exp_out, TP)

    def stacked_taps(pieces):
        # (K*K*sum(Ci), TP) stacked buffer of shifted + halo-masked slabs.
        # Channel order inside a tap is the concatenation of `pieces`; taps are
        # the outer grouping -> matches the fused (Cout, K*K*Cin) weights.
        rows = []
        for kh in range(K):
            for kw in range(K):
                off = (kh - r) * W + (kw - r)
                if off == 0:
                    rows.extend(pieces)
                else:
                    m = mask_ref[kh:kh + 1, :] * mask_ref[K + kw:K + kw + 1, :]
                    shift = (-off) % TP
                    for p in pieces:
                        rows.append(pltpu.roll(p, shift, 1) * m)
        return jnp.concatenate(rows, axis=0)

    def pre_bn2():
        # everything up to (but excluding) bn2: y_e, y_sc, y_gwc
        y_e = expand_1x1()
        s1m, b1m = bn_fold(bn1_sum, bn1_ss, bn1_g_ref, bn1_b_ref, 0, main_in)
        s1e, b1e = bn_fold(bn1_sum, bn1_ss, bn1_g_ref, bn1_b_ref,
                           main_in, main_in + exp_out)
        xg_m = x_m * s1m + b1m                                 # bn1 on x_m part
        xg_e = y_e * s1e + b1e                                 # bn1 on y_e part
        # tap-fused single-matmul convolutions (default precision: bf16 in /
        # f32 accumulate on the MXU)
        y_sc = jnp.dot(wbase_ref[...], stacked_taps([x_m]),
                       preferred_element_type=f32)             # (base_out, TP)
        y_gwc = jnp.dot(wdiv_ref[...], stacked_taps([xg_m, xg_e]),
                        preferred_element_type=f32)            # (div_out,  TP)
        return y_e, y_sc, y_gwc

    # ---- phase 0: bn1 statistics over [x_m ; y_e] ----------------------------
    @pl.when(ph == 0)
    def _():
        y_e = expand_1x1()
        accum_stats(bn1_sum, bn1_ss, 0, x_m)
        accum_stats(bn1_sum, bn1_ss, main_in, y_e)

    # ---- phase 1: convolutions, bn2 statistics over [y_sc ; y_gwc] -----------
    @pl.when(ph == 1)
    def _():
        _, y_sc, y_gwc = pre_bn2()
        accum_stats(bn2_sum, bn2_ss, 0, y_sc)
        accum_stats(bn2_sum, bn2_ss, base_out, y_gwc)

    # ---- phase 2: bn2 normalize + SE + output (y_ref only written here; the
    #      garbage writebacks of earlier phases are overwritten) ---------------
    @pl.when(ph == 2)
    def _():
        y_e, y_sc, y_gwc = pre_bn2()
        s2a, b2a = bn_fold(bn2_sum, bn2_ss, bn2_g_ref, bn2_b_ref, 0, base_out)
        s2b, b2b = bn_fold(bn2_sum, bn2_ss, bn2_g_ref, bn2_b_ref, base_out, out_ch)
        ym_a = y_sc * s2a + b2a                                # (base_out, TP)
        ym_b = y_gwc * s2b + b2b                               # (div_out,  TP)

        # SE: per-image global average pool (tiles hold whole images), tiny FC
        # matmuls on the (out_ch, TB) pooled slab, sigmoid, broadcast scale.
        if TB == 1:
            pooled = jnp.concatenate(
                [jnp.mean(ym_a, axis=1, keepdims=True),
                 jnp.mean(ym_b, axis=1, keepdims=True)], axis=0)    # (out_ch, 1)
        else:
            pa = jnp.mean(ym_a.reshape(base_out, TB, HW), axis=2)
            pb = jnp.mean(ym_b.reshape(div_out, TB, HW), axis=2)
            pooled = jnp.concatenate([pa, pb], axis=0)              # (out_ch, TB)
        h = jnp.maximum(
            jnp.dot(fc1_wT_ref[...], pooled, preferred_element_type=f32)
            + fc1_b_ref[...], 0.0)
        s = jax.nn.sigmoid(
            jnp.dot(fc2_wT_ref[...], h, preferred_element_type=f32)
            + fc2_b_ref[...])                                       # (out_ch, TB)
        if TB == 1:
            sa, sb = s[0:base_out, :], s[base_out:, :]
        else:
            s_full = jnp.broadcast_to(s[:, :, None],
                                      (out_ch, TB, HW)).reshape(out_ch, TP)
            sa, sb = s_full[0:base_out, :], s_full[base_out:, :]

        # need_match == False  ->  y = y_m * se + y_e  (lane-dense stores)
        y_ref[0:base_out, :] = ym_a * sa + y_e[0:base_out, :]
        y_ref[base_out:, :] = ym_b * sb + y_e[base_out:, :]


def tdrconv_forward(x, params, cfg, tile_b=1):
    assert cfg["stride"] == 1, "TODO(synk): stride==2 (avg-pool) path not implemented"
    assert cfg["exp_in"] > 0 and cfg["div_out"] > 0
    assert not cfg["need_match"] and cfg["base_groups"] == 1
    B, C_in, H, W = x.shape
    HW = H * W
    P = B * HW
    assert B % tile_b == 0, "tile_b must divide the batch"
    TP = tile_b * HW
    K = cfg["k"]
    r = K // 2
    f32 = jnp.float32

    # lane-dense layout: (C, B*H*W) slabs (layout plumbing stays in the wrapper)
    x_slab = x.transpose(1, 0, 2, 3).reshape(C_in, P)

    # fused tap-major weights: (Cout, K*K*Cin) with taps outer / channels inner
    w_base_f = params["w_base"].transpose(0, 2, 3, 1).reshape(
        cfg["base_out"], K * K * cfg["main_in"])
    w_exp = params["w_exp"][:, :, 0, 0]                        # (exp_out, exp_in)

    # dense block-diagonal weights for the grouped diversity conv — vectorized
    # construction (no per-output-channel .at[].set() chain)
    g = cfg["div_groups"]
    ipg = cfg["div_in"] // g
    opg = cfg["div_out"] // g
    w_grp = params["w_div"].reshape(g, opg, ipg, K, K)
    eye = jnp.eye(g, dtype=w_grp.dtype)
    w_div_dense = jnp.einsum("ab,aojhw->aobjhw", eye, w_grp).reshape(
        cfg["div_out"], cfg["div_in"], K, K)
    w_div_f = w_div_dense.transpose(0, 2, 3, 1).reshape(
        cfg["div_out"], K * K * cfg["div_in"])

    # separable halo masks for one tile (rows 0..K-1: row masks, K..2K-1: col
    # masks).  Tiles hold whole images, so the pattern is tile-invariant.
    idx = np.arange(TP)
    hh = (idx % HW) // W
    ww = idx % W
    rows = [((hh + (kh - r) >= 0) & (hh + (kh - r) < H)) for kh in range(K)]
    cols = [((ww + (kw - r) >= 0) & (ww + (kw - r) < W)) for kw in range(K)]
    halo_masks = jnp.asarray(np.stack(rows + cols).astype(np.float32))  # (2K, TP)

    bn1_g = params["bn1_gamma"].reshape(-1, 1)
    bn1_b = params["bn1_beta"].reshape(-1, 1)
    bn2_g = params["bn2_gamma"].reshape(-1, 1)
    bn2_b = params["bn2_beta"].reshape(-1, 1)
    fc1_wT = params["fc1_w"].T                                 # (hid, out_ch)
    fc1_b = params["fc1_b"].reshape(-1, 1)
    fc2_wT = params["fc2_w"].T                                 # (out_ch, hid)
    fc2_b = params["fc2_b"].reshape(-1, 1)

    kcfg = dict(cfg)
    kcfg.update(B=B, H=H, W=W, tile_b=tile_b)
    kernel = functools.partial(_tdrconv_kernel, kcfg)

    n_tiles = B // tile_b
    grid = (3, n_tiles)                # (phase, batch tile), phase-major order

    def tiled(shape):
        return pl.BlockSpec(shape, lambda ph, t: (0, t))

    def whole(arr):
        return pl.BlockSpec(arr.shape, lambda ph, t: (0, 0))

    in_specs = [
        tiled((C_in, TP)),                                     # x (pipelined)
        whole(halo_masks),
        whole(w_base_f), whole(w_exp), whole(w_div_f),
        whole(bn1_g), whole(bn1_b), whole(bn2_g), whole(bn2_b),
        whole(fc1_wT), whole(fc1_b), whole(fc2_wT), whole(fc2_b),
    ]
    out_spec = tiled((cfg["out_channels"], TP))

    # advisory cost for XLA scheduling (convs run in phases 1 and 2)
    flops = 4 * P * (cfg["base_out"] * K * K * cfg["main_in"]
                     + cfg["div_out"] * K * K * cfg["div_in"]
                     + cfg["exp_out"] * cfg["exp_in"])
    bytes_accessed = 4 * (3 * C_in * P + cfg["out_channels"] * P)
    cost = pl.CostEstimate(flops=flops,
                           transcendentals=cfg["out_channels"] * B,
                           bytes_accessed=bytes_accessed)

    grid_spec = pltpu.PrefetchScalarGridSpec(
        num_scalar_prefetch=0,
        grid=grid,
        in_specs=in_specs,
        out_specs=out_spec,
        scratch_shapes=[
            pltpu.VMEM((cfg["div_in"], 1), f32),               # bn1 sum
            pltpu.VMEM((cfg["div_in"], 1), f32),               # bn1 sum of sq
            pltpu.VMEM((cfg["out_channels"], 1), f32),         # bn2 sum
            pltpu.VMEM((cfg["out_channels"], 1), f32),         # bn2 sum of sq
        ])

    y_slab = pl.pallas_call(
        kernel,
        out_shape=jax.ShapeDtypeStruct((cfg["out_channels"], P), f32),
        grid_spec=grid_spec,
        compiler_params=pltpu.CompilerParams(
            # Both axes "arbitrary": phases are ordered and the BN stat
            # accumulators are carried across batch tiles.
            # TODO(synk): per-core partial stats + a merge step would let the
            # tile axis be "parallel" (use the 2nd TensorCore on v7x).
            dimension_semantics=("arbitrary", "arbitrary"),
            vmem_limit_bytes=32 * 1024 * 1024),
        cost_estimate=cost,
    )(x_slab, halo_masks, w_base_f, w_exp, w_div_f,
      bn1_g, bn1_b, bn2_g, bn2_b, fc1_wT, fc1_b, fc2_wT, fc2_b)

    # back to NCHW
    return y_slab.reshape(cfg["out_channels"], B, H, W).transpose(1, 0, 2, 3)


def ref_forward(x, params, cfg, eps=1e-5):
    """Pure-JAX reference mirroring TDRConv.forward (training-mode BN)."""
    dn = ("NCHW", "OIHW", "NCHW")
    prec = lax.Precision.HIGHEST
    main_in = cfg["main_in"]
    x_m = x[:, :main_in]
    x_e = x[:, main_in:]

    y_sc = lax.conv_general_dilated(x_m, params["w_base"], (1, 1), ((1, 1), (1, 1)),
                                    dimension_numbers=dn, precision=prec)
    y_e = lax.conv_general_dilated(x_e, params["w_exp"], (1, 1), ((0, 0), (0, 0)),
                                   dimension_numbers=dn, precision=prec)

    def bn(v, gamma, beta):
        mu = jnp.mean(v, axis=(0, 2, 3), keepdims=True)
        var = jnp.mean((v - mu) ** 2, axis=(0, 2, 3), keepdims=True)
        return ((v - mu) / jnp.sqrt(var + eps) * gamma[None, :, None, None]
                + beta[None, :, None, None])

    x_gwc = bn(jnp.concatenate([x_m, y_e], axis=1),
               params["bn1_gamma"], params["bn1_beta"])
    y_gwc = lax.conv_general_dilated(x_gwc, params["w_div"], (1, 1), ((1, 1), (1, 1)),
                                     dimension_numbers=dn,
                                     feature_group_count=cfg["div_groups"],
                                     precision=prec)
    y_m = bn(jnp.concatenate([y_sc, y_gwc], axis=1),
             params["bn2_gamma"], params["bn2_beta"])
    w = jnp.mean(y_m, axis=(2, 3))
    h = jnp.maximum(w @ params["fc1_w"] + params["fc1_b"], 0.0)
    s = jax.nn.sigmoid(h @ params["fc2_w"] + params["fc2_b"])
    y = y_m * s[:, :, None, None] + y_e
    return y[:, :cfg["out_channels"]]


if __name__ == "__main__":
    B, C_in, C_out, H, W = 2, 4, 4, 16, 16
    cfg = tdr_config(C_in, C_out)

    key = jax.random.PRNGKey(0)
    ks = jax.random.split(key, 12)
    k = cfg["k"]
    params = {
        "w_base": 0.3 * jax.random.normal(ks[0], (cfg["base_out"], cfg["main_in"], k, k), jnp.float32),
        "w_exp": 0.3 * jax.random.normal(ks[1], (cfg["exp_out"], cfg["exp_in"], 1, 1), jnp.float32),
        "w_div": 0.3 * jax.random.normal(ks[2], (cfg["div_out"], cfg["div_in"] // cfg["div_groups"], k, k), jnp.float32),
        "bn1_gamma": 1.0 + 0.1 * jax.random.normal(ks[3], (cfg["div_in"],), jnp.float32),
        "bn1_beta": 0.1 * jax.random.normal(ks[4], (cfg["div_in"],), jnp.float32),
        "bn2_gamma": 1.0 + 0.1 * jax.random.normal(ks[5], (C_out,), jnp.float32),
        "bn2_beta": 0.1 * jax.random.normal(ks[6], (C_out,), jnp.float32),
        "fc1_w": 0.3 * jax.random.normal(ks[7], (C_out, cfg["se_hidden"]), jnp.float32),
        "fc1_b": 0.1 * jax.random.normal(ks[8], (cfg["se_hidden"],), jnp.float32),
        "fc2_w": 0.3 * jax.random.normal(ks[9], (cfg["se_hidden"], C_out), jnp.float32),
        "fc2_b": 0.1 * jax.random.normal(ks[10], (C_out,), jnp.float32),
    }
    x = jax.random.normal(ks[11], (B, C_in, H, W), jnp.float32)

    y = jax.block_until_ready(tdrconv_forward(x, params, cfg, tile_b=1))
    y_ref = jax.block_until_ready(ref_forward(x, params, cfg))

    err = float(jnp.max(jnp.abs(y - y_ref)))
    # Kernel matmuls run at default MXU precision (bf16 operands, f32 accum)
    # per the perf review; the reference uses f32 HIGHEST, so allow ~1e-2
    # absolute on O(1) outputs (observed error is a few 1e-3).
    if not (err < 1e-2):
        raise AssertionError(f"Pallas kernel mismatch vs reference: max abs err {err}")
    print("KERNEL_OK")
</pallas_src>

<mosaic_0001>
module attributes {stable_mosaic.version = 11 : i64} {
  func.func @_tdrconv_kernel(%arg0: i32, %arg1: i32, %arg2: memref<4x256xf32, #tpu.memory_space<vmem>>, %arg3: memref<6x256xf32, #tpu.memory_space<vmem>>, %arg4: memref<2x18xf32, #tpu.memory_space<vmem>>, %arg5: memref<4x2xf32, #tpu.memory_space<vmem>>, %arg6: memref<2x54xf32, #tpu.memory_space<vmem>>, %arg7: memref<6x1xf32, #tpu.memory_space<vmem>>, %arg8: memref<6x1xf32, #tpu.memory_space<vmem>>, %arg9: memref<4x1xf32, #tpu.memory_space<vmem>>, %arg10: memref<4x1xf32, #tpu.memory_space<vmem>>, %arg11: memref<2x4xf32, #tpu.memory_space<vmem>>, %arg12: memref<2x1xf32, #tpu.memory_space<vmem>>, %arg13: memref<4x2xf32, #tpu.memory_space<vmem>>, %arg14: memref<4x1xf32, #tpu.memory_space<vmem>>, %arg15: memref<4x256xf32, #tpu.memory_space<vmem>>, %arg16: memref<6x1xf32, #tpu.memory_space<vmem>>, %arg17: memref<6x1xf32, #tpu.memory_space<vmem>>, %arg18: memref<4x1xf32, #tpu.memory_space<vmem>>, %arg19: memref<4x1xf32, #tpu.memory_space<vmem>>) attributes {dimension_semantics = [#tpu.dimension_semantics<arbitrary>, #tpu.dimension_semantics<arbitrary>], iteration_bounds = array<i64: 3, 2>, scalar_prefetch = 0 : i64, scratch_operands = 4 : i64, tpu.core_type = #tpu.core_type<tc>, window_params = [{transform_indices = @transform_0, window_bounds = array<i64: 4, 256>}, {pipeline_mode = #tpu.pipeline_mode<synchronous>, transform_indices = @transform_1, window_bounds = array<i64: 6, 256>}, {pipeline_mode = #tpu.pipeline_mode<synchronous>, transform_indices = @transform_2, window_bounds = array<i64: 2, 18>}, {pipeline_mode = #tpu.pipeline_mode<synchronous>, transform_indices = @transform_3, window_bounds = array<i64: 4, 2>}, {pipeline_mode = #tpu.pipeline_mode<synchronous>, transform_indices = @transform_4, window_bounds = array<i64: 2, 54>}, {pipeline_mode = #tpu.pipeline_mode<synchronous>, transform_indices = @transform_5, window_bounds = array<i64: 6, 1>}, {pipeline_mode = #tpu.pipeline_mode<synchronous>, transform_indices = @transform_6, window_bounds = array<i64: 6, 1>}, {pipeline_mode = #tpu.pipeline_mode<synchronous>, transform_indices = @transform_7, window_bounds = array<i64: 4, 1>}, {pipeline_mode = #tpu.pipeline_mode<synchronous>, transform_indices = @transform_8, window_bounds = array<i64: 4, 1>}, {pipeline_mode = #tpu.pipeline_mode<synchronous>, transform_indices = @transform_9, window_bounds = array<i64: 2, 4>}, {pipeline_mode = #tpu.pipeline_mode<synchronous>, transform_indices = @transform_10, window_bounds = array<i64: 2, 1>}, {pipeline_mode = #tpu.pipeline_mode<synchronous>, transform_indices = @transform_11, window_bounds = array<i64: 4, 2>}, {pipeline_mode = #tpu.pipeline_mode<synchronous>, transform_indices = @transform_12, window_bounds = array<i64: 4, 1>}, {transform_indices = @transform_13, window_bounds = array<i64: 4, 256>}]} {
    %c0 = arith.constant 0 : index
    %c0_0 = arith.constant 0 : index
    %0 = vector.load %arg2[%c0, %c0_0] : memref<4x256xf32, #tpu.memory_space<vmem>>, vector<2x256xf32>
    %c2 = arith.constant 2 : index
    %c0_1 = arith.constant 0 : index
    %1 = vector.load %arg2[%c2, %c0_1] : memref<4x256xf32, #tpu.memory_space<vmem>>, vector<2x256xf32>
    %c0_i32 = arith.constant 0 : i32
    %2 = arith.cmpi eq, %arg0, %c0_i32 : i32
    %c0_i32_2 = arith.constant 0 : i32
    %3 = arith.cmpi eq, %arg1, %c0_i32_2 : i32
    %4 = arith.andi %2, %3 : i1
    %5 = arith.extui %4 : i1 to i32
    %c0_i32_3 = arith.constant 0 : i32
    %6 = arith.cmpi ne, %5, %c0_i32_3 : i32
    scf.if %6 {
      %cst = arith.constant 0.000000e+00 : f32
      %16 = vector.broadcast %cst : f32 to vector<6x1xf32>
      %c0_8 = arith.constant 0 : index
      %c0_9 = arith.constant 0 : index
      %17 = vector.load %arg16[%c0_8, %c0_9] : memref<6x1xf32, #tpu.memory_space<vmem>>, vector<6x1xf32>
      tpu.vector_store %arg16[%c0_8, %c0_9], %16 {strides = array<i32>} : memref<6x1xf32, #tpu.memory_space<vmem>>, vector<6x1xf32>,
      %cst_10 = arith.constant 0.000000e+00 : f32
      %18 = vector.broadcast %cst_10 : f32 to vector<6x1xf32>
      %c0_11 = arith.constant 0 : index
      %c0_12 = arith.constant 0 : index
      %19 = vector.load %arg17[%c0_11, %c0_12] : memref<6x1xf32, #tpu.memory_space<vmem>>, vector<6x1xf32>
      tpu.vector_store %arg17[%c0_11, %c0_12], %18 {strides = array<i32>} : memref<6x1xf32, #tpu.memory_space<vmem>>, vector<6x1xf32>,
      %cst_13 = arith.constant 0.000000e+00 : f32
      %20 = vector.broadcast %cst_13 : f32 to vector<4x1xf32>
      %c0_14 = arith.constant 0 : index
      %c0_15 = arith.constant 0 : index
      %21 = vector.load %arg18[%c0_14, %c0_15] : memref<4x1xf32, #tpu.memory_space<vmem>>, vector<4x1xf32>
      tpu.vector_store %arg18[%c0_14, %c0_15], %20 {strides = array<i32>} : memref<4x1xf32, #tpu.memory_space<vmem>>, vector<4x1xf32>,
      %cst_16 = arith.constant 0.000000e+00 : f32
      %22 = vector.broadcast %cst_16 : f32 to vector<4x1xf32>
      %c0_17 = arith.constant 0 : index
      %c0_18 = arith.constant 0 : index
      %23 = vector.load %arg19[%c0_17, %c0_18] : memref<4x1xf32, #tpu.memory_space<vmem>>, vector<4x1xf32>
      tpu.vector_store %arg19[%c0_17, %c0_18], %22 {strides = array<i32>} : memref<4x1xf32, #tpu.memory_space<vmem>>, vector<4x1xf32>,
    } else {
    }
    %c0_i32_4 = arith.constant 0 : i32
    %7 = arith.cmpi eq, %arg0, %c0_i32_4 : i32
    %8 = arith.extui %7 : i1 to i32
    %c0_i32_5 = arith.constant 0 : i32
    %9 = arith.cmpi ne, %8, %c0_i32_5 : i32
    scf.if %9 {
      %c0_8 = arith.constant 0 : index
      %c0_9 = arith.constant 0 : index
      %16 = vector.load %arg5[%c0_8, %c0_9] : memref<4x2xf32, #tpu.memory_space<vmem>>, vector<4x1xf32>
      %17 = vector.extract_strided_slice %1 {offsets = [0, 0], sizes = [1, 256], strides = [1, 1]} : vector<2x256xf32> to vector<1x256xf32>
      %18 = vector.broadcast %16 : vector<4x1xf32> to vector<4x256xf32>
      %19 = vector.broadcast %17 : vector<1x256xf32> to vector<4x256xf32>
      %20 = arith.mulf %18, %19 : vector<4x256xf32>
      %c0_10 = arith.constant 0 : index
      %c1 = arith.constant 1 : index
      %21 = vector.load %arg5[%c0_10, %c1] : memref<4x2xf32, #tpu.memory_space<vmem>>, vector<4x1xf32>
      %22 = vector.extract_strided_slice %1 {offsets = [1, 0], sizes = [1, 256], strides = [1, 1]} : vector<2x256xf32> to vector<1x256xf32>
      %23 = vector.broadcast %21 : vector<4x1xf32> to vector<4x256xf32>
      %24 = vector.broadcast %22 : vector<1x256xf32> to vector<4x256xf32>
      %25 = arith.mulf %23, %24 : vector<4x256xf32>
      %26 = arith.addf %20, %25 : vector<4x256xf32>
      %c0_11 = arith.constant 0 : index
      %c0_12 = arith.constant 0 : index
      %27 = vector.load %arg16[%c0_11, %c0_12] : memref<6x1xf32, #tpu.memory_space<vmem>>, vector<2x1xf32>
      %cst = arith.constant dense<0.000000e+00> : vector<2xf32>
      %28 = vector.multi_reduction <add>, %0, %cst [1] : vector<2x256xf32> to vector<2xf32>
      %29 = vector.shape_cast %28 : vector<2xf32> to vector<2x1xf32>
      %30 = arith.addf %27, %29 : vector<2x1xf32>
      %c0_13 = arith.constant 0 : index
      %c0_14 = arith.constant 0 : index
      %31 = vector.load %arg16[%c0_13, %c0_14] : memref<6x1xf32, #tpu.memory_space<vmem>>, vector<2x1xf32>
      tpu.vector_store %arg16[%c0_13, %c0_14], %30 {strides = array<i32>} : memref<6x1xf32, #tpu.memory_space<vmem>>, vector<2x1xf32>,
      %c0_15 = arith.constant 0 : index
      %c0_16 = arith.constant 0 : index
      %32 = vector.load %arg17[%c0_15, %c0_16] : memref<6x1xf32, #tpu.memory_space<vmem>>, vector<2x1xf32>
      %33 = arith.mulf %0, %0 : vector<2x256xf32>
      %cst_17 = arith.constant dense<0.000000e+00> : vector<2xf32>
      %34 = vector.multi_reduction <add>, %33, %cst_17 [1] : vector<2x256xf32> to vector<2xf32>
      %35 = vector.shape_cast %34 : vector<2xf32> to vector<2x1xf32>
      %36 = arith.addf %32, %35 : vector<2x1xf32>
      %c0_18 = arith.constant 0 : index
      %c0_19 = arith.constant 0 : index
      %37 = vector.load %arg17[%c0_18, %c0_19] : memref<6x1xf32, #tpu.memory_space<vmem>>, vector<2x1xf32>
      tpu.vector_store %arg17[%c0_18, %c0_19], %36 {strides = array<i32>} : memref<6x1xf32, #tpu.memory_space<vmem>>, vector<2x1xf32>,
      %c2_20 = arith.constant 2 : index
      %c0_21 = arith.constant 0 : index
      %38 = vector.load %arg16[%c2_20, %c0_21] : memref<6x1xf32, #tpu.memory_space<vmem>>, vector<4x1xf32>
      %cst_22 = arith.constant dense<0.000000e+00> : vector<4xf32>
      %39 = vector.multi_reduction <add>, %26, %cst_22 [1] : vector<4x256xf32> to vector<4xf32>
      %40 = vector.shape_cast %39 : vector<4xf32> to vector<4x1xf32>
      %41 = arith.addf %38, %40 : vector<4x1xf32>
      %c2_23 = arith.constant 2 : index
      %c0_24 = arith.constant 0 : index
      %42 = vector.load %arg16[%c2_23, %c0_24] : memref<6x1xf32, #tpu.memory_space<vmem>>, vector<4x1xf32>
      tpu.vector_store %arg16[%c2_23, %c0_24], %41 {strides = array<i32>} : memref<6x1xf32, #tpu.memory_space<vmem>>, vector<4x1xf32>,
      %c2_25 = arith.constant 2 : index
      %c0_26 = arith.constant 0 : index
      %43 = vector.load %arg17[%c2_25, %c0_26] : memref<6x1xf32, #tpu.memory_space<vmem>>, vector<4x1xf32>
      %44 = arith.mulf %26, %26 : vector<4x256xf32>
      %cst_27 = arith.constant dense<0.000000e+00> : vector<4xf32>
      %45 = vector.multi_reduction <add>, %44, %cst_27 [1] : vector<4x256xf32> to vector<4xf32>
      %46 = vector.shape_cast %45 : vector<4xf32> to vector<4x1xf32>
      %47 = arith.addf %43, %46 : vector<4x1xf32>
      %c2_28 = arith.constant 2 : index
      %c0_29 = arith.constant 0 : index
      %48 = vector.load %arg17[%c2_28, %c0_29] : memref<6x1xf32, #tpu.memory_space<vmem>>, vector<4x1xf32>
      tpu.vector_store %arg17[%c2_28, %c0_29], %47 {strides = array<i32>} : memref<6x1xf32, #tpu.memory_space<vmem>>, vector<4x1xf32>,
    } else {
    }
    %c1_i32 = arith.constant 1 : i32
    %10 = arith.cmpi eq, %arg0, %c1_i32 : i32
    %11 = arith.extui %10 : i1 to i32
    %c0_i32_6 = arith.constant 0 : i32
    %12 = arith.cmpi ne, %11, %c0_i32_6 : i32
    scf.if %12 {
      %c0_8 = arith.constant 0 : index
      %c0_9 = arith.constant 0 : index
      %16 = vector.load %arg5[%c0_8, %c0_9] : memref<4x2xf32, #tpu.memory_space<vmem>>, vector<4x1xf32>
      %17 = vector.extract_strided_slice %1 {offsets = [0, 0], sizes = [1, 256], strides = [1, 1]} : vector<2x256xf32> to vector<1x256xf32>
      %18 = vector.broadcast %16 : vector<4x1xf32> to vector<4x256xf32>
      %19 = vector.broadcast %17 : vector<1x256xf32> to vector<4x256xf32>
      %20 = arith.mulf %18, %19 : vector<4x256xf32>
      %c0_10 = arith.constant 0 : index
      %c1 = arith.constant 1 : index
      %21 = vector.load %arg5[%c0_10, %c1] : memref<4x2xf32, #tpu.memory_space<vmem>>, vector<4x1xf32>
      %22 = vector.extract_strided_slice %1 {offsets = [1, 0], sizes = [1, 256], strides = [1, 1]} : vector<2x256xf32> to vector<1x256xf32>
      %23 = vector.broadcast %21 : vector<4x1xf32> to vector<4x256xf32>
      %24 = vector.broadcast %22 : vector<1x256xf32> to vector<4x256xf32>
      %25 = arith.mulf %23, %24 : vector<4x256xf32>
      %26 = arith.addf %20, %25 : vector<4x256xf32>
      %c0_11 = arith.constant 0 : index
      %c0_12 = arith.constant 0 : index
      %27 = vector.load %arg16[%c0_11, %c0_12] : memref<6x1xf32, #tpu.memory_space<vmem>>, vector<2x1xf32>
      %cst = arith.constant 0.001953125 : f32
      %28 = vector.broadcast %cst : f32 to vector<2x1xf32>
      %29 = arith.mulf %27, %28 : vector<2x1xf32>
      %c0_13 = arith.constant 0 : index
      %c0_14 = arith.constant 0 : index
      %30 = vector.load %arg17[%c0_13, %c0_14] : memref<6x1xf32, #tpu.memory_space<vmem>>, vector<2x1xf32>
      %cst_15 = arith.constant 0.001953125 : f32
      %31 = vector.broadcast %cst_15 : f32 to vector<2x1xf32>
      %32 = arith.mulf %30, %31 : vector<2x1xf32>
      %33 = arith.mulf %29, %29 : vector<2x1xf32>
      %34 = arith.subf %32, %33 : vector<2x1xf32>
      %c0_16 = arith.constant 0 : index
      %c0_17 = arith.constant 0 : index
      %35 = vector.load %arg7[%c0_16, %c0_17] : memref<6x1xf32, #tpu.memory_space<vmem>>, vector<2x1xf32>
      %cst_18 = arith.constant 9.99999974E-6 : f32
      %36 = vector.broadcast %cst_18 : f32 to vector<2x1xf32>
      %37 = arith.addf %34, %36 : vector<2x1xf32>
      %38 = math.rsqrt %37 : vector<2x1xf32>
      %39 = arith.mulf %35, %38 : vector<2x1xf32>
      %c0_19 = arith.constant 0 : index
      %c0_20 = arith.constant 0 : index
      %40 = vector.load %arg8[%c0_19, %c0_20] : memref<6x1xf32, #tpu.memory_space<vmem>>, vector<2x1xf32>
      %41 = arith.mulf %29, %39 : vector<2x1xf32>
      %42 = arith.subf %40, %41 : vector<2x1xf32>
      %c2_21 = arith.constant 2 : index
      %c0_22 = arith.constant 0 : index
      %43 = vector.load %arg16[%c2_21, %c0_22] : memref<6x1xf32, #tpu.memory_space<vmem>>, vector<4x1xf32>
      %cst_23 = arith.constant 0.001953125 : f32
      %44 = vector.broadcast %cst_23 : f32 to vector<4x1xf32>
      %45 = arith.mulf %43, %44 : vector<4x1xf32>
      %c2_24 = arith.constant 2 : index
      %c0_25 = arith.constant 0 : index
      %46 = vector.load %arg17[%c2_24, %c0_25] : memref<6x1xf32, #tpu.memory_space<vmem>>, vector<4x1xf32>
      %cst_26 = arith.constant 0.001953125 : f32
      %47 = vector.broadcast %cst_26 : f32 to vector<4x1xf32>
      %48 = arith.mulf %46, %47 : vector<4x1xf32>
      %49 = arith.mulf %45, %45 : vector<4x1xf32>
      %50 = arith.subf %48, %49 : vector<4x1xf32>
      %c2_27 = arith.constant 2 : index
      %c0_28 = arith.constant 0 : index
      %51 = vector.load %arg7[%c2_27, %c0_28] : memref<6x1xf32, #tpu.memory_space<vmem>>, vector<4x1xf32>
      %cst_29 = arith.constant 9.99999974E-6 : f32
      %52 = vector.broadcast %cst_29 : f32 to vector<4x1xf32>
      %53 = arith.addf %50, %52 : vector<4x1xf32>
      %54 = math.rsqrt %53 : vector<4x1xf32>
      %55 = arith.mulf %51, %54 : vector<4x1xf32>
      %c2_30 = arith.constant 2 : index
      %c0_31 = arith.constant 0 : index
      %56 = vector.load %arg8[%c2_30, %c0_31] : memref<6x1xf32, #tpu.memory_space<vmem>>, vector<4x1xf32>
      %57 = arith.mulf %45, %55 : vector<4x1xf32>
      %58 = arith.subf %56, %57 : vector<4x1xf32>
      %59 = vector.broadcast %39 : vector<2x1xf32> to vector<2x256xf32>
      %60 = arith.mulf %0, %59 : vector<2x256xf32>
      %61 = vector.broadcast %42 : vector<2x1xf32> to vector<2x256xf32>
      %62 = arith.addf %60, %61 : vector<2x256xf32>
      %63 = vector.broadcast %55 : vector<4x1xf32> to vector<4x256xf32>
      %64 = arith.mulf %26, %63 : vector<4x256xf32>
      %65 = vector.broadcast %58 : vector<4x1xf32> to vector<4x256xf32>
      %66 = arith.addf %64, %65 : vector<4x256xf32>
      %c0_32 = arith.constant 0 : index
      %c0_33 = arith.constant 0 : index
      %67 = vector.load %arg4[%c0_32, %c0_33] : memref<2x18xf32, #tpu.memory_space<vmem>>, vector<2x18xf32>
      %c0_34 = arith.constant 0 : index
      %c0_35 = arith.constant 0 : index
      %68 = vector.load %arg3[%c0_34, %c0_35] : memref<6x256xf32, #tpu.memory_space<vmem>>, vector<1x256xf32>
      %c3 = arith.constant 3 : index
      %c0_36 = arith.constant 0 : index
      %69 = vector.load %arg3[%c3, %c0_36] : memref<6x256xf32, #tpu.memory_space<vmem>>, vector<1x256xf32>
      %70 = arith.mulf %68, %69 : vector<1x256xf32>
      %c17_i32 = arith.constant 17 : i32
      %71 = tpu.dynamic_rotate %0 by %c17_i32 dim 1 : vector<2x256xf32>, i32 -> vector<2x256xf32>
      %72 = vector.broadcast %70 : vector<1x256xf32> to vector<2x256xf32>
      %73 = arith.mulf %71, %72 : vector<2x256xf32>
      %c0_37 = arith.constant 0 : index
      %c0_38 = arith.constant 0 : index
      %74 = vector.load %arg3[%c0_37, %c0_38] : memref<6x256xf32, #tpu.memory_space<vmem>>, vector<1x256xf32>
      %c4 = arith.constant 4 : index
      %c0_39 = arith.constant 0 : index
      %75 = vector.load %arg3[%c4, %c0_39] : memref<6x256xf32, #tpu.memory_space<vmem>>, vector<1x256xf32>
      %76 = arith.mulf %74, %75 : vector<1x256xf32>
      %c16_i32 = arith.constant 16 : i32
      %77 = tpu.dynamic_rotate %0 by %c16_i32 dim 1 : vector<2x256xf32>, i32 -> vector<2x256xf32>
      %78 = vector.broadcast %76 : vector<1x256xf32> to vector<2x256xf32>
      %79 = arith.mulf %77, %78 : vector<2x256xf32>
      %c0_40 = arith.constant 0 : index
      %c0_41 = arith.constant 0 : index
      %80 = vector.load %arg3[%c0_40, %c0_41] : memref<6x256xf32, #tpu.memory_space<vmem>>, vector<1x256xf32>
      %c5 = arith.constant 5 : index
      %c0_42 = arith.constant 0 : index
      %81 = vector.load %arg3[%c5, %c0_42] : memref<6x256xf32, #tpu.memory_space<vmem>>, vector<1x256xf32>
      %82 = arith.mulf %80, %81 : vector<1x256xf32>
      %c15_i32 = arith.constant 15 : i32
      %83 = tpu.dynamic_rotate %0 by %c15_i32 dim 1 : vector<2x256xf32>, i32 -> vector<2x256xf32>
      %84 = vector.broadcast %82 : vector<1x256xf32> to vector<2x256xf32>
      %85 = arith.mulf %83, %84 : vector<2x256xf32>
      %c1_43 = arith.constant 1 : index
      %c0_44 = arith.constant 0 : index
      %86 = vector.load %arg3[%c1_43, %c0_44] : memref<6x256xf32, #tpu.memory_space<vmem>>, vector<1x256xf32>
      %c3_45 = arith.constant 3 : index
      %c0_46 = arith.constant 0 : index
      %87 = vector.load %arg3[%c3_45, %c0_46] : memref<6x256xf32, #tpu.memory_space<vmem>>, vector<1x256xf32>
      %88 = arith.mulf %86, %87 : vector<1x256xf32>
      %c1_i32_47 = arith.constant 1 : i32
      %89 = tpu.dynamic_rotate %0 by %c1_i32_47 dim 1 : vector<2x256xf32>, i32 -> vector<2x256xf32>
      %90 = vector.broadcast %88 : vector<1x256xf32> to vector<2x256xf32>
      %91 = arith.mulf %89, %90 : vector<2x256xf32>
      %c1_48 = arith.constant 1 : index
      %c0_49 = arith.constant 0 : index
      %92 = vector.load %arg3[%c1_48, %c0_49] : memref<6x256xf32, #tpu.memory_space<vmem>>, vector<1x256xf32>
      %c5_50 = arith.constant 5 : index
      %c0_51 = arith.constant 0 : index
      %93 = vector.load %arg3[%c5_50, %c0_51] : memref<6x256xf32, #tpu.memory_space<vmem>>, vector<1x256xf32>
      %94 = arith.mulf %92, %93 : vector<1x256xf32>
      %c255_i32 = arith.constant 255 : i32
      %95 = tpu.dynamic_rotate %0 by %c255_i32 dim 1 : vector<2x256xf32>, i32 -> vector<2x256xf32>
      %96 = vector.broadcast %94 : vector<1x256xf32> to vector<2x256xf32>
      %97 = arith.mulf %95, %96 : vector<2x256xf32>
      %c2_52 = arith.constant 2 : index
      %c0_53 = arith.constant 0 : index
      %98 = vector.load %arg3[%c2_52, %c0_53] : memref<6x256xf32, #tpu.memory_space<vmem>>, vector<1x256xf32>
      %c3_54 = arith.constant 3 : index
      %c0_55 = arith.constant 0 : index
      %99 = vector.load %arg3[%c3_54, %c0_55] : memref<6x256xf32, #tpu.memory_space<vmem>>, vector<1x256xf32>
      %100 = arith.mulf %98, %99 : vector<1x256xf32>
      %c241_i32 = arith.constant 241 : i32
      %101 = tpu.dynamic_rotate %0 by %c241_i32 dim 1 : vector<2x256xf32>, i32 -> vector<2x256xf32>
      %102 = vector.broadcast %100 : vector<1x256xf32> to vector<2x256xf32>
      %103 = arith.mulf %101, %102 : vector<2x256xf32>
      %c2_56 = arith.constant 2 : index
      %c0_57 = arith.constant 0 : index
      %104 = vector.load %arg3[%c2_56, %c0_57] : memref<6x256xf32, #tpu.memory_space<vmem>>, vector<1x256xf32>
      %c4_58 = arith.constant 4 : index
      %c0_59 = arith.constant 0 : index
      %105 = vector.load %arg3[%c4_58, %c0_59] : memref<6x256xf32, #tpu.memory_space<vmem>>, vector<1x256xf32>
      %106 = arith.mulf %104, %105 : vector<1x256xf32>
      %c240_i32 = arith.constant 240 : i32
      %107 = tpu.dynamic_rotate %0 by %c240_i32 dim 1 : vector<2x256xf32>, i32 -> vector<2x256xf32>
      %108 = vector.broadcast %106 : vector<1x256xf32> to vector<2x256xf32>
      %109 = arith.mulf %107, %108 : vector<2x256xf32>
      %c2_60 = arith.constant 2 : index
      %c0_61 = arith.constant 0 : index
      %110 = vector.load %arg3[%c2_60, %c0_61] : memref<6x256xf32, #tpu.memory_space<vmem>>, vector<1x256xf32>
      %c5_62 = arith.constant 5 : index
      %c0_63 = arith.constant 0 : index
      %111 = vector.load %arg3[%c5_62, %c0_63] : memref<6x256xf32, #tpu.memory_space<vmem>>, vector<1x256xf32>
      %112 = arith.mulf %110, %111 : vector<1x256xf32>
      %c239_i32 = arith.constant 239 : i32
      %113 = tpu.dynamic_rotate %0 by %c239_i32 dim 1 : vector<2x256xf32>, i32 -> vector<2x256xf32>
      %114 = vector.broadcast %112 : vector<1x256xf32> to vector<2x256xf32>
      %115 = arith.mulf %113, %114 : vector<2x256xf32>
      %116 = tpu.concatenate %73, %79, %85, %91, %0, %97, %103, %109, %115 in 0 : vector<2x256xf32>, vector<2x256xf32>, vector<2x256xf32>, vector<2x256xf32>, vector<2x256xf32>, vector<2x256xf32>, vector<2x256xf32>, vector<2x256xf32>, vector<2x256xf32> -> vector<18x256xf32>
      %cst_64 = arith.constant dense<0.000000e+00> : vector<2x256xf32>
      %117 = tpu.matmul %67, %116, %cst_64 {dimension_numbers = #tpu.dot_dimension_numbers<[1], [0], [0], [1], [0, 0, 1, 1], [], []>} : vector<2x18xf32>, vector<18x256xf32>, vector<2x256xf32> -> vector<2x256xf32>
      %c0_65 = arith.constant 0 : index
      %c0_66 = arith.constant 0 : index
      %118 = vector.load %arg6[%c0_65, %c0_66] : memref<2x54xf32, #tpu.memory_space<vmem>>, vector<2x54xf32>
      %c0_67 = arith.constant 0 : index
      %c0_68 = arith.constant 0 : index
      %119 = vector.load %arg3[%c0_67, %c0_68] : memref<6x256xf32, #tpu.memory_space<vmem>>, vector<1x256xf32>
      %c3_69 = arith.constant 3 : index
      %c0_70 = arith.constant 0 : index
      %120 = vector.load %arg3[%c3_69, %c0_70] : memref<6x256xf32, #tpu.memory_space<vmem>>, vector<1x256xf32>
      %121 = arith.mulf %119, %120 : vector<1x256xf32>
      %c17_i32_71 = arith.constant 17 : i32
      %122 = tpu.dynamic_rotate %62 by %c17_i32_71 dim 1 : vector<2x256xf32>, i32 -> vector<2x256xf32>
      %123 = vector.broadcast %121 : vector<1x256xf32> to vector<2x256xf32>
      %124 = arith.mulf %122, %123 : vector<2x256xf32>
      %c17_i32_72 = arith.constant 17 : i32
      %125 = tpu.dynamic_rotate %66 by %c17_i32_72 dim 1 : vector<4x256xf32>, i32 -> vector<4x256xf32>
      %126 = vector.broadcast %121 : vector<1x256xf32> to vector<4x256xf32>
      %127 = arith.mulf %125, %126 : vector<4x256xf32>
      %c0_73 = arith.constant 0 : index
      %c0_74 = arith.constant 0 : index
      %128 = vector.load %arg3[%c0_73, %c0_74] : memref<6x256xf32, #tpu.memory_space<vmem>>, vector<1x256xf32>
      %c4_75 = arith.constant 4 : index
      %c0_76 = arith.constant 0 : index
      %129 = vector.load %arg3[%c4_75, %c0_76] : memref<6x256xf32, #tpu.memory_space<vmem>>, vector<1x256xf32>
      %130 = arith.mulf %128, %129 : vector<1x256xf32>
      %c16_i32_77 = arith.constant 16 : i32
      %131 = tpu.dynamic_rotate %62 by %c16_i32_77 dim 1 : vector<2x256xf32>, i32 -> vector<2x256xf32>
      %132 = vector.broadcast %130 : vector<1x256xf32> to vector<2x256xf32>
      %133 = arith.mulf %131, %132 : vector<2x256xf32>
      %c16_i32_78 = arith.constant 16 : i32
      %134 = tpu.dynamic_rotate %66 by %c16_i32_78 dim 1 : vector<4x256xf32>, i32 -> vector<4x256xf32>
      %135 = vector.broadcast %130 : vector<1x256xf32> to vector<4x256xf32>
      %136 = arith.mulf %134, %135 : vector<4x256xf32>
      %c0_79 = arith.constant 0 : index
      %c0_80 = arith.constant 0 : index
      %137 = vector.load %arg3[%c0_79, %c0_80] : memref<6x256xf32, #tpu.memory_space<vmem>>, vector<1x256xf32>
      %c5_81 = arith.constant 5 : index
      %c0_82 = arith.constant 0 : index
      %138 = vector.load %arg3[%c5_81, %c0_82] : memref<6x256xf32, #tpu.memory_space<vmem>>, vector<1x256xf32>
      %139 = arith.mulf %137, %138 : vector<1x256xf32>
      %c15_i32_83 = arith.constant 15 : i32
      %140 = tpu.dynamic_rotate %62 by %c15_i32_83 dim 1 : vector<2x256xf32>, i32 -> vector<2x256xf32>
      %141 = vector.broadcast %139 : vector<1x256xf32> to vector<2x256xf32>
      %142 = arith.mulf %140, %141 : vector<2x256xf32>
      %c15_i32_84 = arith.constant 15 : i32
      %143 = tpu.dynamic_rotate %66 by %c15_i32_84 dim 1 : vector<4x256xf32>, i32 -> vector<4x256xf32>
      %144 = vector.broadcast %139 : vector<1x256xf32> to vector<4x256xf32>
      %145 = arith.mulf %143, %144 : vector<4x256xf32>
      %c1_85 = arith.constant 1 : index
      %c0_86 = arith.constant 0 : index
      %146 = vector.load %arg3[%c1_85, %c0_86] : memref<6x256xf32, #tpu.memory_space<vmem>>, vector<1x256xf32>
      %c3_87 = arith.constant 3 : index
      %c0_88 = arith.constant 0 : index
      %147 = vector.load %arg3[%c3_87, %c0_88] : memref<6x256xf32, #tpu.memory_space<vmem>>, vector<1x256xf32>
      %148 = arith.mulf %146, %147 : vector<1x256xf32>
      %c1_i32_89 = arith.constant 1 : i32
      %149 = tpu.dynamic_rotate %62 by %c1_i32_89 dim 1 : vector<2x256xf32>, i32 -> vector<2x256xf32>
      %150 = vector.broadcast %148 : vector<1x256xf32> to vector<2x256xf32>
      %151 = arith.mulf %149, %150 : vector<2x256xf32>
      %c1_i32_90 = arith.constant 1 : i32
      %152 = tpu.dynamic_rotate %66 by %c1_i32_90 dim 1 : vector<4x256xf32>, i32 -> vector<4x256xf32>
      %153 = vector.broadcast %148 : vector<1x256xf32> to vector<4x256xf32>
      %154 = arith.mulf %152, %153 : vector<4x256xf32>
      %c1_91 = arith.constant 1 : index
      %c0_92 = arith.constant 0 : index
      %155 = vector.load %arg3[%c1_91, %c0_92] : memref<6x256xf32, #tpu.memory_space<vmem>>, vector<1x256xf32>
      %c5_93 = arith.constant 5 : index
      %c0_94 = arith.constant 0 : index
      %156 = vector.load %arg3[%c5_93, %c0_94] : memref<6x256xf32, #tpu.memory_space<vmem>>, vector<1x256xf32>
      %157 = arith.mulf %155, %156 : vector<1x256xf32>
      %c255_i32_95 = arith.constant 255 : i32
      %158 = tpu.dynamic_rotate %62 by %c255_i32_95 dim 1 : vector<2x256xf32>, i32 -> vector<2x256xf32>
      %159 = vector.broadcast %157 : vector<1x256xf32> to vector<2x256xf32>
      %160 = arith.mulf %158, %159 : vector<2x256xf32>
      %c255_i32_96 = arith.constant 255 : i32
      %161 = tpu.dynamic_rotate %66 by %c255_i32_96 dim 1 : vector<4x256xf32>, i32 -> vector<4x256xf32>
      %162 = vector.broadcast %157 : vector<1x256xf32> to vector<4x256xf32>
      %163 = arith.mulf %161, %162 : vector<4x256xf32>
      %c2_97 = arith.constant 2 : index
      %c0_98 = arith.constant 0 : index
      %164 = vector.load %arg3[%c2_97, %c0_98] : memref<6x256xf32, #tpu.memory_space<vmem>>, vector<1x256xf32>
      %c3_99 = arith.constant 3 : index
      %c0_100 = arith.constant 0 : index
      %165 = vector.load %arg3[%c3_99, %c0_100] : memref<6x256xf32, #tpu.memory_space<vmem>>, vector<1x256xf32>
      %166 = arith.mulf %164, %165 : vector<1x256xf32>
      %c241_i32_101 = arith.constant 241 : i32
      %167 = tpu.dynamic_rotate %62 by %c241_i32_101 dim 1 : vector<2x256xf32>, i32 -> vector<2x256xf32>
      %168 = vector.broadcast %166 : vector<1x256xf32> to vector<2x256xf32>
      %169 = arith.mulf %167, %168 : vector<2x256xf32>
      %c241_i32_102 = arith.constant 241 : i32
      %170 = tpu.dynamic_rotate %66 by %c241_i32_102 dim 1 : vector<4x256xf32>, i32 -> vector<4x256xf32>
      %171 = vector.broadcast %166 : vector<1x256xf32> to vector<4x256xf32>
      %172 = arith.mulf %170, %171 : vector<4x256xf32>
      %c2_103 = arith.constant 2 : index
      %c0_104 = arith.constant 0 : index
      %173 = vector.load %arg3[%c2_103, %c0_104] : memref<6x256xf32, #tpu.memory_space<vmem>>, vector<1x256xf32>
      %c4_105 = arith.constant 4 : index
      %c0_106 = arith.constant 0 : index
      %174 = vector.load %arg3[%c4_105, %c0_106] : memref<6x256xf32, #tpu.memory_space<vmem>>, vector<1x256xf32>
      %175 = arith.mulf %173, %174 : vector<1x256xf32>
      %c240_i32_107 = arith.constant 240 : i32
      %176 = tpu.dynamic_rotate %62 by %c240_i32_107 dim 1 : vector<2x256xf32>, i32 -> vector<2x256xf32>
      %177 = vector.broadcast %175 : vector<1x256xf32> to vector<2x256xf32>
      %178 = arith.mulf %176, %177 : vector<2x256xf32>
      %c240_i32_108 = arith.constant 240 : i32
      %179 = tpu.dynamic_rotate %66 by %c240_i32_108 dim 1 : vector<4x256xf32>, i32 -> vector<4x256xf32>
      %180 = vector.broadcast %175 : vector<1x256xf32> to vector<4x256xf32>
      %181 = arith.mulf %179, %180 : vector<4x256xf32>
      %c2_109 = arith.constant 2 : index
      %c0_110 = arith.constant 0 : index
      %182 = vector.load %arg3[%c2_109, %c0_110] : memref<6x256xf32, #tpu.memory_space<vmem>>, vector<1x256xf32>
      %c5_111 = arith.constant 5 : index
      %c0_112 = arith.constant 0 : index
      %183 = vector.load %arg3[%c5_111, %c0_112] : memref<6x256xf32, #tpu.memory_space<vmem>>, vector<1x256xf32>
      %184 = arith.mulf %182, %183 : vector<1x256xf32>
      %c239_i32_113 = arith.constant 239 : i32
      %185 = tpu.dynamic_rotate %62 by %c239_i32_113 dim 1 : vector<2x256xf32>, i32 -> vector<2x256xf32>
      %186 = vector.broadcast %184 : vector<1x256xf32> to vector<2x256xf32>
      %187 = arith.mulf %185, %186 : vector<2x256xf32>
      %c239_i32_114 = arith.constant 239 : i32
      %188 = tpu.dynamic_rotate %66 by %c239_i32_114 dim 1 : vector<4x256xf32>, i32 -> vector<4x256xf32>
      %189 = vector.broadcast %184 : vector<1x256xf32> to vector<4x256xf32>
      %190 = arith.mulf %188, %189 : vector<4x256xf32>
      %191 = tpu.concatenate %124, %127, %133, %136, %142, %145, %151, %154, %62, %66, %160, %163, %169, %172, %178, %181 in 0 : vector<2x256xf32>, vector<4x256xf32>, vector<2x256xf32>, vector<4x256xf32>, vector<2x256xf32>, vector<4x256xf32>, vector<2x256xf32>, vector<4x256xf32>, vector<2x256xf32>, vector<4x256xf32>, vector<2x256xf32>, vector<4x256xf32>, vector<2x256xf32>, vector<4x256xf32>, vector<2x256xf32>, vector<4x256xf32> -> vector<48x256xf32>
      %192 = tpu.concatenate %187, %190 in 0 : vector<2x256xf32>, vector<4x256xf32> -> vector<6x256xf32>
      %193 = tpu.concatenate %191, %192 in 0 : vector<48x256xf32>, vector<6x256xf32> -> vector<54x256xf32>
      %cst_115 = arith.constant dense<0.000000e+00> : vector<2x256xf32>
      %194 = tpu.matmul %118, %193, %cst_115 {dimension_numbers = #tpu.dot_dimension_numbers<[1], [0], [0], [1], [0, 0, 1, 1], [], []>} : vector<2x54xf32>, vector<54x256xf32>, vector<2x256xf32> -> vector<2x256xf32>
      %c0_116 = arith.constant 0 : index
      %c0_117 = arith.constant 0 : index
      %195 = vector.load %arg18[%c0_116, %c0_117] : memref<4x1xf32, #tpu.memory_space<vmem>>, vector<2x1xf32>
      %cst_118 = arith.constant dense<0.000000e+00> : vector<2xf32>
      %196 = vector.multi_reduction <add>, %117, %cst_118 [1] : vector<2x256xf32> to vector<2xf32>
      %197 = vector.shape_cast %196 : vector<2xf32> to vector<2x1xf32>
      %198 = arith.addf %195, %197 : vector<2x1xf32>
      %c0_119 = arith.constant 0 : index
      %c0_120 = arith.constant 0 : index
      %199 = vector.load %arg18[%c0_119, %c0_120] : memref<4x1xf32, #tpu.memory_space<vmem>>, vector<2x1xf32>
      tpu.vector_store %arg18[%c0_119, %c0_120], %198 {strides = array<i32>} : memref<4x1xf32, #tpu.memory_space<vmem>>, vector<2x1xf32>,
      %c0_121 = arith.constant 0 : index
      %c0_122 = arith.constant 0 : index
      %200 = vector.load %arg19[%c0_121, %c0_122] : memref<4x1xf32, #tpu.memory_space<vmem>>, vector<2x1xf32>
      %201 = arith.mulf %117, %117 : vector<2x256xf32>
      %cst_123 = arith.constant dense<0.000000e+00> : vector<2xf32>
      %202 = vector.multi_reduction <add>, %201, %cst_123 [1] : vector<2x256xf32> to vector<2xf32>
      %203 = vector.shape_cast %202 : vector<2xf32> to vector<2x1xf32>
      %204 = arith.addf %200, %203 : vector<2x1xf32>
      %c0_124 = arith.constant 0 : index
      %c0_125 = arith.constant 0 : index
      %205 = vector.load %arg19[%c0_124, %c0_125] : memref<4x1xf32, #tpu.memory_space<vmem>>, vector<2x1xf32>
      tpu.vector_store %arg19[%c0_124, %c0_125], %204 {strides = array<i32>} : memref<4x1xf32, #tpu.memory_space<vmem>>, vector<2x1xf32>,
      %c2_126 = arith.constant 2 : index
      %c0_127 = arith.constant 0 : index
      %206 = vector.load %arg18[%c2_126, %c0_127] : memref<4x1xf32, #tpu.memory_space<vmem>>, vector<2x1xf32>
      %cst_128 = arith.constant dense<0.000000e+00> : vector<2xf32>
      %207 = vector.multi_reduction <add>, %194, %cst_128 [1] : vector<2x256xf32> to vector<2xf32>
      %208 = vector.shape_cast %207 : vector<2xf32> to vector<2x1xf32>
      %209 = arith.addf %206, %208 : vector<2x1xf32>
      %c2_129 = arith.constant 2 : index
      %c0_130 = arith.constant 0 : index
      %210 = vector.load %arg18[%c2_129, %c0_130] : memref<4x1xf32, #tpu.memory_space<vmem>>, vector<2x1xf32>
      tpu.vector_store %arg18[%c2_129, %c0_130], %209 {strides = array<i32>} : memref<4x1xf32, #tpu.memory_space<vmem>>, vector<2x1xf32>,
      %c2_131 = arith.constant 2 : index
      %c0_132 = arith.constant 0 : index
      %211 = vector.load %arg19[%c2_131, %c0_132] : memref<4x1xf32, #tpu.memory_space<vmem>>, vector<2x1xf32>
      %212 = arith.mulf %194, %194 : vector<2x256xf32>
      %cst_133 = arith.constant dense<0.000000e+00> : vector<2xf32>
      %213 = vector.multi_reduction <add>, %212, %cst_133 [1] : vector<2x256xf32> to vector<2xf32>
      %214 = vector.shape_cast %213 : vector<2xf32> to vector<2x1xf32>
      %215 = arith.addf %211, %214 : vector<2x1xf32>
      %c2_134 = arith.constant 2 : index
      %c0_135 = arith.constant 0 : index
      %216 = vector.load %arg19[%c2_134, %c0_135] : memref<4x1xf32, #tpu.memory_space<vmem>>, vector<2x1xf32>
      tpu.vector_store %arg19[%c2_134, %c0_135], %215 {strides = array<i32>} : memref<4x1xf32, #tpu.memory_space<vmem>>, vector<2x1xf32>,
    } else {
    }
    %c2_i32 = arith.constant 2 : i32
    %13 = arith.cmpi eq, %arg0, %c2_i32 : i32
    %14 = arith.extui %13 : i1 to i32
    %c0_i32_7 = arith.constant 0 : i32
    %15 = arith.cmpi ne, %14, %c0_i32_7 : i32
    scf.if %15 {
      %c0_8 = arith.constant 0 : index
      %c0_9 = arith.constant 0 : index
      %16 = vector.load %arg5[%c0_8, %c0_9] : memref<4x2xf32, #tpu.memory_space<vmem>>, vector<4x1xf32>
      %17 = vector.extract_strided_slice %1 {offsets = [0, 0], sizes = [1, 256], strides = [1, 1]} : vector<2x256xf32> to vector<1x256xf32>
      %18 = vector.broadcast %16 : vector<4x1xf32> to vector<4x256xf32>
      %19 = vector.broadcast %17 : vector<1x256xf32> to vector<4x256xf32>
      %20 = arith.mulf %18, %19 : vector<4x256xf32>
      %c0_10 = arith.constant 0 : index
      %c1 = arith.constant 1 : index
      %21 = vector.load %arg5[%c0_10, %c1] : memref<4x2xf32, #tpu.memory_space<vmem>>, vector<4x1xf32>
      %22 = vector.extract_strided_slice %1 {offsets = [1, 0], sizes = [1, 256], strides = [1, 1]} : vector<2x256xf32> to vector<1x256xf32>
      %23 = vector.broadcast %21 : vector<4x1xf32> to vector<4x256xf32>
      %24 = vector.broadcast %22 : vector<1x256xf32> to vector<4x256xf32>
      %25 = arith.mulf %23, %24 : vector<4x256xf32>
      %26 = arith.addf %20, %25 : vector<4x256xf32>
      %c0_11 = arith.constant 0 : index
      %c0_12 = arith.constant 0 : index
      %27 = vector.load %arg16[%c0_11, %c0_12] : memref<6x1xf32, #tpu.memory_space<vmem>>, vector<2x1xf32>
      %cst = arith.constant 0.001953125 : f32
      %28 = vector.broadcast %cst : f32 to vector<2x1xf32>
      %29 = arith.mulf %27, %28 : vector<2x1xf32>
      %c0_13 = arith.constant 0 : index
      %c0_14 = arith.constant 0 : index
      %30 = vector.load %arg17[%c0_13, %c0_14] : memref<6x1xf32, #tpu.memory_space<vmem>>, vector<2x1xf32>
      %cst_15 = arith.constant 0.001953125 : f32
      %31 = vector.broadcast %cst_15 : f32 to vector<2x1xf32>
      %32 = arith.mulf %30, %31 : vector<2x1xf32>
      %33 = arith.mulf %29, %29 : vector<2x1xf32>
      %34 = arith.subf %32, %33 : vector<2x1xf32>
      %c0_16 = arith.constant 0 : index
      %c0_17 = arith.constant 0 : index
      %35 = vector.load %arg7[%c0_16, %c0_17] : memref<6x1xf32, #tpu.memory_space<vmem>>, vector<2x1xf32>
      %cst_18 = arith.constant 9.99999974E-6 : f32
      %36 = vector.broadcast %cst_18 : f32 to vector<2x1xf32>
      %37 = arith.addf %34, %36 : vector<2x1xf32>
      %38 = math.rsqrt %37 : vector<2x1xf32>
      %39 = arith.mulf %35, %38 : vector<2x1xf32>
      %c0_19 = arith.constant 0 : index
      %c0_20 = arith.constant 0 : index
      %40 = vector.load %arg8[%c0_19, %c0_20] : memref<6x1xf32, #tpu.memory_space<vmem>>, vector<2x1xf32>
      %41 = arith.mulf %29, %39 : vector<2x1xf32>
      %42 = arith.subf %40, %41 : vector<2x1xf32>
      %c2_21 = arith.constant 2 : index
      %c0_22 = arith.constant 0 : index
      %43 = vector.load %arg16[%c2_21, %c0_22] : memref<6x1xf32, #tpu.memory_space<vmem>>, vector<4x1xf32>
      %cst_23 = arith.constant 0.001953125 : f32
      %44 = vector.broadcast %cst_23 : f32 to vector<4x1xf32>
      %45 = arith.mulf %43, %44 : vector<4x1xf32>
      %c2_24 = arith.constant 2 : index
      %c0_25 = arith.constant 0 : index
      %46 = vector.load %arg17[%c2_24, %c0_25] : memref<6x1xf32, #tpu.memory_space<vmem>>, vector<4x1xf32>
      %cst_26 = arith.constant 0.001953125 : f32
      %47 = vector.broadcast %cst_26 : f32 to vector<4x1xf32>
      %48 = arith.mulf %46, %47 : vector<4x1xf32>
      %49 = arith.mulf %45, %45 : vector<4x1xf32>
      %50 = arith.subf %48, %49 : vector<4x1xf32>
      %c2_27 = arith.constant 2 : index
      %c0_28 = arith.constant 0 : index
      %51 = vector.load %arg7[%c2_27, %c0_28] : memref<6x1xf32, #tpu.memory_space<vmem>>, vector<4x1xf32>
      %cst_29 = arith.constant 9.99999974E-6 : f32
      %52 = vector.broadcast %cst_29 : f32 to vector<4x1xf32>
      %53 = arith.addf %50, %52 : vector<4x1xf32>
      %54 = math.rsqrt %53 : vector<4x1xf32>
      %55 = arith.mulf %51, %54 : vector<4x1xf32>
      %c2_30 = arith.constant 2 : index
      %c0_31 = arith.constant 0 : index
      %56 = vector.load %arg8[%c2_30, %c0_31] : memref<6x1xf32, #tpu.memory_space<vmem>>, vector<4x1xf32>
      %57 = arith.mulf %45, %55 : vector<4x1xf32>
      %58 = arith.subf %56, %57 : vector<4x1xf32>
      %59 = vector.broadcast %39 : vector<2x1xf32> to vector<2x256xf32>
      %60 = arith.mulf %0, %59 : vector<2x256xf32>
      %61 = vector.broadcast %42 : vector<2x1xf32> to vector<2x256xf32>
      %62 = arith.addf %60, %61 : vector<2x256xf32>
      %63 = vector.broadcast %55 : vector<4x1xf32> to vector<4x256xf32>
      %64 = arith.mulf %26, %63 : vector<4x256xf32>
      %65 = vector.broadcast %58 : vector<4x1xf32> to vector<4x256xf32>
      %66 = arith.addf %64, %65 : vector<4x256xf32>
      %c0_32 = arith.constant 0 : index
      %c0_33 = arith.constant 0 : index
      %67 = vector.load %arg4[%c0_32, %c0_33] : memref<2x18xf32, #tpu.memory_space<vmem>>, vector<2x18xf32>
      %c0_34 = arith.constant 0 : index
      %c0_35 = arith.constant 0 : index
      %68 = vector.load %arg3[%c0_34, %c0_35] : memref<6x256xf32, #tpu.memory_space<vmem>>, vector<1x256xf32>
      %c3 = arith.constant 3 : index
      %c0_36 = arith.constant 0 : index
      %69 = vector.load %arg3[%c3, %c0_36] : memref<6x256xf32, #tpu.memory_space<vmem>>, vector<1x256xf32>
      %70 = arith.mulf %68, %69 : vector<1x256xf32>
      %c17_i32 = arith.constant 17 : i32
      %71 = tpu.dynamic_rotate %0 by %c17_i32 dim 1 : vector<2x256xf32>, i32 -> vector<2x256xf32>
      %72 = vector.broadcast %70 : vector<1x256xf32> to vector<2x256xf32>
      %73 = arith.mulf %71, %72 : vector<2x256xf32>
      %c0_37 = arith.constant 0 : index
      %c0_38 = arith.constant 0 : index
      %74 = vector.load %arg3[%c0_37, %c0_38] : memref<6x256xf32, #tpu.memory_space<vmem>>, vector<1x256xf32>
      %c4 = arith.constant 4 : index
      %c0_39 = arith.constant 0 : index
      %75 = vector.load %arg3[%c4, %c0_39] : memref<6x256xf32, #tpu.memory_space<vmem>>, vector<1x256xf32>
      %76 = arith.mulf %74, %75 : vector<1x256xf32>
      %c16_i32 = arith.constant 16 : i32
      %77 = tpu.dynamic_rotate %0 by %c16_i32 dim 1 : vector<2x256xf32>, i32 -> vector<2x256xf32>
      %78 = vector.broadcast %76 : vector<1x256xf32> to vector<2x256xf32>
      %79 = arith.mulf %77, %78 : vector<2x256xf32>
      %c0_40 = arith.constant 0 : index
      %c0_41 = arith.constant 0 : index
      %80 = vector.load %arg3[%c0_40, %c0_41] : memref<6x256xf32, #tpu.memory_space<vmem>>, vector<1x256xf32>
      %c5 = arith.constant 5 : index
      %c0_42 = arith.constant 0 : index
      %81 = vector.load %arg3[%c5, %c0_42] : memref<6x256xf32, #tpu.memory_space<vmem>>, vector<1x256xf32>
      %82 = arith.mulf %80, %81 : vector<1x256xf32>
      %c15_i32 = arith.constant 15 : i32
      %83 = tpu.dynamic_rotate %0 by %c15_i32 dim 1 : vector<2x256xf32>, i32 -> vector<2x256xf32>
      %84 = vector.broadcast %82 : vector<1x256xf32> to vector<2x256xf32>
      %85 = arith.mulf %83, %84 : vector<2x256xf32>
      %c1_43 = arith.constant 1 : index
      %c0_44 = arith.constant 0 : index
      %86 = vector.load %arg3[%c1_43, %c0_44] : memref<6x256xf32, #tpu.memory_space<vmem>>, vector<1x256xf32>
      %c3_45 = arith.constant 3 : index
      %c0_46 = arith.constant 0 : index
      %87 = vector.load %arg3[%c3_45, %c0_46] : memref<6x256xf32, #tpu.memory_space<vmem>>, vector<1x256xf32>
      %88 = arith.mulf %86, %87 : vector<1x256xf32>
      %c1_i32_47 = arith.constant 1 : i32
      %89 = tpu.dynamic_rotate %0 by %c1_i32_47 dim 1 : vector<2x256xf32>, i32 -> vector<2x256xf32>
      %90 = vector.broadcast %88 : vector<1x256xf32> to vector<2x256xf32>
      %91 = arith.mulf %89, %90 : vector<2x256xf32>
      %c1_48 = arith.constant 1 : index
      %c0_49 = arith.constant 0 : index
      %92 = vector.load %arg3[%c1_48, %c0_49] : memref<6x256xf32, #tpu.memory_space<vmem>>, vector<1x256xf32>
      %c5_50 = arith.constant 5 : index
      %c0_51 = arith.constant 0 : index
      %93 = vector.load %arg3[%c5_50, %c0_51] : memref<6x256xf32, #tpu.memory_space<vmem>>, vector<1x256xf32>
      %94 = arith.mulf %92, %93 : vector<1x256xf32>
      %c255_i32 = arith.constant 255 : i32
      %95 = tpu.dynamic_rotate %0 by %c255_i32 dim 1 : vector<2x256xf32>, i32 -> vector<2x256xf32>
      %96 = vector.broadcast %94 : vector<1x256xf32> to vector<2x256xf32>
      %97 = arith.mulf %95, %96 : vector<2x256xf32>
      %c2_52 = arith.constant 2 : index
      %c0_53 = arith.constant 0 : index
      %98 = vector.load %arg3[%c2_52, %c0_53] : memref<6x256xf32, #tpu.memory_space<vmem>>, vector<1x256xf32>
      %c3_54 = arith.constant 3 : index
      %c0_55 = arith.constant 0 : index
      %99 = vector.load %arg3[%c3_54, %c0_55] : memref<6x256xf32, #tpu.memory_space<vmem>>, vector<1x256xf32>
      %100 = arith.mulf %98, %99 : vector<1x256xf32>
      %c241_i32 = arith.constant 241 : i32
      %101 = tpu.dynamic_rotate %0 by %c241_i32 dim 1 : vector<2x256xf32>, i32 -> vector<2x256xf32>
      %102 = vector.broadcast %100 : vector<1x256xf32> to vector<2x256xf32>
      %103 = arith.mulf %101, %102 : vector<2x256xf32>
      %c2_56 = arith.constant 2 : index
      %c0_57 = arith.constant 0 : index
      %104 = vector.load %arg3[%c2_56, %c0_57] : memref<6x256xf32, #tpu.memory_space<vmem>>, vector<1x256xf32>
      %c4_58 = arith.constant 4 : index
      %c0_59 = arith.constant 0 : index
      %105 = vector.load %arg3[%c4_58, %c0_59] : memref<6x256xf32, #tpu.memory_space<vmem>>, vector<1x256xf32>
      %106 = arith.mulf %104, %105 : vector<1x256xf32>
      %c240_i32 = arith.constant 240 : i32
      %107 = tpu.dynamic_rotate %0 by %c240_i32 dim 1 : vector<2x256xf32>, i32 -> vector<2x256xf32>
      %108 = vector.broadcast %106 : vector<1x256xf32> to vector<2x256xf32>
      %109 = arith.mulf %107, %108 : vector<2x256xf32>
      %c2_60 = arith.constant 2 : index
      %c0_61 = arith.constant 0 : index
      %110 = vector.load %arg3[%c2_60, %c0_61] : memref<6x256xf32, #tpu.memory_space<vmem>>, vector<1x256xf32>
      %c5_62 = arith.constant 5 : index
      %c0_63 = arith.constant 0 : index
      %111 = vector.load %arg3[%c5_62, %c0_63] : memref<6x256xf32, #tpu.memory_space<vmem>>, vector<1x256xf32>
      %112 = arith.mulf %110, %111 : vector<1x256xf32>
      %c239_i32 = arith.constant 239 : i32
      %113 = tpu.dynamic_rotate %0 by %c239_i32 dim 1 : vector<2x256xf32>, i32 -> vector<2x256xf32>
      %114 = vector.broadcast %112 : vector<1x256xf32> to vector<2x256xf32>
      %115 = arith.mulf %113, %114 : vector<2x256xf32>
      %116 = tpu.concatenate %73, %79, %85, %91, %0, %97, %103, %109, %115 in 0 : vector<2x256xf32>, vector<2x256xf32>, vector<2x256xf32>, vector<2x256xf32>, vector<2x256xf32>, vector<2x256xf32>, vector<2x256xf32>, vector<2x256xf32>, vector<2x256xf32> -> vector<18x256xf32>
      %cst_64 = arith.constant dense<0.000000e+00> : vector<2x256xf32>
      %117 = tpu.matmul %67, %116, %cst_64 {dimension_numbers = #tpu.dot_dimension_numbers<[1], [0], [0], [1], [0, 0, 1, 1], [], []>} : vector<2x18xf32>, vector<18x256xf32>, vector<2x256xf32> -> vector<2x256xf32>
      %c0_65 = arith.constant 0 : index
      %c0_66 = arith.constant 0 : index
      %118 = vector.load %arg6[%c0_65, %c0_66] : memref<2x54xf32, #tpu.memory_space<vmem>>, vector<2x54xf32>
      %c0_67 = arith.constant 0 : index
      %c0_68 = arith.constant 0 : index
      %119 = vector.load %arg3[%c0_67, %c0_68] : memref<6x256xf32, #tpu.memory_space<vmem>>, vector<1x256xf32>
      %c3_69 = arith.constant 3 : index
      %c0_70 = arith.constant 0 : index
      %120 = vector.load %arg3[%c3_69, %c0_70] : memref<6x256xf32, #tpu.memory_space<vmem>>, vector<1x256xf32>
      %121 = arith.mulf %119, %120 : vector<1x256xf32>
      %c17_i32_71 = arith.constant 17 : i32
      %122 = tpu.dynamic_rotate %62 by %c17_i32_71 dim 1 : vector<2x256xf32>, i32 -> vector<2x256xf32>
      %123 = vector.broadcast %121 : vector<1x256xf32> to vector<2x256xf32>
      %124 = arith.mulf %122, %123 : vector<2x256xf32>
      %c17_i32_72 = arith.constant 17 : i32
      %125 = tpu.dynamic_rotate %66 by %c17_i32_72 dim 1 : vector<4x256xf32>, i32 -> vector<4x256xf32>
      %126 = vector.broadcast %121 : vector<1x256xf32> to vector<4x256xf32>
      %127 = arith.mulf %125, %126 : vector<4x256xf32>
      %c0_73 = arith.constant 0 : index
      %c0_74 = arith.constant 0 : index
      %128 = vector.load %arg3[%c0_73, %c0_74] : memref<6x256xf32, #tpu.memory_space<vmem>>, vector<1x256xf32>
      %c4_75 = arith.constant 4 : index
      %c0_76 = arith.constant 0 : index
      %129 = vector.load %arg3[%c4_75, %c0_76] : memref<6x256xf32, #tpu.memory_space<vmem>>, vector<1x256xf32>
      %130 = arith.mulf %128, %129 : vector<1x256xf32>
      %c16_i32_77 = arith.constant 16 : i32
      %131 = tpu.dynamic_rotate %62 by %c16_i32_77 dim 1 : vector<2x256xf32>, i32 -> vector<2x256xf32>
      %132 = vector.broadcast %130 : vector<1x256xf32> to vector<2x256xf32>
      %133 = arith.mulf %131, %132 : vector<2x256xf32>
      %c16_i32_78 = arith.constant 16 : i32
      %134 = tpu.dynamic_rotate %66 by %c16_i32_78 dim 1 : vector<4x256xf32>, i32 -> vector<4x256xf32>
      %135 = vector.broadcast %130 : vector<1x256xf32> to vector<4x256xf32>
      %136 = arith.mulf %134, %135 : vector<4x256xf32>
      %c0_79 = arith.constant 0 : index
      %c0_80 = arith.constant 0 : index
      %137 = vector.load %arg3[%c0_79, %c0_80] : memref<6x256xf32, #tpu.memory_space<vmem>>, vector<1x256xf32>
      %c5_81 = arith.constant 5 : index
      %c0_82 = arith.constant 0 : index
      %138 = vector.load %arg3[%c5_81, %c0_82] : memref<6x256xf32, #tpu.memory_space<vmem>>, vector<1x256xf32>
      %139 = arith.mulf %137, %138 : vector<1x256xf32>
      %c15_i32_83 = arith.constant 15 : i32
      %140 = tpu.dynamic_rotate %62 by %c15_i32_83 dim 1 : vector<2x256xf32>, i32 -> vector<2x256xf32>
      %141 = vector.broadcast %139 : vector<1x256xf32> to vector<2x256xf32>
      %142 = arith.mulf %140, %141 : vector<2x256xf32>
      %c15_i32_84 = arith.constant 15 : i32
      %143 = tpu.dynamic_rotate %66 by %c15_i32_84 dim 1 : vector<4x256xf32>, i32 -> vector<4x256xf32>
      %144 = vector.broadcast %139 : vector<1x256xf32> to vector<4x256xf32>
      %145 = arith.mulf %143, %144 : vector<4x256xf32>
      %c1_85 = arith.constant 1 : index
      %c0_86 = arith.constant 0 : index
      %146 = vector.load %arg3[%c1_85, %c0_86] : memref<6x256xf32, #tpu.memory_space<vmem>>, vector<1x256xf32>
      %c3_87 = arith.constant 3 : index
      %c0_88 = arith.constant 0 : index
      %147 = vector.load %arg3[%c3_87, %c0_88] : memref<6x256xf32, #tpu.memory_space<vmem>>, vector<1x256xf32>
      %148 = arith.mulf %146, %147 : vector<1x256xf32>
      %c1_i32_89 = arith.constant 1 : i32
      %149 = tpu.dynamic_rotate %62 by %c1_i32_89 dim 1 : vector<2x256xf32>, i32 -> vector<2x256xf32>
      %150 = vector.broadcast %148 : vector<1x256xf32> to vector<2x256xf32>
      %151 = arith.mulf %149, %150 : vector<2x256xf32>
      %c1_i32_90 = arith.constant 1 : i32
      %152 = tpu.dynamic_rotate %66 by %c1_i32_90 dim 1 : vector<4x256xf32>, i32 -> vector<4x256xf32>
      %153 = vector.broadcast %148 : vector<1x256xf32> to vector<4x256xf32>
      %154 = arith.mulf %152, %153 : vector<4x256xf32>
      %c1_91 = arith.constant 1 : index
      %c0_92 = arith.constant 0 : index
      %155 = vector.load %arg3[%c1_91, %c0_92] : memref<6x256xf32, #tpu.memory_space<vmem>>, vector<1x256xf32>
      %c5_93 = arith.constant 5 : index
      %c0_94 = arith.constant 0 : index
      %156 = vector.load %arg3[%c5_93, %c0_94] : memref<6x256xf32, #tpu.memory_space<vmem>>, vector<1x256xf32>
      %157 = arith.mulf %155, %156 : vector<1x256xf32>
      %c255_i32_95 = arith.constant 255 : i32
      %158 = tpu.dynamic_rotate %62 by %c255_i32_95 dim 1 : vector<2x256xf32>, i32 -> vector<2x256xf32>
      %159 = vector.broadcast %157 : vector<1x256xf32> to vector<2x256xf32>
      %160 = arith.mulf %158, %159 : vector<2x256xf32>
      %c255_i32_96 = arith.constant 255 : i32
      %161 = tpu.dynamic_rotate %66 by %c255_i32_96 dim 1 : vector<4x256xf32>, i32 -> vector<4x256xf32>
      %162 = vector.broadcast %157 : vector<1x256xf32> to vector<4x256xf32>
      %163 = arith.mulf %161, %162 : vector<4x256xf32>
      %c2_97 = arith.constant 2 : index
      %c0_98 = arith.constant 0 : index
      %164 = vector.load %arg3[%c2_97, %c0_98] : memref<6x256xf32, #tpu.memory_space<vmem>>, vector<1x256xf32>
      %c3_99 = arith.constant 3 : index
      %c0_100 = arith.constant 0 : index
      %165 = vector.load %arg3[%c3_99, %c0_100] : memref<6x256xf32, #tpu.memory_space<vmem>>, vector<1x256xf32>
      %166 = arith.mulf %164, %165 : vector<1x256xf32>
      %c241_i32_101 = arith.constant 241 : i32
      %167 = tpu.dynamic_rotate %62 by %c241_i32_101 dim 1 : vector<2x256xf32>, i32 -> vector<2x256xf32>
      %168 = vector.broadcast %166 : vector<1x256xf32> to vector<2x256xf32>
      %169 = arith.mulf %167, %168 : vector<2x256xf32>
      %c241_i32_102 = arith.constant 241 : i32
      %170 = tpu.dynamic_rotate %66 by %c241_i32_102 dim 1 : vector<4x256xf32>, i32 -> vector<4x256xf32>
      %171 = vector.broadcast %166 : vector<1x256xf32> to vector<4x256xf32>
      %172 = arith.mulf %170, %171 : vector<4x256xf32>
      %c2_103 = arith.constant 2 : index
      %c0_104 = arith.constant 0 : index
      %173 = vector.load %arg3[%c2_103, %c0_104] : memref<6x256xf32, #tpu.memory_space<vmem>>, vector<1x256xf32>
      %c4_105 = arith.constant 4 : index
      %c0_106 = arith.constant 0 : index
      %174 = vector.load %arg3[%c4_105, %c0_106] : memref<6x256xf32, #tpu.memory_space<vmem>>, vector<1x256xf32>
      %175 = arith.mulf %173, %174 : vector<1x256xf32>
      %c240_i32_107 = arith.constant 240 : i32
      %176 = tpu.dynamic_rotate %62 by %c240_i32_107 dim 1 : vector<2x256xf32>, i32 -> vector<2x256xf32>
      %177 = vector.broadcast %175 : vector<1x256xf32> to vector<2x256xf32>
      %178 = arith.mulf %176, %177 : vector<2x256xf32>
      %c240_i32_108 = arith.constant 240 : i32
      %179 = tpu.dynamic_rotate %66 by %c240_i32_108 dim 1 : vector<4x256xf32>, i32 -> vector<4x256xf32>
      %180 = vector.broadcast %175 : vector<1x256xf32> to vector<4x256xf32>
      %181 = arith.mulf %179, %180 : vector<4x256xf32>
      %c2_109 = arith.constant 2 : index
      %c0_110 = arith.constant 0 : index
      %182 = vector.load %arg3[%c2_109, %c0_110] : memref<6x256xf32, #tpu.memory_space<vmem>>, vector<1x256xf32>
      %c5_111 = arith.constant 5 : index
      %c0_112 = arith.constant 0 : index
      %183 = vector.load %arg3[%c5_111, %c0_112] : memref<6x256xf32, #tpu.memory_space<vmem>>, vector<1x256xf32>
      %184 = arith.mulf %182, %183 : vector<1x256xf32>
      %c239_i32_113 = arith.constant 239 : i32
      %185 = tpu.dynamic_rotate %62 by %c239_i32_113 dim 1 : vector<2x256xf32>, i32 -> vector<2x256xf32>
      %186 = vector.broadcast %184 : vector<1x256xf32> to vector<2x256xf32>
      %187 = arith.mulf %185, %186 : vector<2x256xf32>
      %c239_i32_114 = arith.constant 239 : i32
      %188 = tpu.dynamic_rotate %66 by %c239_i32_114 dim 1 : vector<4x256xf32>, i32 -> vector<4x256xf32>
      %189 = vector.broadcast %184 : vector<1x256xf32> to vector<4x256xf32>
      %190 = arith.mulf %188, %189 : vector<4x256xf32>
      %191 = tpu.concatenate %124, %127, %133, %136, %142, %145, %151, %154, %62, %66, %160, %163, %169, %172, %178, %181 in 0 : vector<2x256xf32>, vector<4x256xf32>, vector<2x256xf32>, vector<4x256xf32>, vector<2x256xf32>, vector<4x256xf32>, vector<2x256xf32>, vector<4x256xf32>, vector<2x256xf32>, vector<4x256xf32>, vector<2x256xf32>, vector<4x256xf32>, vector<2x256xf32>, vector<4x256xf32>, vector<2x256xf32>, vector<4x256xf32> -> vector<48x256xf32>
      %192 = tpu.concatenate %187, %190 in 0 : vector<2x256xf32>, vector<4x256xf32> -> vector<6x256xf32>
      %193 = tpu.concatenate %191, %192 in 0 : vector<48x256xf32>, vector<6x256xf32> -> vector<54x256xf32>
      %cst_115 = arith.constant dense<0.000000e+00> : vector<2x256xf32>
      %194 = tpu.matmul %118, %193, %cst_115 {dimension_numbers = #tpu.dot_dimension_numbers<[1], [0], [0], [1], [0, 0, 1, 1], [], []>} : vector<2x54xf32>, vector<54x256xf32>, vector<2x256xf32> -> vector<2x256xf32>
      %c0_116 = arith.constant 0 : index
      %c0_117 = arith.constant 0 : index
      %195 = vector.load %arg18[%c0_116, %c0_117] : memref<4x1xf32, #tpu.memory_space<vmem>>, vector<2x1xf32>
      %cst_118 = arith.constant 0.001953125 : f32
      %196 = vector.broadcast %cst_118 : f32 to vector<2x1xf32>
      %197 = arith.mulf %195, %196 : vector<2x1xf32>
      %c0_119 = arith.constant 0 : index
      %c0_120 = arith.constant 0 : index
      %198 = vector.load %arg19[%c0_119, %c0_120] : memref<4x1xf32, #tpu.memory_space<vmem>>, vector<2x1xf32>
      %cst_121 = arith.constant 0.001953125 : f32
      %199 = vector.broadcast %cst_121 : f32 to vector<2x1xf32>
      %200 = arith.mulf %198, %199 : vector<2x1xf32>
      %201 = arith.mulf %197, %197 : vector<2x1xf32>
      %202 = arith.subf %200, %201 : vector<2x1xf32>
      %c0_122 = arith.constant 0 : index
      %c0_123 = arith.constant 0 : index
      %203 = vector.load %arg9[%c0_122, %c0_123] : memref<4x1xf32, #tpu.memory_space<vmem>>, vector<2x1xf32>
      %cst_124 = arith.constant 9.99999974E-6 : f32
      %204 = vector.broadcast %cst_124 : f32 to vector<2x1xf32>
      %205 = arith.addf %202, %204 : vector<2x1xf32>
      %206 = math.rsqrt %205 : vector<2x1xf32>
      %207 = arith.mulf %203, %206 : vector<2x1xf32>
      %c0_125 = arith.constant 0 : index
      %c0_126 = arith.constant 0 : index
      %208 = vector.load %arg10[%c0_125, %c0_126] : memref<4x1xf32, #tpu.memory_space<vmem>>, vector<2x1xf32>
      %209 = arith.mulf %197, %207 : vector<2x1xf32>
      %210 = arith.subf %208, %209 : vector<2x1xf32>
      %c2_127 = arith.constant 2 : index
      %c0_128 = arith.constant 0 : index
      %211 = vector.load %arg18[%c2_127, %c0_128] : memref<4x1xf32, #tpu.memory_space<vmem>>, vector<2x1xf32>
      %cst_129 = arith.constant 0.001953125 : f32
      %212 = vector.broadcast %cst_129 : f32 to vector<2x1xf32>
      %213 = arith.mulf %211, %212 : vector<2x1xf32>
      %c2_130 = arith.constant 2 : index
      %c0_131 = arith.constant 0 : index
      %214 = vector.load %arg19[%c2_130, %c0_131] : memref<4x1xf32, #tpu.memory_space<vmem>>, vector<2x1xf32>
      %cst_132 = arith.constant 0.001953125 : f32
      %215 = vector.broadcast %cst_132 : f32 to vector<2x1xf32>
      %216 = arith.mulf %214, %215 : vector<2x1xf32>
      %217 = arith.mulf %213, %213 : vector<2x1xf32>
      %218 = arith.subf %216, %217 : vector<2x1xf32>
      %c2_133 = arith.constant 2 : index
      %c0_134 = arith.constant 0 : index
      %219 = vector.load %arg9[%c2_133, %c0_134] : memref<4x1xf32, #tpu.memory_space<vmem>>, vector<2x1xf32>
      %cst_135 = arith.constant 9.99999974E-6 : f32
      %220 = vector.broadcast %cst_135 : f32 to vector<2x1xf32>
      %221 = arith.addf %218, %220 : vector<2x1xf32>
      %222 = math.rsqrt %221 : vector<2x1xf32>
      %223 = arith.mulf %219, %222 : vector<2x1xf32>
      %c2_136 = arith.constant 2 : index
      %c0_137 = arith.constant 0 : index
      %224 = vector.load %arg10[%c2_136, %c0_137] : memref<4x1xf32, #tpu.memory_space<vmem>>, vector<2x1xf32>
      %225 = arith.mulf %213, %223 : vector<2x1xf32>
      %226 = arith.subf %224, %225 : vector<2x1xf32>
      %227 = vector.broadcast %207 : vector<2x1xf32> to vector<2x256xf32>
      %228 = arith.mulf %117, %227 : vector<2x256xf32>
      %229 = vector.broadcast %210 : vector<2x1xf32> to vector<2x256xf32>
      %230 = arith.addf %228, %229 : vector<2x256xf32>
      %231 = vector.broadcast %223 : vector<2x1xf32> to vector<2x256xf32>
      %232 = arith.mulf %194, %231 : vector<2x256xf32>
      %233 = vector.broadcast %226 : vector<2x1xf32> to vector<2x256xf32>
      %234 = arith.addf %232, %233 : vector<2x256xf32>
      %cst_138 = arith.constant dense<0.000000e+00> : vector<2xf32>
      %235 = vector.multi_reduction <add>, %230, %cst_138 [1] : vector<2x256xf32> to vector<2xf32>
      %236 = vector.shape_cast %235 : vector<2xf32> to vector<2x1xf32>
      %cst_139 = arith.constant 2.560000e+02 : f32
      %237 = vector.broadcast %cst_139 : f32 to vector<2x1xf32>
      %238 = arith.divf %236, %237 : vector<2x1xf32>
      %cst_140 = arith.constant dense<0.000000e+00> : vector<2xf32>
      %239 = vector.multi_reduction <add>, %234, %cst_140 [1] : vector<2x256xf32> to vector<2xf32>
      %240 = vector.shape_cast %239 : vector<2xf32> to vector<2x1xf32>
      %cst_141 = arith.constant 2.560000e+02 : f32
      %241 = vector.broadcast %cst_141 : f32 to vector<2x1xf32>
      %242 = arith.divf %240, %241 : vector<2x1xf32>
      %243 = tpu.concatenate %238, %242 in 0 : vector<2x1xf32>, vector<2x1xf32> -> vector<4x1xf32>
      %c0_142 = arith.constant 0 : index
      %c0_143 = arith.constant 0 : index
      %244 = vector.load %arg11[%c0_142, %c0_143] : memref<2x4xf32, #tpu.memory_space<vmem>>, vector<2x4xf32>
      %cst_144 = arith.constant dense<0.000000e+00> : vector<2x1xf32>
      %245 = tpu.matmul %244, %243, %cst_144 {dimension_numbers = #tpu.dot_dimension_numbers<[1], [0], [0], [1], [0, 0, 1, 1], [], []>} : vector<2x4xf32>, vector<4x1xf32>, vector<2x1xf32> -> vector<2x1xf32>
      %c0_145 = arith.constant 0 : index
      %c0_146 = arith.constant 0 : index
      %246 = vector.load %arg12[%c0_145, %c0_146] : memref<2x1xf32, #tpu.memory_space<vmem>>, vector<2x1xf32>
      %247 = arith.addf %245, %246 : vector<2x1xf32>
      %cst_147 = arith.constant 0.000000e+00 : f32
      %248 = vector.broadcast %cst_147 : f32 to vector<2x1xf32>
      %249 = arith.maximumf %247, %248 : vector<2x1xf32>
      %c0_148 = arith.constant 0 : index
      %c0_149 = arith.constant 0 : index
      %250 = vector.load %arg13[%c0_148, %c0_149] : memref<4x2xf32, #tpu.memory_space<vmem>>, vector<4x2xf32>
      %cst_150 = arith.constant dense<0.000000e+00> : vector<4x1xf32>
      %251 = tpu.matmul %250, %249, %cst_150 {dimension_numbers = #tpu.dot_dimension_numbers<[1], [0], [0], [1], [0, 0, 1, 1], [], []>} : vector<4x2xf32>, vector<2x1xf32>, vector<4x1xf32> -> vector<4x1xf32>
      %c0_151 = arith.constant 0 : index
      %c0_152 = arith.constant 0 : index
      %252 = vector.load %arg14[%c0_151, %c0_152] : memref<4x1xf32, #tpu.memory_space<vmem>>, vector<4x1xf32>
      %253 = arith.addf %251, %252 : vector<4x1xf32>
      %254 = arith.negf %253 : vector<4x1xf32>
      %255 = math.exp %254 : vector<4x1xf32>
      %cst_153 = arith.constant 1.000000e+00 : f32
      %256 = vector.broadcast %cst_153 : f32 to vector<4x1xf32>
      %257 = arith.addf %256, %255 : vector<4x1xf32>
      %258 = arith.divf %256, %257 : vector<4x1xf32>
      %259 = vector.extract_strided_slice %258 {offsets = [0, 0], sizes = [2, 1], strides = [1, 1]} : vector<4x1xf32> to vector<2x1xf32>
      %260 = vector.extract_strided_slice %258 {offsets = [2, 0], sizes = [2, 1], strides = [1, 1]} : vector<4x1xf32> to vector<2x1xf32>
      %261 = vector.broadcast %259 : vector<2x1xf32> to vector<2x256xf32>
      %262 = arith.mulf %230, %261 : vector<2x256xf32>
      %263 = vector.extract_strided_slice %26 {offsets = [0, 0], sizes = [2, 256], strides = [1, 1]} : vector<4x256xf32> to vector<2x256xf32>
      %264 = arith.addf %262, %263 : vector<2x256xf32>
      %c0_154 = arith.constant 0 : index
      %c0_155 = arith.constant 0 : index
      %265 = vector.load %arg15[%c0_154, %c0_155] : memref<4x256xf32, #tpu.memory_space<vmem>>, vector<2x256xf32>
      tpu.vector_store %arg15[%c0_154, %c0_155], %264 {strides = array<i32>} : memref<4x256xf32, #tpu.memory_space<vmem>>, vector<2x256xf32>,
      %266 = vector.broadcast %260 : vector<2x1xf32> to vector<2x256xf32>
      %267 = arith.mulf %234, %266 : vector<2x256xf32>
      %268 = vector.extract_strided_slice %26 {offsets = [2, 0], sizes = [2, 256], strides = [1, 1]} : vector<4x256xf32> to vector<2x256xf32>
      %269 = arith.addf %267, %268 : vector<2x256xf32>
      %c2_156 = arith.constant 2 : index
      %c0_157 = arith.constant 0 : index
      %270 = vector.load %arg15[%c2_156, %c0_157] : memref<4x256xf32, #tpu.memory_space<vmem>>, vector<2x256xf32>
      tpu.vector_store %arg15[%c2_156, %c0_157], %269 {strides = array<i32>} : memref<4x256xf32, #tpu.memory_space<vmem>>, vector<2x256xf32>,
    } else {
    }
    return
  }
  func.func @transform_0(%arg0: i32, %arg1: i32) -> (i32, i32) {
    %c0_i32 = arith.constant 0 : i32
    %c0_i32_0 = arith.constant 0 : i32
    return %c0_i32, %arg1 : i32, i32
  }
  func.func @transform_1(%arg0: i32, %arg1: i32) -> (i32, i32) {
    %c0_i32 = arith.constant 0 : i32
    %c0_i32_0 = arith.constant 0 : i32
    %c0_i32_1 = arith.constant 0 : i32
    return %c0_i32, %c0_i32_0 : i32, i32
  }
  func.func @transform_2(%arg0: i32, %arg1: i32) -> (i32, i32) {
    %c0_i32 = arith.constant 0 : i32
    %c0_i32_0 = arith.constant 0 : i32
    %c0_i32_1 = arith.constant 0 : i32
    return %c0_i32, %c0_i32_0 : i32, i32
  }
  func.func @transform_3(%arg0: i32, %arg1: i32) -> (i32, i32) {
    %c0_i32 = arith.constant 0 : i32
    %c0_i32_0 = arith.constant 0 : i32
    %c0_i32_1 = arith.constant 0 : i32
    return %c0_i32, %c0_i32_0 : i32, i32
  }
  func.func @transform_4(%arg0: i32, %arg1: i32) -> (i32, i32) {
    %c0_i32 = arith.constant 0 : i32
    %c0_i32_0 = arith.constant 0 : i32
    %c0_i32_1 = arith.constant 0 : i32
    return %c0_i32, %c0_i32_0 : i32, i32
  }
  func.func @transform_5(%arg0: i32, %arg1: i32) -> (i32, i32) {
    %c0_i32 = arith.constant 0 : i32
    %c0_i32_0 = arith.constant 0 : i32
    %c0_i32_1 = arith.constant 0 : i32
    return %c0_i32, %c0_i32_0 : i32, i32
  }
  func.func @transform_6(%arg0: i32, %arg1: i32) -> (i32, i32) {
    %c0_i32 = arith.constant 0 : i32
    %c0_i32_0 = arith.constant 0 : i32
    %c0_i32_1 = arith.constant 0 : i32
    return %c0_i32, %c0_i32_0 : i32, i32
  }
  func.func @transform_7(%arg0: i32, %arg1: i32) -> (i32, i32) {
    %c0_i32 = arith.constant 0 : i32
    %c0_i32_0 = arith.constant 0 : i32
    %c0_i32_1 = arith.constant 0 : i32
    return %c0_i32, %c0_i32_0 : i32, i32
  }
  func.func @transform_8(%arg0: i32, %arg1: i32) -> (i32, i32) {
    %c0_i32 = arith.constant 0 : i32
    %c0_i32_0 = arith.constant 0 : i32
    %c0_i32_1 = arith.constant 0 : i32
    return %c0_i32, %c0_i32_0 : i32, i32
  }
  func.func @transform_9(%arg0: i32, %arg1: i32) -> (i32, i32) {
    %c0_i32 = arith.constant 0 : i32
    %c0_i32_0 = arith.constant 0 : i32
    %c0_i32_1 = arith.constant 0 : i32
    return %c0_i32, %c0_i32_0 : i32, i32
  }
  func.func @transform_10(%arg0: i32, %arg1: i32) -> (i32, i32) {
    %c0_i32 = arith.constant 0 : i32
    %c0_i32_0 = arith.constant 0 : i32
    %c0_i32_1 = arith.constant 0 : i32
    return %c0_i32, %c0_i32_0 : i32, i32
  }
  func.func @transform_11(%arg0: i32, %arg1: i32) -> (i32, i32) {
    %c0_i32 = arith.constant 0 : i32
    %c0_i32_0 = arith.constant 0 : i32
    %c0_i32_1 = arith.constant 0 : i32
    return %c0_i32, %c0_i32_0 : i32, i32
  }
  func.func @transform_12(%arg0: i32, %arg1: i32) -> (i32, i32) {
    %c0_i32 = arith.constant 0 : i32
    %c0_i32_0 = arith.constant 0 : i32
    %c0_i32_1 = arith.constant 0 : i32
    return %c0_i32, %c0_i32_0 : i32, i32
  }
  func.func @transform_13(%arg0: i32, %arg1: i32) -> (i32, i32) {
    %c0_i32 = arith.constant 0 : i32
    %c0_i32_0 = arith.constant 0 : i32
    return %c0_i32, %arg1 : i32, i32
  }
}

</mosaic_0001>

<bundles_post_ra>
// kernel: tpu_custom_call.1
= control target key start
LH: loop header
LB: loop body
LE: loop exit
PB: predicated region body
PF: predicated region fallthrough
CT: control target
= control target key end

     0   :  { %s3979_s0 = inlined_call_operand.vmem [shape: f32[4,512], index: 0, kind: input, shape index: {}]   ;;  %s3980_s1 = inlined_call_operand.vmem [shape: f32[6,256], index: 1, kind: input, shape index: {}]   ;;  %s3981_s2 = inlined_call_operand.vmem [shape: f32[2,18], index: 2, kind: input, shape index: {}]   ;;  %s3982_s3 = inlined_call_operand.vmem [shape: f32[4,2], index: 3, kind: input, shape index: {}]   ;;  %s3983_s4 = inlined_call_operand.vmem [shape: f32[2,54], index: 4, kind: input, shape index: {}]   ;;  %s3984_s5 = inlined_call_operand.vmem [shape: f32[6,1], index: 5, kind: input, shape index: {}]   ;;  %s3985_s6 = inlined_call_operand.vmem [shape: f32[6,1], index: 6, kind: input, shape index: {}]   ;;  %s3986_s7 = inlined_call_operand.vmem [shape: f32[4,1], index: 7, kind: input, shape index: {}]   ;;  %s3987_s8 = inlined_call_operand.vmem [shape: f32[4,1], index: 8, kind: input, shape index: {}]   ;;  %s3988_s9 = inlined_call_operand.vmem [shape: f32[2,4], index: 9, kind: input, shape index: {}]   ;;  %s3989_s10 = inlined_call_operand.vmem [shape: f32[2,1], index: 10, kind: input, shape index: {}]   ;;  %s3990_s11 = inlined_call_operand.vmem [shape: f32[4,2], index: 11, kind: input, shape index: {}]   ;;  %s3991_s12 = inlined_call_operand.vmem [shape: f32[4,1], index: 12, kind: input, shape index: {}]   ;;  %s3992_s13 = inlined_call_operand.hbm [shape: f32[4,512], index: 13, kind: output, shape index: {}]  }
   0x1   :  { %4019 = sst [smem:[#allocation13_spill]] %s3979_s0 }
   0x2   :  { %4020 = sst [smem:[#allocation14_spill]] %s3980_s1 }
   0x3   :  { %4021 = sst [smem:[#allocation15_spill]] %s3981_s2 }
   0x4   :  { %18 = vsyncpa [#allocation7], 0 }
   0x5   :  { %20 = vsyncpa [#allocation7 + $0x1], 0  ;;  %s2881_s25 = smov 0   ;;  %s2883_s26 = smov 0  }
   0x6   :  { %s2885_s27 = smov 0   ;;  %s2887_s28 = smov 0  }
   0x7   :  { %s2889_s29 = smov 0   ;;  %s2891_s30 = smov 0  }
   0x8   :  { %s2893_s14 = smov 0   ;;  %s2895_s15 = smov 0  }
   0x9 LB: > { %4022 = sst [smem:[#allocation9_spill]] %s2772_s30  ;;  %s2473_s16 = sadd.s32 4294967295, %s2780_s15   ;;  %s2780_s15 = sphi %s2895_s15, %s26_s15   ;;  %s2776_s14 = sphi %s2893_s14, %s4048_s14   ;;  %s2772_s30 = sphi %s2891_s30, %s4047_s30   ;;  %s2768_s29 = sphi %s2889_s29, %s4046_s29   ;;  %s2764_s28 = sphi %s2887_s28, %s4045_s28   ;;  %s2760_s27 = sphi %s2885_s27, %s4051_s27   ;;  %s2756_s26 = sphi %s2883_s26, %s4050_s26   ;;  %s2752_s25 = sphi %s2881_s25, %s4049_s25  }
   0xa   : > { %4023 = sst [smem:[#allocation10_spill]] %s2776_s14  ;;  %s2474_s17 = sadd.s32 4294967294, %s2780_s15  }
   0xb   : > { %s35_s18 = sadd.s32 1, %s2772_s30  ;;  %s38_s19 = sadd.s32 1, %s2776_s14 }
   0xc   : > { %p36_p0 = scmp.ge.s32.totalorder %s35_s18, 2  ;;  %s323_s20 = sadd.s32 1, %s2760_s27 }
   0xd   : > { %p333_p1 = scmp.ne.s32.totalorder %s2760_s27, %s2756_s26  ;;  %p334_p2 = scmp.eq.s32.totalorder %s2473_s16, 5 }
   0xe   : > { %s4053_s18 = smov (%p36_p0, %s35_s18), 0  ;;  %s4055_s19 = smov (!%p36_p0, %s38_s19), %s2776_s14 }
   0xf   : > { %4024 = sst [smem:[#allocation11_spill]] %s4053_s18  ;;  %s320_s21 = ssub.s32 %s2772_s30, %s4053_s18 }
  0x10   : > { %p2933_p3 = por %p334_p2, %p333_p1  ;;  %p40_p4 = scmp.ge.s32.totalorder %s4055_s19, 3 }
  0x11   : > { %p321_p5 = scmp.eq.s32.totalorder %s320_s21, 0  ;;  %p339_p6 = scmp.ne.s32.totalorder %s2756_s26, %s2752_s25 }
  0x12   : > { %p340_p7 = scmp.eq.s32.totalorder %s2474_s17, 5  ;;  %s4057_s19 = smov (%p40_p4, %s4055_s19), 0 }
  0x13   : > { %4026 = sst [smem:[#allocation12_spill]] %s4057_s19  ;;  %p2477_p9 = scmp.ge.s32.totalorder %s2780_s15, 1 }
  0x14   : > { %s2942_s23 = scalar_select %p321_p5, %s2760_s27, %s323_s20  }
  0x15   : > { %p2944_p8 = por %p340_p7, %p339_p6  ;;  %p403_p10 = scmp.lt.s32.totalorder %s2780_s15, 7 }
  0x17   : > { %p404_p11 = pnand %p2477_p9, %p403_p10 }
  0x18   : > { %s3996_s16 = sand.u32 (!%p404_p11), 1, %s2756_s26   ;;  %s2479_s21 = sshll.u32 (!%p404_p11), %s2764_s28, 1 }
  0x19   : > { %407 = sbr.rel (%p404_p11) target bundleno = 2381 (0x94d), region = 72  ;;  %s2478_s17 = sshll.u32 (!%p404_p11), %s3996_s16, 3 }
  0x1a   : > { %p448_p12 = scmp.lt.s32.totalorder (!%p404_p11), %s2479_s21, 3  ;;  %p456_p13 = scmp.eq.s32.totalorder (!%p404_p11), %s2768_s29, 0 }
  0x1b   : > { %p457_p0 = scmp.eq.s32.totalorder (!%p404_p11), %s2764_s28, 0  ;;  %s4028_s0 = sld [smem:[#allocation13_spill]] (!%p404_p11) }
  0x1c   : > { %s2963_s30 = scalar_lea.vmem (!%p404_p11), [#allocation6], %s2478_s17 }
  0x1d   : > { %p458_p1 = pnand (!%p404_p11), %p457_p0, %p456_p13 }
  0x20   : > { %s4059_s21 = smov (!%p448_p12, %s2479_s21), 3  ;;  %461 = sbr.rel (%p458_p1) target bundleno = 39 (0x27), region = 76 }
  0x21   : > { %s2480_s20 = sshll.u32 %s4059_s21, 2  ;;  %vm462_vm0 = vcmask (!%p458_p1), 5120   ;;  %vm465_vm1 = vcmask (!%p458_p1), 3072   ;;  %v2782_v2 = vmov (!%p458_p1), 0.0  }
  0x22   : > { %s451_s14 = scalar_lea.vmem %s4028_s0, %s2480_s20  ;;  %463 = vst.msk [vmem:[#allocation2] sm:$0x3f] (!%p458_p1), %vm462_vm0, %v2782_v2  ;;  %464 = vst.msk [vmem:[#allocation3] sm:$0x3f] (!%p458_p1), %vm462_vm0, %v2782_v2 }
  0x23   : > { %v2959_v0 = vld [vmem:[%s451_s14] sm:$0x33]  ;;  %v2961_v1 = vld [vmem:[%s451_s14] sm:$0xcc]  ;;  %466 = vst.msk [vmem:[#allocation4] sm:$0xf] (!%p458_p1), %vm465_vm1, %v2782_v2 }
  0x24   : > { %467 = vst.msk [vmem:[#allocation5] sm:$0xf] (!%p458_p1), %vm465_vm1, %v2782_v2 }
  0x27 PF: > { %p2481_p2 = scmp.ne.s32.totalorder %s2768_s29, 0 }
  0x28   : > { %v471_v3 = vld [vmem:[%s3982_s3] sm:$0xf] (!%p2481_p2)  ;;  %v2783_v4 = vmov (!%p2481_p2), 0   ;;  %v526_v5 = vcombine.high (!%p2481_p2), %v2959_v0, %v2959_v0  ;;  %vm528_vm2 = vcmask (!%p2481_p2), 1041408   ;;  %v538_v8 = vmul.f32 (!%p2481_p2), %v2959_v0, %v2959_v0 }
  0x29   : > { %470 = sbr.rel (%p2481_p2) target bundleno = 329 (0x149), region = 80  ;;  %2662 = vset.pattern.permute.xlu0 (!%p2481_p2), %v2783_v4  ;;  %v529_v6 = vsel (!%p2481_p2), %vm528_vm2, %v2959_v0, 0.0  ;;  %v2784_v11 = vmov (!%p2481_p2), 1   ;;  %v478_v15 = vlaneseq (!%p2481_p2)  ;;  %vm550_vm3 = vcmask (!%p2481_p2), 1043456   ;;  %v524_v45 = vld [vmem:[#allocation2] sm:$0x3] (!%p2481_p2) }
  0x2a   : > { %474 = vperm.xlu0 (!%p2481_p2), %2662, %v471_v3   ;;  %v530_v7 = vsel (!%p2481_p2), %vm528_vm2, %v526_v5, 0.0  ;;  %v540_v10 = vcombine.high (!%p2481_p2), %v538_v8, %v538_v8  ;;  %v542_v12 = vsel (!%p2481_p2), %vm528_vm2, %v538_v8, 0.0  ;;  %vm535_vm4 = vcmask (!%p2481_p2), 1024   ;;  %v537_v48 = vld [vmem:[#allocation3] sm:$0x3] (!%p2481_p2) }
  0x2b   : > { %v531_v9 = vadd.f32 (!%p2481_p2), %v530_v7, %v529_v6  ;;  %v479_v16 = vshrl.u32 (!%p2481_p2), %v478_v15, 7  ;;  %v549_v51 = vld [vmem:[#allocation2 + $0x2] sm:$0xf] (!%p2481_p2)  ;;  %vm557_vm5 = vcmask (!%p2481_p2), 3072   ;;  %v559_v53 = vld [vmem:[#allocation3 + $0x2] sm:$0xf] (!%p2481_p2) }
  0x2c   : > { %v543_v13 = vsel (!%p2481_p2), %vm528_vm2, %v540_v10, 0.0 }
  0x2d   : > { %532 = vadd.xlane.f32.xlu1 (!%p2481_p2), %v531_v9  ;;  %v544_v14 = vadd.f32 (!%p2481_p2), %v543_v13, %v542_v12  ;;  %v480_v17 = vsub.s32 (!%p2481_p2), 2, %v479_v16  ;;  %v484_v18 = vsub.s32 (!%p2481_p2), 6, %v479_v16  ;;  %v504_v19 = vsub.s32 (!%p2481_p2), 3, %v479_v16 }
  0x2e   : > { %2663 = vset.pattern.permute.xlu0 (!%p2481_p2), %v2784_v11  ;;  %v508_v20 = vsub.s32 (!%p2481_p2), 7, %v479_v16 }
  0x2f   : > { %499 = vperm.xlu0 (!%p2481_p2), %2663, %v471_v3   ;;  %v481_v21 = vrot.slane (!%p2481_p2), %v2961_v1, %v480_v17  ;;  %v485_v22 = vrot.slane (!%p2481_p2), %v2961_v1, %v484_v18  ;;  %v505_v23 = vrot.slane (!%p2481_p2), %v2961_v1, %v504_v19 }
  0x30   : > { %v509_v24 = vrot.slane %v2961_v1, %v508_v20 }
  0x31   : > { %545 = vadd.xlane.f32.xlu1 %v544_v14  ;;  %v491_v26 = vrot.slane %v481_v21, %v480_v17  ;;  %v495_v27 = vrot.slane %v485_v22, %v480_v17  ;;  %v515_v28 = vrot.slane %v505_v23, %v504_v19 }
  0x32   : > { %v519_v29 = vrot.slane %v509_v24, %v504_v19 }
  0xa9   : > { %v475_v25 = vpop.permute.xlu0 %474 }
  0xaa   : > { %v496_v31 = vmul.f32 %v491_v26, %v475_v25  ;;  %v497_v32 = vmul.f32 %v495_v27, %v475_v25 }
  0xae   : > { %v500_v30 = vpop.permute.xlu0 %499 }
  0xaf   : > { %v520_v33 = vmul.f32 %v515_v28, %v500_v30  ;;  %v521_v34 = vmul.f32 %v519_v29, %v500_v30 }
  0xb1   : > { %v522_v35 = vadd.f32 %v520_v33, %v496_v31  ;;  %v523_v36 = vadd.f32 %v521_v34, %v497_v32 }
  0xb3   : > { %v551_v37 = vsel %vm550_vm3, %v522_v35, 0.0  ;;  %v552_v38 = vsel %vm550_vm3, %v523_v36, 0.0  ;;  %v560_v39 = vmul.f32 %v522_v35, %v522_v35  ;;  %v561_v40 = vmul.f32 %v523_v36, %v523_v36 }
  0xb4   : > { %v553_v41 = vadd.f32 %v552_v38, %v551_v37 }
  0xb5   : > { %v562_v42 = vsel %vm550_vm3, %v560_v39, 0.0  ;;  %v563_v43 = vsel %vm550_vm3, %v561_v40, 0.0 }
  0xb6   : > { %554 = vadd.xlane.f32.xlu1 %v553_v41  ;;  %v564_v44 = vadd.f32 %v563_v43, %v562_v42 }
  0xb8   : > { %565 = vadd.xlane.f32.xlu0 %v564_v44 }
  0xba   : > { %v533_v46 = vpop.xlane.xlu1 %532 }
  0xbb   : > { %v534_v47 = vadd.f32 %v533_v46, %v524_v45 }
  0xbd   : > { %536 = vst.msk [vmem:[#allocation2] sm:$0x3] %vm535_vm4, %v534_v47 }
  0xbe   : > { %v546_v49 = vpop.xlane.xlu1 %545 }
  0xbf   : > { %v547_v50 = vadd.f32 %v546_v49, %v537_v48 }
  0xc1   : > { %548 = vst.msk [vmem:[#allocation3] sm:$0x3] %vm535_vm4, %v547_v50 }
 0x143   : > { %v555_v52 = vpop.xlane.xlu1 %554 }
 0x144   : > { %v556_v54 = vadd.f32 %v555_v52, %v549_v51 }
 0x145   : > { %v566_v55 = vpop.xlane.xlu0 %565 }
 0x146   : > { %558 = vst.msk [vmem:[#allocation2 + $0x2] sm:$0xf] %vm557_vm5, %v556_v54  ;;  %v567_v56 = vadd.f32 %v566_v55, %v559_v53 }
 0x148   : > { %568 = vst.msk [vmem:[#allocation3 + $0x2] sm:$0xf] %vm557_vm5, %v567_v56 }
 0x149 PF: > { %p2482_p4 = scmp.ne.s32.totalorder %s2768_s29, 1 }
 0x14a   : > { %v573_v57 = vld [vmem:[%s3982_s3] sm:$0xf] (!%p2482_p4)  ;;  %v2984_v58 = vcombine.high (!%p2482_p4), %v2959_v0, %v2959_v0  ;;  %v2785_v59 = vmov (!%p2482_p4), 1   ;;  %v2786_v60 = vmov (!%p2482_p4), 0   ;;  %v628_v62 = vld [vmem:[#allocation3] sm:$0x3] (!%p2482_p4)  ;;  %v580_v25 = vlaneseq (!%p2482_p4) }
 0x14b   : > { %572 = sbr.rel (%p2482_p4) target bundleno = 1046 (0x416), region = 84  ;;  %2664 = vset.pattern.permute.xlu0 (!%p2482_p4), %v2785_v59  ;;  %2666 = vset.pattern.permute.xlu1 (!%p2482_p4), %v2786_v60  ;;  %v626_v61 = vld [vmem:[#allocation2] sm:$0x3] (!%p2482_p4)  ;;  %s3999_s17 = smov (!%p2482_p4), 16   ;;  %v629_v2 = vmul.f32 (!%p2482_p4), 0.001953125, %v628_v62  ;;  %vm913_vm6 = vcmask (!%p2482_p4), 1041408  }
 0x14c   : > { %601 = vperm.xlu0 (!%p2482_p4), %2664, %v573_v57   ;;  %727 = vrot.lane.b32.xlu1 (!%p2482_p4), %v2984_v58, %s3999_s17  ;;  %v627_v63 = vmul.f32 (!%p2482_p4), 0.001953125, %v626_v61  ;;  %s3997_s20 = smov (!%p2482_p4), 127   ;;  %v632_v13 = vld [vmem:[%s3984_s5] sm:$0x3] (!%p2482_p4)  ;;  %v645_v14 = vld [vmem:[%s3984_s5 + $0x2] sm:$0xf] (!%p2482_p4) }
 0x14d   : > { %v639_v3 = vld [vmem:[#allocation2 + $0x2] sm:$0xf] (!%p2482_p4)  ;;  %v636_v22 = vld [vmem:[%s3985_s6] sm:$0x3] (!%p2482_p4)  ;;  %s4009_s18 = smov (!%p2482_p4), 15   ;;  %s4003_s0 = smov (!%p2482_p4), 113  }
 0x14e   : > { %v640_v5 = vmul.f32 (!%p2482_p4), 0.001953125, %v639_v3  ;;  %v630_v7 = vmul.f32 (!%p2482_p4), %v627_v63, %v627_v63  ;;  %v649_v19 = vld [vmem:[%s3985_s6 + $0x2] sm:$0xf] (!%p2482_p4)  ;;  %s4007_s16 = smov (!%p2482_p4), 17   ;;  %v581_v26 = vshrl.u32 (!%p2482_p4), %v580_v25, 7  ;;  %v3038_v62 = vand.u32 (!%p2482_p4), 127, %v580_v25 }
 0x14f   : > { %v641_v4 = vld [vmem:[#allocation3 + $0x2] sm:$0xf] (!%p2482_p4)  ;;  %v2794_v38 = vmov (!%p2482_p4), 839922192   ;;  %s4029_s1 = sld [smem:[#allocation14_spill]] (!%p2482_p4)  ;;  %s4030_s19 = smov (!%p2482_p4), 15  }
 0x150   : > { %v642_v6 = vmul.f32 (!%p2482_p4), 0.001953125, %v641_v4  ;;  %v643_v8 = vmul.f32 (!%p2482_p4), %v640_v5, %v640_v5  ;;  %2665 = vset.pattern.permute.xlu0 (!%p2482_p4), %v2786_v60  ;;  %794 = vrot.lane.b32.xlu1 (!%p2482_p4), %v2984_v58, %s3997_s20  ;;  %v631_v9 = vsub.f32 (!%p2482_p4), %v629_v2, %v630_v7  ;;  %v606_v28 = vsub.s32 (!%p2482_p4), 3, %v581_v26  ;;  %s4034_s14 = smov (!%p2482_p4), 113   ;;  %s4037_s2 = sld [smem:[#allocation15_spill]] (!%p2482_p4) }
 0x151   : > { %576 = vperm.xlu0 (!%p2482_p4), %2665, %v573_v57   ;;  %v610_v29 = vsub.s32 (!%p2482_p4), 7, %v581_v26  ;;  %v582_v30 = vsub.s32 (!%p2482_p4), 2, %v581_v26  ;;  %v586_v31 = vsub.s32 (!%p2482_p4), 6, %v581_v26  ;;  %v657_v39 = vunpack.c.l.s4 (!%p2482_p4), %v2794_v38 }
 0x152   : > { %v644_v10 = vsub.f32 %v642_v6, %v643_v8  ;;  %v633_v11 = vadd.f32 1e-05, %v631_v9  ;;  %v607_v34 = vrot.slane %v2961_v1, %v606_v28  ;;  %vm729_vm7 = vcmp.lt.s32.totalorder %v3038_v62, 16 }
 0x153   : > { %v611_v35 = vrot.slane %v2961_v1, %v610_v29  ;;  %v583_v36 = vrot.slane %v2961_v1, %v582_v30  ;;  %v587_v37 = vrot.slane %v2961_v1, %v586_v31  ;;  %v658_v46 = vunpack.c.0.s8 %v657_v39 }
 0x154   : > { %v646_v12 = vadd.f32 1e-05, %v644_v10  ;;  %2667 = vrsqrt.f32 %v633_v11  ;;  %v617_v40 = vrot.slane %v607_v34, %v606_v28  ;;  %vm796_vm8 = vcmp.lt.s32.totalorder %v3038_v62, 127 }
 0x155   : > { %725 = vrot.lane.b32.xlu0 %v2959_v0, %s3999_s17  ;;  %s4005_s17 = smov 1   ;;  %v621_v41 = vrot.slane %v611_v35, %v606_v28  ;;  %v593_v42 = vrot.slane %v583_v36, %v582_v30  ;;  %v597_v43 = vrot.slane %v587_v37, %v582_v30  ;;  %v661_v53 = vsub.s32 %v658_v46, %v581_v26  ;;  %v693_v2 = vld [vmem:[%s4029_s1] ss:$8 sm:$0x3] }
 0x156   : > { %2669 = vrsqrt.f32 %v646_v12  ;;  %v2484_v3 = vld [vmem:[%s4029_s1 + $0x4] ss:$8 sm:$0x3]  ;;  %v2486_v6 = vld [vmem:[%s4029_s1 + $0x1] ss:$8 sm:$0x3] }
 0x157   : > { %v2483_v11 = vld [vmem:[%s4029_s1 + $0x3] ss:$8 sm:$0x3]  ;;  %v3069_v12 = vld [vmem:[%s4029_s1 + $0x2] ss:$8 sm:$0x3] }
 0x158   : > { %v696_v25 = vmul.f32 %v2483_v11, %v693_v2  ;;  %v770_v29 = vmul.f32 %v2486_v6, %v2483_v11  ;;  %vm752_vm9 = vcmp.lt.s32.totalorder %v3038_v62, 15  ;;  %vm819_vm10 = vcmp.lt.s32.totalorder %v3038_v62, 113 }
 0x159   : > { %792 = vrot.lane.b32.xlu0 %v2959_v0, %s3997_s20  ;;  %s4001_s20 = smov 112   ;;  %vm706_vm11 = vcmp.lt.s32.totalorder %v3038_v62, 17  ;;  %vm775_vm12 = vcmp.lt.s32.totalorder %v3038_v62, 1  ;;  %vm840_vm13 = vcmp.lt.s32.totalorder %v3038_v62, 112  ;;  %vm916_vm14 = vcmask 1043456  }
 0x15a   : > { %vm919_vm15 = vcmask 1045504   ;;  %vm861_vm0 = vcmp.lt.s32.totalorder %v3038_v62, 111  ;;  %vm1245_vm1 = vcmask 441344   ;;  %vm928_vm2 = vcmask 146432  }
 0x15b   : > { %vm1333_vm3 = vcmask 1024  }
 0x15e   : > { %v2668_v15 = vpop.eup %2667 }
 0x15f   : > { %v635_v17 = vmul.f32 %v2668_v15, %v632_v13  ;;  %v3071_v13 = vsub.s32 0, %v581_v26  ;;  %v724_v15 = vmul.f32 %v2484_v3, %v693_v2 }
 0x160   : > { %v2670_v16 = vpop.eup %2669 }
 0x161   : > { %v648_v18 = vmul.f32 %v2670_v16, %v645_v14  ;;  %654 = vperm.xlu1 %2666, %v635_v17   ;;  %v637_v20 = vmul.f32 %v635_v17, %v627_v63  ;;  %v3073_v14 = vsub.s32 1, %v581_v26 }
 0x163   : > { %v650_v21 = vmul.f32 %v648_v18, %v640_v5  ;;  %v638_v24 = vsub.f32 %v636_v22, %v637_v20  ;;  %v3051_v5 = vld [vmem:[%s4029_s1 + $0x5] ss:$8 sm:$0x3]  ;;  %v3099_v28 = vrot.slane %v724_v15, %v3073_v14  ;;  %v3144_v46 = vrot.slane %v696_v25, %v3073_v14 }
 0x164   : > { %v791_v17 = vmul.f32 %v2486_v6, %v3051_v5  ;;  %v747_v20 = vmul.f32 %v3051_v5, %v693_v2 }
 0x165   : > { %v651_v23 = vsub.f32 %v649_v19, %v650_v21  ;;  %680 = vperm.xlu1 %2666, %v648_v18   ;;  %v814_v21 = vmul.f32 %v3069_v12, %v2483_v11 }
 0x166   : > { %v3107_v31 = vrot.slane %v791_v17, %v3071_v13  ;;  %v3114_v35 = vrot.slane %v747_v20, %v3071_v13  ;;  %v3117_v36 = vrot.slane %v747_v20, %v3073_v14 }
 0x167   : > { %687 = vperm.xlu0 %2665, %v651_v23   ;;  %v3121_v37 = vrot.slane %v814_v21, %v3071_v13  ;;  %v3128_v39 = vrot.slane %v814_v21, %v3073_v14 }
 0x169   : > { %667 = vperm.xlu1 %2666, %v638_v24  }
 0x16b   : > { %748 = vrot.lane.b32.xlu0 %v2959_v0, %s4009_s18 }
 0x16d   : > { %750 = vrot.lane.b32.xlu1 %v2984_v58, %s4009_s18  ;;  %s4032_s18 = smov 16  }
 0x16f   : > { %815 = vrot.lane.b32.xlu0 %v2959_v0, %s4003_s0 }
 0x171   : > { %817 = vrot.lane.b32.xlu1 %v2984_v58, %s4003_s0  ;;  %s4035_s0 = smov 112  }
 0x173   : > { %700 = vrot.lane.b32.xlu0 %v2959_v0, %s4007_s16 }
 0x175   : > { %702 = vrot.lane.b32.xlu1 %v2984_v58, %s4007_s16  ;;  %s4033_s16 = smov 1  }
 0x177   : > { %771 = vrot.lane.b32.xlu0 %v2959_v0, %s4005_s17 }
 0x179   : > { %773 = vrot.lane.b32.xlu1 %v2984_v58, %s4005_s17  ;;  %s4036_s17 = smov 127  }
 0x17b   : > { %836 = vrot.lane.b32.xlu0 %v2959_v0, %s4001_s20 }
 0x17d   : > { %838 = vrot.lane.b32.xlu1 %v2984_v58, %s4001_s20  ;;  %s4031_s20 = smov 17  }
 0x1be   : > { %v3026_v33 = vpop.permute.xlu1 %727 }
 0x1c2   : > { %v3034_v45 = vpop.permute.xlu1 %794 }
 0x1cb   : > { %v602_v27 = vpop.permute.xlu0 %601 }
 0x1cc   : > { %v622_v47 = vmul.f32 %v617_v40, %v602_v27  ;;  %v623_v48 = vmul.f32 %v621_v41, %v602_v27  ;;  %v3096_v27 = vrot.slane %v724_v15, %v3071_v13  ;;  %v3132_v40 = vrot.slane %v696_v25, %v3071_v13 }
 0x1cd   : > { %v835_v41 = vmul.f32 %v3069_v12, %v2484_v3 }
 0x1cf   : > { %v3202_v20 = vrot.slane %v835_v41, %v3073_v14 }
 0x1d0   : > { %v577_v32 = vpop.permute.xlu0 %576 }
 0x1d1   : > { %v598_v49 = vmul.f32 %v593_v42, %v577_v32  ;;  %v599_v50 = vmul.f32 %v597_v43, %v577_v32  ;;  %v3110_v32 = vrot.slane %v791_v17, %v3073_v14 }
 0x1d3   : > { %v624_v54 = vadd.f32 %v622_v47, %v598_v49  ;;  %v625_v55 = vadd.f32 %v623_v48, %v599_v50  ;;  %v3147_v47 = vrot.slane %v770_v29, %v3071_v13 }
 0x1d4   : > { %v3032_v44 = vpop.permute.xlu0 %725 }
 0x1d5   : > { %v730_v42 = vsel %vm729_vm7, %v3032_v44, %v3026_v33  ;;  %v731_v43 = vsel %vm729_vm7, %v3026_v33, %v3032_v44 }
 0x1d8   : > { %v3036_v52 = vpop.permute.xlu0 %792 }
 0x1d9   : > { %v797_v48 = vsel %vm796_vm8, %v3036_v52, %v3034_v45  ;;  %v798_v49 = vsel %vm796_vm8, %v3034_v45, %v3036_v52  ;;  %v744_v52 = vmul.f32 %v3099_v28, %v730_v42 }
 0x1db   : > { %v880_v17 = vrot.slane %v744_v52, 6 }
 0x1e0   : > { %v655_v51 = vpop.permute.xlu1 %654 }
 0x1e1   : > { %v662_v57 = vrot.slane %v655_v51, %v661_v53 }
 0x1e3   : > { %v664_v7 = vmul.f32 %v662_v57, %v2959_v0  ;;  %v3179_v57 = vrot.slane %v835_v41, %v3071_v13 }
 0x1e4   : > { %v681_v56 = vpop.permute.xlu1 %680 }
 0x1e5   : > { %v683_v59 = vmul.f32 %v681_v56, %v624_v54  ;;  %v684_v60 = vmul.f32 %v681_v56, %v625_v55  ;;  %v3176_v56 = vrot.slane %v770_v29, %v3073_v14 }
 0x1e6   : > { %v688_v61 = vpop.permute.xlu0 %687 }
 0x1e7   : > { %v3040_v63 = vadd.f32 %v688_v61, %v683_v59  ;;  %v3057_v8 = vadd.f32 %v688_v61, %v684_v60  ;;  %v743_v59 = vmul.f32 %v3096_v27, %v731_v43  ;;  %v810_v60 = vmul.f32 %v3107_v31, %v797_v48 }
 0x1e8   : > { %v668_v4 = vpop.permute.xlu1 %667  ;;  %v811_v61 = vmul.f32 %v3110_v32, %v798_v49 }
 0x1e9   : > { %v675_v9 = vrot.slane %v668_v4, %v661_v53  ;;  %1053 = vrot.lane.b32.xlu0 %v3040_v63, %s4030_s19  ;;  %1021 = vrot.lane.b32.xlu1 %v3040_v63, %s4031_s20  ;;  %v1179_v19 = vrot.slane %v3040_v63, 6  ;;  %v1180_v24 = vrot.slane %v3057_v8, 6 }
 0x1ea   : > { %v749_v10 = vpop.permute.xlu0 %748  ;;  %v898_v25 = vrot.slane %v811_v61, 6 }
 0x1eb   : > { %v3075_v16 = vadd.f32 %v675_v9, %v664_v7 }
 0x1ec   : > { %v751_v18 = vpop.permute.xlu1 %750 }
 0x1ed   : > { %1037 = vrot.lane.b32.xlu0 %v3040_v63, %s4032_s18  ;;  %1023 = vrot.lane.b32.xlu1 %v3057_v8, %s4031_s20  ;;  %v3087_v23 = vcombine.high %v3075_v16, %v3075_v16  ;;  %v3093_v26 = vsel %vm913_vm6, %v3075_v16, %v1179_v19  ;;  %v753_v50 = vsel %vm752_vm9, %v749_v10, %v751_v18 }
 0x1ee   : > { %v816_v22 = vpop.permute.xlu0 %815  ;;  %v754_v33 = vsel %vm752_vm9, %v751_v18, %v749_v10  ;;  %v767_v3 = vmul.f32 %v3117_v36, %v753_v50 }
 0x1ef   : > { %v3103_v30 = vsel %vm913_vm6, %v3087_v23, %v1180_v24  ;;  %v766_v2 = vmul.f32 %v3114_v35, %v754_v33  ;;  %v897_v24 = vrot.slane %v810_v60, 6 }
 0x1f0   : > { %v818_v34 = vpop.permute.xlu1 %817 }
 0x1f1   : > { %1069 = vrot.lane.b32.xlu0 %v3040_v63, %s4033_s16  ;;  %1055 = vrot.lane.b32.xlu1 %v3057_v8, %s4030_s19  ;;  %v820_v51 = vsel %vm819_vm10, %v816_v22, %v818_v34  ;;  %v821_v53 = vsel %vm819_vm10, %v818_v34, %v816_v22  ;;  %v879_v22 = vrot.slane %v743_v59, 6  ;;  %v885_v29 = vrot.slane %v766_v2, 4 }
 0x1f2   : > { %v701_v38 = vpop.permute.xlu0 %700  ;;  %v833_v4 = vmul.f32 %v3121_v37, %v820_v51  ;;  %v834_v6 = vmul.f32 %v3128_v39, %v821_v53  ;;  %v886_v34 = vrot.slane %v767_v3, 4 }
 0x1f4   : > { %v703_v44 = vpop.permute.xlu1 %702  ;;  %v903_v48 = vrot.slane %v833_v4, 4 }
 0x1f5   : > { %v707_v54 = vsel %vm706_vm11, %v701_v38, %v703_v44  ;;  %1101 = vrot.lane.b32.xlu0 %v3040_v63, %s4034_s14  ;;  %1039 = vrot.lane.b32.xlu1 %v3057_v8, %s4032_s18  ;;  %v708_v55 = vsel %vm706_vm11, %v703_v44, %v701_v38  ;;  %v904_v38 = vrot.slane %v834_v6, 4 }
 0x1f6   : > { %v772_v45 = vpop.permute.xlu0 %771  ;;  %v721_v7 = vmul.f32 %v3144_v46, %v707_v54  ;;  %v720_v10 = vmul.f32 %v3132_v40, %v708_v55  ;;  %v923_v54 = vsel %vm913_vm6, %v2984_v58, %v898_v25 }
 0x1f7   : > { %v925_v59 = vsel %vm916_vm14, %v923_v54, %v904_v38 }
 0x1f8   : > { %v774_v9 = vpop.permute.xlu1 %773  ;;  %v915_v43 = vsel %vm913_vm6, %v721_v7, %v880_v17  ;;  %v914_v41 = vsel %vm913_vm6, %v720_v10, %v879_v22 }
 0x1f9   : > { %v776_v11 = vsel %vm775_vm12, %v772_v45, %v774_v9  ;;  %v777_v15 = vsel %vm775_vm12, %v774_v9, %v772_v45  ;;  %1117 = vrot.lane.b32.xlu0 %v3040_v63, %s4035_s0  ;;  %1071 = vrot.lane.b32.xlu1 %v3057_v8, %s4033_s16  ;;  %v922_v45 = vsel %vm913_vm6, %v2959_v0, %v897_v24 }
 0x1fa   : > { %v789_v18 = vmul.f32 %v3147_v47, %v777_v15  ;;  %v790_v19 = vmul.f32 %v3176_v56, %v776_v11  ;;  %v837_v21 = vpop.permute.xlu0 %836  ;;  %v918_v60 = vsel %vm916_vm14, %v915_v43, %v886_v34  ;;  %v917_v61 = vsel %vm916_vm14, %v914_v41, %v885_v29 }
 0x1fb   : > { %v924_v2 = vsel %vm916_vm14, %v922_v45, %v903_v48  ;;  %v2796_v11 = vmov 0.0  }
 0x1fc   : > { %v839_v42 = vpop.permute.xlu1 %838  ;;  %v891_v33 = vrot.slane %v789_v18, 2  ;;  %v892_v44 = vrot.slane %v790_v19, 2  ;;  %1002 = vmatprep.mubr.f32.mxu0 %v2796_v11  ;;  %1319 = vmatprep.mubr.f32.mxu1 %v2796_v11 }
 0x1fd   : > { %v841_v49 = vsel %vm840_vm13, %v837_v21, %v839_v42  ;;  %v842_v50 = vsel %vm840_vm13, %v839_v42, %v837_v21  ;;  %1085 = vrot.lane.b32.xlu0 %v3040_v63, %s4036_s17  ;;  %1103 = vrot.lane.b32.xlu1 %v3057_v8, %s4034_s14 }
 0x1fe   : > { %v854_v51 = vmul.f32 %v3179_v57, %v841_v49  ;;  %v855_v53 = vmul.f32 %v3202_v20, %v842_v50  ;;  %v921_v3 = vsel %vm919_vm15, %v918_v60, %v892_v44  ;;  %v920_v6 = vsel %vm919_vm15, %v917_v61, %v891_v33 }
 0x200   : > { %v909_v52 = vrot.slane %v854_v51, 2  ;;  %v910_v55 = vrot.slane %v855_v53, 2 }
 0x201   : > { %1045 = vrot.lane.b32.xlu0 %v3075_v16, %s4030_s19  ;;  %1119 = vrot.lane.b32.xlu1 %v3057_v8, %s4035_s0 }
 0x202   : > { %v927_v4 = vsel %vm919_vm15, %v925_v59, %v910_v55  ;;  %v926_v7 = vsel %vm919_vm15, %v924_v2, %v909_v52 }
 0x203   : > { %v2531_v9 = vpack.c.bf16 %v927_v4, %v921_v3  ;;  %v2533_v10 = vpack.c.bf16 %v926_v7, %v920_v6 }
 0x205   : > { %1029 = vrot.lane.b32.xlu0 %v3075_v16, %s4032_s18  ;;  %1087 = vrot.lane.b32.xlu1 %v3057_v8, %s4036_s17 }
 0x206   : > { %2532 = vmatprep.subr.bf16.mxu0 %v2531_v9 }
 0x207   : > { %2534 = vmatpush1.bf16.msra.mxu0 %v2533_v10 }
 0x209   : > { %1013 = vrot.lane.b32.xlu0 %v3075_v16, %s4031_s20  ;;  %1047 = vrot.lane.b32.xlu1 %v3087_v23, %s4030_s19  ;;  %s2795_s19 = smov 111  }
 0x20d   : > { %1061 = vrot.lane.b32.xlu0 %v3075_v16, %s4033_s16  ;;  %1031 = vrot.lane.b32.xlu1 %v3087_v23, %s4032_s18 }
 0x211   : > { %1077 = vrot.lane.b32.xlu0 %v3075_v16, %s4036_s17  ;;  %1015 = vrot.lane.b32.xlu1 %v3087_v23, %s4031_s20 }
 0x215   : > { %1093 = vrot.lane.b32.xlu0 %v3075_v16, %s4034_s14  ;;  %1063 = vrot.lane.b32.xlu1 %v3087_v23, %s4033_s16 }
 0x219   : > { %1109 = vrot.lane.b32.xlu0 %v3075_v16, %s4035_s0  ;;  %1079 = vrot.lane.b32.xlu1 %v3087_v23, %s4036_s17 }
 0x21d   : > { %1133 = vrot.lane.b32.xlu0 %v3040_v63, %s2795_s19  ;;  %1095 = vrot.lane.b32.xlu1 %v3087_v23, %s4034_s14 }
 0x221   : > { %1125 = vrot.lane.b32.xlu0 %v3075_v16, %s2795_s19  ;;  %1111 = vrot.lane.b32.xlu1 %v3087_v23, %s4035_s0 }
 0x225   : > { %1135 = vrot.lane.b32.xlu1 %v3057_v8, %s2795_s19  ;;  %857 = vrot.lane.b32.xlu0 %v2959_v0, %s2795_s19 }
 0x229   : > { %1127 = vrot.lane.b32.xlu1 %v3087_v23, %s2795_s19 }
 0x22d   : > { %859 = vrot.lane.b32.xlu1 %v2984_v58, %s2795_s19 }
 0x25b   : > { %v1022_v63 = vpop.permute.xlu1 %1021  ;;  %v1054_v15 = vpop.permute.xlu0 %1053 }
 0x25f   : > { %v1024_v17 = vpop.permute.xlu1 %1023  ;;  %v1038_v18 = vpop.permute.xlu0 %1037 }
 0x260   : > { %v1025_v48 = vsel %vm706_vm11, %v1022_v63, %v1024_v17  ;;  %v1026_v49 = vsel %vm706_vm11, %v1024_v17, %v1022_v63 }
 0x261   : > { %v1027_v54 = vmul.f32 %v1026_v49, %v3132_v40  ;;  %v1028_v45 = vmul.f32 %v1025_v48, %v3144_v46 }
 0x263   : > { %v1056_v19 = vpop.permute.xlu1 %1055  ;;  %v1070_v16 = vpop.permute.xlu0 %1069  ;;  %v1144_v17 = vrot.slane %v1028_v45, 6 }
 0x264   : > { %v1057_v51 = vsel %vm752_vm9, %v1054_v15, %v1056_v19  ;;  %v1058_v53 = vsel %vm752_vm9, %v1056_v19, %v1054_v15  ;;  %v1143_v15 = vrot.slane %v1027_v54, 6 }
 0x265   : > { %v1059_v6 = vmul.f32 %v1058_v53, %v3114_v35  ;;  %v1060_v7 = vmul.f32 %v1057_v51, %v3117_v36 }
 0x267   : > { %v1040_v21 = vpop.permute.xlu1 %1039  ;;  %v3266_v22 = vpop.permute.xlu0 %1101 }
 0x268   : > { %v1041_v52 = vsel %vm729_vm7, %v1038_v18, %v1040_v21  ;;  %v1042_v55 = vsel %vm729_vm7, %v1040_v21, %v1038_v18 }
 0x269   : > { %v1043_v9 = vmul.f32 %v1042_v55, %v3096_v27  ;;  %v1044_v10 = vmul.f32 %v1041_v52, %v3099_v28 }
 0x26b   : > { %v1072_v24 = vpop.permute.xlu1 %1071  ;;  %v3268_v8 = vpop.permute.xlu0 %1117 }
 0x26c   : > { %v1073_v48 = vsel %vm775_vm12, %v1070_v16, %v1072_v24  ;;  %v1074_v49 = vsel %vm775_vm12, %v1072_v24, %v1070_v16 }
 0x26f   : > { %v3270_v25 = vpop.permute.xlu1 %1103  ;;  %v3272_v29 = vpop.permute.xlu0 %1085 }
 0x273   : > { %v3274_v34 = vpop.permute.xlu1 %1119  ;;  %v1046_v23 = vpop.permute.xlu0 %1045 }
 0x277   : > { %v3276_v58 = vpop.permute.xlu1 %1087  ;;  %v1030_v38 = vpop.permute.xlu0 %1029 }
 0x27b   : > { %v1048_v42 = vpop.permute.xlu1 %1047  ;;  %v1014_v43 = vpop.permute.xlu0 %1013 }
 0x27c   : > { %v1049_v50 = vsel %vm752_vm9, %v1046_v23, %v1048_v42  ;;  %v1050_v41 = vsel %vm752_vm9, %v1048_v42, %v1046_v23  ;;  %v1162_v42 = vrot.slane %v1060_v7, 2 }
 0x27d   : > { %v1051_v33 = vmul.f32 %v1050_v41, %v3114_v35  ;;  %v1052_v44 = vmul.f32 %v1049_v50, %v3117_v36 }
 0x27f   : > { %v1032_v59 = vpop.permute.xlu1 %1031  ;;  %v1062_v60 = vpop.permute.xlu0 %1061  ;;  %v1155_v61 = vrot.slane %v1051_v33, 4  ;;  %v1156_v2 = vrot.slane %v1052_v44, 4 }
 0x280   : > { %v1033_v3 = vsel %vm729_vm7, %v1030_v38, %v1032_v59  ;;  %v1034_v4 = vsel %vm729_vm7, %v1032_v59, %v1030_v38  ;;  %v1161_v38 = vrot.slane %v1059_v6, 2 }
 0x281   : > { %v1035_v11 = vmul.f32 %v1034_v4, %v3096_v27  ;;  %v1036_v63 = vmul.f32 %v1033_v3, %v3099_v28  ;;  %v1218_v36 = vsel %vm916_vm14, %v1044_v10, %v1156_v2  ;;  %v1217_v23 = vsel %vm916_vm14, %v1043_v9, %v1155_v61 }
 0x282   : > { %v1220_v51 = vsel %vm919_vm15, %v1218_v36, %v1162_v42  ;;  %v1075_v61 = vmul.f32 %v1074_v49, %v3147_v47  ;;  %v1076_v2 = vmul.f32 %v1073_v48, %v3176_v56  ;;  %v1105_v3 = vsel %vm819_vm10, %v3266_v22, %v3270_v25 }
 0x283   : > { %v1016_v18 = vpop.permute.xlu1 %1015  ;;  %v1078_v19 = vpop.permute.xlu0 %1077  ;;  %v1149_v50 = vrot.slane %v1035_v11, 2  ;;  %v1150_v41 = vrot.slane %v1036_v63, 2  ;;  %v1089_v49 = vsel %vm796_vm8, %v3272_v29, %v3276_v58 }
 0x284   : > { %v1017_v21 = vsel %vm706_vm11, %v1014_v43, %v1016_v18  ;;  %v1018_v35 = vsel %vm706_vm11, %v1016_v18, %v1014_v43  ;;  %v1107_v18 = vmul.f32 %v1105_v3, %v3121_v37 }
 0x285   : > { %v1019_v27 = vmul.f32 %v1018_v35, %v3132_v40  ;;  %v1020_v28 = vmul.f32 %v1017_v21, %v3144_v46  ;;  %v1219_v40 = vsel %vm919_vm15, %v1217_v23, %v1161_v38 }
 0x287   : > { %v1064_v33 = vpop.permute.xlu1 %1063  ;;  %v1094_v43 = vpop.permute.xlu0 %1093  ;;  %v1214_v44 = vsel %vm913_vm6, %v1020_v28, %v1144_v17  ;;  %v1213_v53 = vsel %vm913_vm6, %v1019_v27, %v1143_v15  ;;  %v1173_v15 = vrot.slane %v1075_v61, 4  ;;  %v1174_v17 = vrot.slane %v1076_v2, 4 }
 0x288   : > { %v1065_v46 = vsel %vm775_vm12, %v1062_v60, %v1064_v33  ;;  %v1066_v54 = vsel %vm775_vm12, %v1064_v33, %v1062_v60  ;;  %v1216_v16 = vsel %vm919_vm15, %v1214_v44, %v1150_v41  ;;  %v1215_v24 = vsel %vm919_vm15, %v1213_v53, %v1149_v50 }
 0x289   : > { %v1067_v45 = vmul.f32 %v1066_v54, %v3147_v47  ;;  %v1068_v52 = vmul.f32 %v1065_v46, %v3176_v56  ;;  %v2535_v55 = vpack.c.bf16 %v1220_v51, %v1216_v16  ;;  %v2537_v59 = vpack.c.bf16 %v1219_v40, %v1215_v24 }
 0x28a   : > { %v1106_v60 = vsel %vm819_vm10, %v3270_v25, %v3266_v22  ;;  %v856_v56 = vmul.f32 %v3069_v12, %v3051_v5  ;;  %v1121_v5 = vsel %vm840_vm13, %v3268_v8, %v3274_v34  ;;  %v1122_v12 = vsel %vm840_vm13, %v3274_v34, %v3268_v8 }
 0x28b   : > { %v1167_v4 = vrot.slane %v1067_v45, 6  ;;  %v1168_v6 = vrot.slane %v1068_v52, 6  ;;  %v1080_v7 = vpop.permute.xlu1 %1079  ;;  %2536 = vmatprep.subr.bf16.mxu1 %v2535_v55  ;;  %v1110_v63 = vpop.permute.xlu0 %1109  ;;  %v1108_v21 = vmul.f32 %v1106_v60, %v3128_v39  ;;  %v1090_v50 = vsel %vm796_vm8, %v3276_v58, %v3272_v29 }
 0x28c   : > { %v1081_v9 = vsel %vm796_vm8, %v1078_v19, %v1080_v7  ;;  %v1082_v47 = vsel %vm796_vm8, %v1080_v7, %v1078_v19  ;;  %2538 = vmatpush1.bf16.msra.mxu1 %v2537_v59  ;;  %v1124_v51 = vmul.f32 %v1122_v12, %v3202_v20  ;;  %v1091_v58 = vmul.f32 %v1089_v49, %v3107_v31 }
 0x28d   : > { %v1083_v10 = vmul.f32 %v1081_v9, %v3107_v31  ;;  %v1084_v11 = vmul.f32 %v1082_v47, %v3110_v32  ;;  %v1222_v22 = vsel %vm913_vm6, %v1162_v42, %v1168_v6  ;;  %v1221_v25 = vsel %vm913_vm6, %v1161_v38, %v1167_v4 }
 0x28e   : > { %v1224_v42 = vsel %vm916_vm14, %v1222_v22, %v1174_v17  ;;  %v1223_v27 = vsel %vm916_vm14, %v1221_v25, %v1173_v15  ;;  %v1092_v40 = vmul.f32 %v1090_v50, %v3110_v32  ;;  %v1198_v16 = vrot.slane %v1108_v21, 2 }
 0x28f   : > { %v1185_v19 = vrot.slane %v1083_v10, 2  ;;  %v1186_v35 = vrot.slane %v1084_v11, 2  ;;  %v1096_v36 = vpop.permute.xlu1 %1095  ;;  %v868_v24 = vrot.slane %v856_v56, %v3071_v13  ;;  %v1210_v31 = vrot.slane %v1124_v51, 4 }
 0x290   : > { %v1097_v23 = vsel %vm819_vm10, %v1094_v43, %v1096_v36  ;;  %v1098_v38 = vsel %vm819_vm10, %v1096_v36, %v1094_v43  ;;  %v1134_v43 = vpop.permute.xlu0 %1133  ;;  %v1009_v36 = vld [vmem:[%s3983_s4] sm:$0x3] }
 0x291   : > { %v1099_v28 = vmul.f32 %v1097_v23, %v3121_v37  ;;  %v1100_v48 = vmul.f32 %v1098_v38, %v3128_v39  ;;  %v1228_v8 = vsel %vm919_vm15, %v3103_v30, %v1186_v35  ;;  %v1227_v34 = vsel %vm919_vm15, %v3093_v26, %v1185_v19 }
 0x292   : > { %v2539_v41 = vpack.c.bf16 %v1228_v8, %v1224_v42  ;;  %v2541_v37 = vpack.c.bf16 %v1227_v34, %v1223_v27  ;;  %v872_v26 = vrot.slane %v856_v56, %v3073_v14  ;;  %v1123_v30 = vmul.f32 %v1121_v5, %v3179_v57  ;;  %v692_v27 = vld [vmem:[%s4037_s2] sm:$0x3] }
 0x293   : > { %v1191_v33 = vrot.slane %v1099_v28, 4  ;;  %v1192_v39 = vrot.slane %v1100_v48, 4  ;;  %v1112_v44 = vpop.permute.xlu1 %1111  ;;  %v1197_v14 = vrot.slane %v1107_v18, 2 }
 0x294   : > { %v1113_v53 = vsel %vm840_vm13, %v1110_v63, %v1112_v44  ;;  %v1114_v29 = vsel %vm840_vm13, %v1112_v44, %v1110_v63  ;;  %2540 = vmatprep.subr.bf16.mxu1 %v2539_v41  ;;  %v1209_v2 = vrot.slane %v1123_v30, 4 }
 0x295   : > { %v1115_v46 = vmul.f32 %v1113_v53, %v3179_v57  ;;  %v1116_v54 = vmul.f32 %v1114_v29, %v3202_v20  ;;  %2542 = vmatpush1.bf16.msra.mxu1 %v2541_v37  ;;  %v1230_v59 = vsel %vm916_vm14, %v1092_v40, %v1192_v39  ;;  %v1229_v61 = vsel %vm916_vm14, %v1091_v58, %v1191_v33  ;;  %v1126_v20 = vpop.permute.xlu0 %1125 }
 0x296   : > { %v1232_v4 = vsel %vm919_vm15, %v1230_v59, %v1198_v16  ;;  %v1231_v7 = vsel %vm919_vm15, %v1229_v61, %v1197_v14  ;;  %v1353_v61 = vld [vmem:[#allocation5 + $0x2] sm:$0x3] }
 0x297   : > { %v1203_v45 = vrot.slane %v1115_v46, 6  ;;  %v1204_v52 = vrot.slane %v1116_v54, 6  ;;  %v1136_v55 = vpop.permute.xlu1 %1135  ;;  %v1326_v46 = vld [vmem:[#allocation4] sm:$0x3] }
 0x298   : > { %v1137_v32 = vsel %vm861_vm0, %v1134_v43, %v1136_v55  ;;  %v1138_v57 = vsel %vm861_vm0, %v1136_v55, %v1134_v43 }
 0x299   : > { %v1140_v3 = vmul.f32 %v1138_v57, %v872_v26  ;;  %v1234_v60 = vsel %vm913_vm6, %v1198_v16, %v1204_v52  ;;  %v1233_v13 = vsel %vm913_vm6, %v1197_v14, %v1203_v45  ;;  %v1139_v47 = vmul.f32 %v1137_v32, %v868_v24  ;;  %v858_v18 = vpop.permute.xlu0 %857  ;;  %v1335_v14 = vld [vmem:[#allocation5] sm:$0x3]  ;;  %v1345_v45 = vld [vmem:[#allocation4 + $0x2] sm:$0x3] }
 0x29a   : > { %v1236_v6 = vsel %vm916_vm14, %v1234_v60, %v1210_v31  ;;  %v1235_v9 = vsel %vm916_vm14, %v1233_v13, %v1209_v2 }
 0x29b   : > { %v1128_v56 = vpop.permute.xlu1 %1127  ;;  %v2543_v10 = vpack.c.bf16 %v1236_v6, %v1232_v4  ;;  %v2545_v11 = vpack.c.bf16 %v1235_v9, %v1231_v7  ;;  %v1240_v25 = vrot.slane %v1140_v3, 6  ;;  %v1239_v21 = vrot.slane %v1139_v47, 6 }
 0x29c   : > { %v1129_v63 = vsel %vm861_vm0, %v1126_v20, %v1128_v56  ;;  %v1130_v22 = vsel %vm861_vm0, %v1128_v56, %v1126_v20 }
 0x29d   : > { %v1131_v15 = vmul.f32 %v1129_v63, %v868_v24  ;;  %v1132_v17 = vmul.f32 %v1130_v22, %v872_v26  ;;  %2544 = vmatprep.subr.bf16.mxu1 %v2543_v10 }
 0x29e   : > { %2546 = vmatpush1.bf16.msra.mxu1 %v2545_v11 }
 0x29f   : > { %v860_v5 = vpop.permute.xlu1 %859  ;;  %v1244_v12 = vsel %vm913_vm6, %v1132_v17, %v1240_v25  ;;  %v1243_v42 = vsel %vm913_vm6, %v1131_v15, %v1239_v21 }
 0x2a0   : > { %v862_v19 = vsel %vm861_vm0, %v858_v18, %v860_v5  ;;  %v863_v35 = vsel %vm861_vm0, %v860_v5, %v858_v18  ;;  %2491 = vmatprep.subr.msk.mxu1 %vm919_vm15, %v1244_v12 }
 0x2a1   : > { %v875_v23 = vmul.f32 %v868_v24, %v862_v19  ;;  %v876_v38 = vmul.f32 %v872_v26, %v863_v35 }
 0x2a2   : > { %2492 = vmatpush1.msk.msra.mxu1 %vm919_vm15, %v1243_v42 }
 0x2a3   : > { %2488 = vmatprep.subr.msk.mxu0 %vm913_vm6, %v876_v38  ;;  %2493 = vmatmul.mubr.msk.f32.vlgmr.msra.gmra.mrb[0].mxu1 %vm1245_vm1, %v1009_v36 }
 0x2a4   : > { %2489 = vmatpush1.msk.msra.mxu0 %vm913_vm6, %v875_v23 }
 0x2a5   : > { %2490 = vmatmul.mubr.msk.f32.vlgmr.msra.gmra.mrb[0].mxu0 %vm928_vm2, %v692_v27 }
 0x376   : > { %v1321_v62 = vpop.f32.mrb[0].mxu1 }
 0x377   : > { %v1346_v28 = vsel %vm913_vm6, %v1321_v62, 0.0  ;;  %v1354_v48 = vmul.f32 %v1321_v62, %v1321_v62  ;;  %v1323_v8 = vpop.f32.mrb[1].mxu1 }
 0x378   : > { %v1004_v34 = vpop.f32.mrb[0].mxu0  ;;  %v1347_v49 = vsel %vm913_vm6, %v1323_v8, 0.0  ;;  %v1355_v50 = vmul.f32 %v1323_v8, %v1323_v8 }
 0x379   : > { %v1327_v41 = vsel %vm913_vm6, %v1004_v34, 0.0  ;;  %v1336_v37 = vmul.f32 %v1004_v34, %v1004_v34  ;;  %v1006_v33 = vpop.f32.mrb[1].mxu0  ;;  %v1348_v39 = vadd.f32 %v1347_v49, %v1346_v28  ;;  %v1356_v43 = vsel %vm913_vm6, %v1354_v48, 0.0 }
 0x37a   : > { %v1328_v44 = vsel %vm913_vm6, %v1006_v33, 0.0  ;;  %v1337_v26 = vmul.f32 %v1006_v33, %v1006_v33  ;;  %v1357_v30 = vsel %vm913_vm6, %v1355_v50, 0.0 }
 0x37b   : > { %v1329_v51 = vadd.f32 %v1328_v44, %v1327_v41  ;;  %v1338_v53 = vsel %vm913_vm6, %v1336_v37, 0.0  ;;  %v1358_v29 = vadd.f32 %v1357_v30, %v1356_v43 }
 0x37c   : > { %v1339_v58 = vsel %vm913_vm6, %v1337_v26, 0.0 }
 0x37d   : > { %1330 = vadd.xlane.f32.xlu0 %v1329_v51  ;;  %v1340_v40 = vadd.f32 %v1339_v58, %v1338_v53 }
 0x37f   : > { %1341 = vadd.xlane.f32.xlu1 %v1340_v40 }
 0x381   : > { %1349 = vadd.xlane.f32.xlu0 %v1348_v39 }
 0x385   : > { %1359 = vadd.xlane.f32.xlu0 %v1358_v29 }
 0x40a   : > { %v1331_v54 = vpop.xlane.xlu0 %1330 }
 0x40b   : > { %v1332_v16 = vadd.f32 %v1331_v54, %v1326_v46 }
 0x40c   : > { %v1342_v24 = vpop.xlane.xlu1 %1341 }
 0x40d   : > { %1334 = vst.msk [vmem:[#allocation4] sm:$0x3] %vm1333_vm3, %v1332_v16  ;;  %v1343_v52 = vadd.f32 %v1342_v24, %v1335_v14 }
 0x40e   : > { %v1350_v55 = vpop.xlane.xlu0 %1349 }
 0x40f   : > { %1344 = vst.msk [vmem:[#allocation5] sm:$0x3] %vm1333_vm3, %v1343_v52  ;;  %v1351_v59 = vadd.f32 %v1350_v55, %v1345_v45 }
 0x411   : > { %1352 = vst.msk [vmem:[#allocation4 + $0x2] sm:$0x3] %vm1333_vm3, %v1351_v59 }
 0x412   : > { %v1360_v2 = vpop.xlane.xlu0 %1359 }
 0x413   : > { %v1361_v31 = vadd.f32 %v1360_v2, %v1353_v61 }
 0x415   : > { %1362 = vst.msk [vmem:[#allocation5 + $0x2] sm:$0x3] %vm1333_vm3, %v1361_v31 }
 0x416 PF: > { %p2494_p5 = scmp.ne.s32.totalorder %s2768_s29, 2 }
 0x417   : > { %v1367_v32 = vld [vmem:[%s3982_s3] sm:$0xf] (!%p2494_p5)  ;;  %v3441_v57 = vcombine.high (!%p2494_p5), %v2959_v0, %v2959_v0  ;;  %v2797_v20 = vmov (!%p2494_p5), 1   ;;  %v2798_v3 = vmov (!%p2494_p5), 0   ;;  %v1422_v13 = vld [vmem:[#allocation3] sm:$0x3] (!%p2494_p5)  ;;  %v1374_v62 = vlaneseq (!%p2494_p5) }
 0x418   : > { %1366 = sbr.rel (%p2494_p5) target bundleno = 2356 (0x934), region = 88  ;;  %2671 = vset.pattern.permute.xlu0 (!%p2494_p5), %v2797_v20  ;;  %2673 = vset.pattern.permute.xlu1 (!%p2494_p5), %v2798_v3  ;;  %v1420_v60 = vld [vmem:[#allocation2] sm:$0x3] (!%p2494_p5)  ;;  %s2799_s17 = smov (!%p2494_p5), 16   ;;  %v1423_v6 = vmul.f32 (!%p2494_p5), 0.001953125, %v1422_v13  ;;  %vm1707_vm4 = vcmask (!%p2494_p5), 1041408  }
 0x419   : > { %1395 = vperm.xlu0 (!%p2494_p5), %2671, %v1367_v32   ;;  %1521 = vrot.lane.b32.xlu1 (!%p2494_p5), %v3441_v57, %s2799_s17  ;;  %v1421_v4 = vmul.f32 (!%p2494_p5), 0.001953125, %v1420_v60  ;;  %v1433_v7 = vld [vmem:[#allocation2 + $0x2] sm:$0xf] (!%p2494_p5)  ;;  %v1435_v9 = vld [vmem:[#allocation3 + $0x2] sm:$0xf] (!%p2494_p5)  ;;  %s4011_s29 = smov (!%p2494_p5), 127  }
 0x41a   : > { %v1434_v47 = vmul.f32 (!%p2494_p5), 0.001953125, %v1433_v7  ;;  %v1436_v56 = vmul.f32 (!%p2494_p5), 0.001953125, %v1435_v9  ;;  %v1426_v17 = vld [vmem:[%s3984_s5] sm:$0x3] (!%p2494_p5)  ;;  %v1439_v18 = vld [vmem:[%s3984_s5 + $0x2] sm:$0xf] (!%p2494_p5) }
 0x41b   : > { %v1424_v10 = vmul.f32 (!%p2494_p5), %v1421_v4, %v1421_v4  ;;  %v1443_v35 = vld [vmem:[%s3985_s6 + $0x2] sm:$0xf] (!%p2494_p5)  ;;  %v1430_v38 = vld [vmem:[%s3985_s6] sm:$0x3] (!%p2494_p5)  ;;  %s4017_s19 = smov (!%p2494_p5), 15   ;;  %s4015_s20 = smov (!%p2494_p5), 113  }
 0x41c   : > { %v1437_v11 = vmul.f32 (!%p2494_p5), %v1434_v47, %v1434_v47  ;;  %s2803_s21 = smov (!%p2494_p5), 17   ;;  %s2804_s18 = smov (!%p2494_p5), 1   ;;  %v1375_v28 = vshrl.u32 (!%p2494_p5), %v1374_v62, 7  ;;  %v2806_v43 = vmov (!%p2494_p5), 839922192   ;;  %vm1710_vm12 = vcmask (!%p2494_p5), 1043456  }
 0x41d   : > { %2672 = vset.pattern.permute.xlu0 (!%p2494_p5), %v2798_v3  ;;  %v1425_v63 = vsub.f32 (!%p2494_p5), %v1423_v6, %v1424_v10  ;;  %s4013_s16 = smov (!%p2494_p5), 112   ;;  %v1451_v44 = vunpack.c.l.s4 (!%p2494_p5), %v2806_v43  ;;  %s4038_s1 = sld [smem:[#allocation14_spill]] (!%p2494_p5)  ;;  %vm1713_vm13 = vcmask (!%p2494_p5), 1045504   ;;  %vm2039_vm15 = vcmask (!%p2494_p5), 441344  }
 0x41e   : > { %1370 = vperm.xlu0 (!%p2494_p5), %2672, %v1367_v32   ;;  %v1438_v22 = vsub.f32 (!%p2494_p5), %v1436_v56, %v1437_v11  ;;  %v1400_v48 = vsub.s32 (!%p2494_p5), 3, %v1375_v28  ;;  %v1404_v8 = vsub.s32 (!%p2494_p5), 7, %v1375_v28  ;;  %v1376_v34 = vsub.s32 (!%p2494_p5), 2, %v1375_v28  ;;  %s4043_s2 = sld [smem:[#allocation15_spill]] (!%p2494_p5) }
 0x41f   : > { %v1427_v25 = vadd.f32 1e-05, %v1425_v63  ;;  %v1380_v49 = vsub.s32 6, %v1375_v28  ;;  %v1452_v40 = vunpack.c.0.s8 %v1451_v44  ;;  %v3515_v11 = vand.u32 127, %v1374_v62 }
 0x420   : > { %v1440_v15 = vadd.f32 1e-05, %v1438_v22  ;;  %v1401_v41 = vrot.slane %v2961_v1, %v1400_v48  ;;  %v1405_v37 = vrot.slane %v2961_v1, %v1404_v8  ;;  %v1377_v33 = vrot.slane %v2961_v1, %v1376_v34 }
 0x421   : > { %2674 = vrsqrt.f32 %v1427_v25  ;;  %v1381_v39 = vrot.slane %v2961_v1, %v1380_v49  ;;  %v1455_v52 = vsub.s32 %v1452_v40, %v1375_v28  ;;  %v3517_v63 = vsub.s32 0, %v1375_v28 }
 0x422   : > { %1519 = vrot.lane.b32.xlu0 %v2959_v0, %s2799_s17  ;;  %2676 = vrsqrt.f32 %v1440_v15  ;;  %v1411_v26 = vrot.slane %v1401_v41, %v1400_v48  ;;  %v1415_v30 = vrot.slane %v1405_v37, %v1400_v48  ;;  %v1387_v51 = vrot.slane %v1377_v33, %v1376_v34 }
 0x423   : > { %v1391_v53 = vrot.slane %v1381_v39, %v1376_v34  ;;  %v1487_v7 = vld [vmem:[%s4038_s1] ss:$8 sm:$0x3]  ;;  %v3522_v22 = vld [vmem:[%s4038_s1 + $0x5] ss:$8 sm:$0x3] }
 0x424   : > { %vm1590_vm5 = vcmp.lt.s32.totalorder %v3515_v11, 127  ;;  %vm1523_vm6 = vcmp.lt.s32.totalorder %v3515_v11, 16  ;;  %vm1546_vm7 = vcmp.lt.s32.totalorder %v3515_v11, 15  ;;  %vm1613_vm8 = vcmp.lt.s32.totalorder %v3515_v11, 113 }
 0x425   : > { %vm1500_vm9 = vcmp.lt.s32.totalorder %v3515_v11, 17  ;;  %vm1569_vm10 = vcmp.lt.s32.totalorder %v3515_v11, 1  ;;  %vm1634_vm11 = vcmp.lt.s32.totalorder %v3515_v11, 112  ;;  %vm1655_vm14 = vcmp.lt.s32.totalorder %v3515_v11, 111 }
 0x426   : > { %vm1722_vm0 = vcmask 146432   ;;  %vm2809_vm1 = vmmov 0   ;;  %vm2193_vm2 = vcmask 31744   ;;  %vm2273_vm3 = vcmask 15360  }
 0x42b   : > { %v2675_v21 = vpop.eup %2674 }
 0x42c   : > { %v2677_v5 = vpop.eup %2676  ;;  %v1429_v12 = vmul.f32 %v2675_v21, %v1426_v17  ;;  %v3539_v21 = vld [vmem:[%s4038_s1 + $0x2] ss:$8 sm:$0x3] }
 0x42d   : > { %v1442_v19 = vmul.f32 %v2677_v5, %v1439_v18  ;;  %v2498_v18 = vld [vmem:[%s4038_s1 + $0x1] ss:$8 sm:$0x3] }
 0x42e   : > { %1448 = vperm.xlu1 %2673, %v1429_v12   ;;  %v1431_v36 = vmul.f32 %v1429_v12, %v1421_v4  ;;  %v3545_v12 = vsub.s32 1, %v1375_v28 }
 0x42f   : > { %v1444_v23 = vmul.f32 %v1442_v19, %v1434_v47  ;;  %v2496_v47 = vld [vmem:[%s4038_s1 + $0x4] ss:$8 sm:$0x3] }
 0x430   : > { %v1432_v27 = vsub.f32 %v1430_v38, %v1431_v36  ;;  %v2495_v36 = vld [vmem:[%s4038_s1 + $0x3] ss:$8 sm:$0x3] }
 0x431   : > { %v1445_v42 = vsub.f32 %v1443_v35, %v1444_v23  ;;  %v1585_v35 = vmul.f32 %v2498_v18, %v3522_v22  ;;  %v1490_v28 = vmul.f32 %v2495_v36, %v1487_v7  ;;  %v1564_v49 = vmul.f32 %v2498_v18, %v2495_v36 }
 0x432   : > { %1474 = vperm.xlu1 %2673, %v1442_v19   ;;  %v1518_v19 = vmul.f32 %v2496_v47, %v1487_v7 }
 0x433   : > { %1481 = vperm.xlu0 %2672, %v1445_v42   ;;  %v1541_v42 = vmul.f32 %v3522_v22, %v1487_v7  ;;  %v3570_v34 = vrot.slane %v1585_v35, %v3517_v63 }
 0x434   : > { %v3564_v48 = vrot.slane %v1518_v19, %v3517_v63  ;;  %v3567_v8 = vrot.slane %v1518_v19, %v3545_v12 }
 0x435   : > { %v3579_v37 = vrot.slane %v1541_v42, %v3517_v63  ;;  %v3584_v43 = vrot.slane %v1541_v42, %v3545_v12 }
 0x436   : > { %1461 = vperm.xlu1 %2673, %v1432_v27   ;;  %v1608_v27 = vmul.f32 %v3539_v21, %v2495_v36 }
 0x437   : > { %1586 = vrot.lane.b32.xlu0 %v2959_v0, %s4011_s29 }
 0x438   : > { %v3588_v44 = vrot.slane %v1608_v27, %v3517_v63 }
 0x43a   : > { %1588 = vrot.lane.b32.xlu1 %v3441_v57, %s4011_s29  ;;  %s4039_s29 = smov 15  }
 0x43b   : > { %1542 = vrot.lane.b32.xlu0 %v2959_v0, %s4017_s19 }
 0x43e   : > { %1544 = vrot.lane.b32.xlu1 %v3441_v57, %s4017_s19 }
 0x43f   : > { %1609 = vrot.lane.b32.xlu0 %v2959_v0, %s4015_s20 }
 0x442   : > { %1611 = vrot.lane.b32.xlu1 %v3441_v57, %s4015_s20  ;;  %s4042_s20 = smov 127  }
 0x443   : > { %1494 = vrot.lane.b32.xlu0 %v2959_v0, %s2803_s21 }
 0x446   : > { %1496 = vrot.lane.b32.xlu1 %v3441_v57, %s2803_s21 }
 0x447   : > { %1565 = vrot.lane.b32.xlu0 %v2959_v0, %s2804_s18 }
 0x44a   : > { %1567 = vrot.lane.b32.xlu1 %v3441_v57, %s2804_s18 }
 0x44b   : > { %1630 = vrot.lane.b32.xlu0 %v2959_v0, %s4013_s16 }
 0x44e   : > { %1632 = vrot.lane.b32.xlu1 %v3441_v57, %s4013_s16  ;;  %s4040_s16 = smov 113  }
 0x48b   : > { %v3487_v58 = vpop.permute.xlu1 %1521 }
 0x498   : > { %v1396_v50 = vpop.permute.xlu0 %1395 }
 0x499   : > { %v1416_v46 = vmul.f32 %v1411_v26, %v1396_v50  ;;  %v1417_v54 = vmul.f32 %v1415_v30, %v1396_v50  ;;  %v3573_v50 = vrot.slane %v1585_v35, %v3545_v12  ;;  %v3595_v30 = vrot.slane %v1608_v27, %v3545_v12 }
 0x49d   : > { %v1371_v29 = vpop.permute.xlu0 %1370 }
 0x49e   : > { %v1392_v14 = vmul.f32 %v1387_v51, %v1371_v29  ;;  %v1393_v16 = vmul.f32 %v1391_v53, %v1371_v29  ;;  %v3599_v51 = vrot.slane %v1490_v28, %v3517_v63  ;;  %v1629_v53 = vmul.f32 %v3539_v21, %v2496_v47 }
 0x4a0   : > { %v3491_v55 = vadd.f32 %v1416_v46, %v1392_v14  ;;  %v3493_v1 = vadd.f32 %v1417_v54, %v1393_v16  ;;  %v3608_v46 = vrot.slane %v1490_v28, %v3545_v12  ;;  %v3611_v54 = vrot.slane %v1564_v49, %v3517_v63 }
 0x4a1   : > { %v3489_v45 = vpop.permute.xlu0 %1519 }
 0x4a2   : > { %v1524_v29 = vsel %vm1523_vm6, %v3489_v45, %v3487_v58  ;;  %v1525_v14 = vsel %vm1523_vm6, %v3487_v58, %v3489_v45 }
 0x4a3   : > { %v1538_v45 = vmul.f32 %v3567_v8, %v1524_v29 }
 0x4ad   : > { %v1449_v24 = vpop.permute.xlu1 %1448 }
 0x4ae   : > { %v1456_v61 = vrot.slane %v1449_v24, %v1455_v52 }
 0x4b0   : > { %v1458_v60 = vmul.f32 %v1456_v61, %v2959_v0 }
 0x4b1   : > { %v1475_v59 = vpop.permute.xlu1 %1474 }
 0x4b2   : > { %v1477_v2 = vmul.f32 %v1475_v59, %v3491_v55  ;;  %v1478_v31 = vmul.f32 %v1475_v59, %v3493_v1  ;;  %v1482_v32 = vpop.permute.xlu0 %1481 }
 0x4b4   : > { %v3497_v20 = vadd.f32 %v1482_v32, %v1477_v2  ;;  %v3500_v13 = vadd.f32 %v1482_v32, %v1478_v31 }
 0x4b5   : > { %v1462_v3 = vpop.permute.xlu1 %1461 }
 0x4b6   : > { %v1469_v4 = vrot.slane %v1462_v3, %v1455_v52  ;;  %1847 = vrot.lane.b32.xlu0 %v3497_v20, %s4017_s19  ;;  %1815 = vrot.lane.b32.xlu1 %v3497_v20, %s2803_s21  ;;  %v1587_v6 = vpop.permute.xlu0 %1586  ;;  %v1973_v10 = vrot.slane %v3497_v20, 6  ;;  %v1974_v17 = vrot.slane %v3500_v13, 6  ;;  %s4041_s19 = smov 112   ;;  %v3637_v3 = vrot.slane %v1564_v49, %v3545_v12 }
 0x4b8   : > { %v3509_v9 = vadd.f32 %v1469_v4, %v1458_v60  ;;  %v3640_v60 = vrot.slane %v1629_v53, %v3517_v63  ;;  %v1537_v4 = vmul.f32 %v3564_v48, %v1525_v14 }
 0x4b9   : > { %v1589_v56 = vpop.permute.xlu1 %1588 }
 0x4ba   : > { %1831 = vrot.lane.b32.xlu0 %v3497_v20, %s2799_s17  ;;  %1817 = vrot.lane.b32.xlu1 %v3500_v13, %s2803_s21  ;;  %v1543_v25 = vpop.permute.xlu0 %1542  ;;  %v3530_v15 = vcombine.high %v3509_v9, %v3509_v9  ;;  %v3543_v5 = vsel %vm1707_vm4, %v3509_v9, %v1973_v10  ;;  %v1591_v41 = vsel %vm1590_vm5, %v1587_v6, %v1589_v56  ;;  %v1673_v49 = vrot.slane %v1537_v4, 6 }
 0x4bb   : > { %v1592_v39 = vsel %vm1590_vm5, %v1589_v56, %v1587_v6  ;;  %v1604_v40 = vmul.f32 %v3570_v34, %v1591_v41 }
 0x4bc   : > { %v3553_v23 = vsel %vm1707_vm4, %v3530_v15, %v1974_v17  ;;  %v1605_v16 = vmul.f32 %v3573_v50, %v1592_v39 }
 0x4bd   : > { %v1545_v38 = vpop.permute.xlu1 %1544  ;;  %v1691_v6 = vrot.slane %v1604_v40, 6 }
 0x4be   : > { %1863 = vrot.lane.b32.xlu0 %v3497_v20, %s2804_s18  ;;  %1849 = vrot.lane.b32.xlu1 %v3500_v13, %s4039_s29  ;;  %v1610_v62 = vpop.permute.xlu0 %1609  ;;  %v1547_v61 = vsel %vm1546_vm7, %v1543_v25, %v1545_v38  ;;  %v1548_v2 = vsel %vm1546_vm7, %v1545_v38, %v1543_v25  ;;  %v1692_v56 = vrot.slane %v1605_v16, 6  ;;  %v1674_v38 = vrot.slane %v1538_v45, 6 }
 0x4bf   : > { %v1560_v10 = vmul.f32 %v3579_v37, %v1548_v2  ;;  %v1561_v25 = vmul.f32 %v3584_v43, %v1547_v61  ;;  %v1716_v39 = vsel %vm1707_vm4, %v2959_v0, %v1691_v6 }
 0x4c0   : > { %v1717_v14 = vsel %vm1707_vm4, %v3441_v57, %v1692_v56 }
 0x4c1   : > { %v1612_v33 = vpop.permute.xlu1 %1611  ;;  %v1680_v16 = vrot.slane %v1561_v25, 4 }
 0x4c2   : > { %1895 = vrot.lane.b32.xlu0 %v3497_v20, %s4040_s16  ;;  %1833 = vrot.lane.b32.xlu1 %v3500_v13, %s2799_s17  ;;  %v1495_v26 = vpop.permute.xlu0 %1494  ;;  %v1614_v24 = vsel %vm1613_vm8, %v1610_v62, %v1612_v33  ;;  %v1615_v52 = vsel %vm1613_vm8, %v1612_v33, %v1610_v62  ;;  %v3661_v62 = vrot.slane %v1629_v53, %v3545_v12 }
 0x4c3   : > { %v1627_v7 = vmul.f32 %v3588_v44, %v1614_v24  ;;  %v1628_v47 = vmul.f32 %v3595_v30, %v1615_v52 }
 0x4c5   : > { %v1497_v59 = vpop.permute.xlu1 %1496  ;;  %v1697_v41 = vrot.slane %v1627_v7, 4  ;;  %v1698_v33 = vrot.slane %v1628_v47, 4 }
 0x4c6   : > { %v1501_v31 = vsel %vm1500_vm9, %v1495_v26, %v1497_v59  ;;  %1911 = vrot.lane.b32.xlu0 %v3497_v20, %s4041_s19  ;;  %1865 = vrot.lane.b32.xlu1 %v3500_v13, %s2804_s18  ;;  %v1566_v58 = vpop.permute.xlu0 %1565  ;;  %v1502_v32 = vsel %vm1500_vm9, %v1497_v59, %v1495_v26  ;;  %v1679_v26 = vrot.slane %v1560_v10, 4  ;;  %v2133_v59 = vld [vmem:[#allocation4 + $0x2] sm:$0x3]  ;;  %v2135_v10 = vld [vmem:[#allocation5 + $0x2] sm:$0x3] }
 0x4c7   : > { %v1515_v17 = vmul.f32 %v3608_v46, %v1501_v31  ;;  %v1514_v19 = vmul.f32 %v3599_v51, %v1502_v32  ;;  %v1719_v45 = vsel %vm1710_vm12, %v1717_v14, %v1698_v33  ;;  %v1718_v32 = vsel %vm1710_vm12, %v1716_v39, %v1697_v41  ;;  %v2122_v41 = vld [vmem:[#allocation5] sm:$0x3] }
 0x4c8   : > { %v2134_v7 = vmul.f32 0.001953125, %v2133_v59  ;;  %v2123_v39 = vmul.f32 0.001953125, %v2122_v41  ;;  %v2143_v59 = vld [vmem:[%s3987_s8 + $0x2] sm:$0x3] }
 0x4c9   : > { %v1568_v18 = vpop.permute.xlu1 %1567  ;;  %v1709_v40 = vsel %vm1707_vm4, %v1515_v17, %v1674_v38  ;;  %v1708_v52 = vsel %vm1707_vm4, %v1514_v19, %v1673_v49  ;;  %v2136_v38 = vmul.f32 0.001953125, %v2135_v10 }
 0x4ca   : > { %v1570_v35 = vsel %vm1569_vm10, %v1566_v58, %v1568_v18  ;;  %v1571_v36 = vsel %vm1569_vm10, %v1568_v18, %v1566_v58  ;;  %1879 = vrot.lane.b32.xlu0 %v3497_v20, %s4042_s20  ;;  %1897 = vrot.lane.b32.xlu1 %v3500_v13, %s4040_s16  ;;  %v1631_v28 = vpop.permute.xlu0 %1630  ;;  %v1712_v47 = vsel %vm1710_vm12, %v1709_v40, %v1680_v16  ;;  %v2139_v16 = vld [vmem:[%s3986_s7 + $0x2] sm:$0x3] }
 0x4cb   : > { %v1583_v42 = vmul.f32 %v3611_v54, %v1571_v36  ;;  %v1584_v27 = vmul.f32 %v3637_v3, %v1570_v35  ;;  %v1711_v56 = vsel %vm1710_vm12, %v1708_v52, %v1679_v26 }
 0x4cd   : > { %v1633_v29 = vpop.permute.xlu1 %1632  ;;  %v1685_v61 = vrot.slane %v1583_v42, 2  ;;  %v1686_v2 = vrot.slane %v1584_v27, 2  ;;  %v2137_v42 = vmul.f32 %v2134_v7, %v2134_v7  ;;  %v2120_v27 = vld [vmem:[#allocation4] sm:$0x3] }
 0x4ce   : > { %v1635_v53 = vsel %vm1634_vm11, %v1631_v28, %v1633_v29  ;;  %v1636_v24 = vsel %vm1634_vm11, %v1633_v29, %v1631_v28  ;;  %1839 = vrot.lane.b32.xlu0 %v3509_v9, %s4039_s29  ;;  %1913 = vrot.lane.b32.xlu1 %v3500_v13, %s4041_s19  ;;  %v2121_v49 = vmul.f32 0.001953125, %v2120_v27 }
 0x4cf   : > { %v1648_v31 = vmul.f32 %v3640_v60, %v1635_v53  ;;  %v1649_v58 = vmul.f32 %v3661_v62, %v1636_v24  ;;  %v1715_v25 = vsel %vm1713_vm13, %v1712_v47, %v1686_v2  ;;  %v1714_v18 = vsel %vm1713_vm13, %v1711_v56, %v1685_v61 }
 0x4d0   : > { %v2138_v28 = vsub.f32 %v2136_v38, %v2137_v42  ;;  %v2124_v26 = vmul.f32 %v2121_v49, %v2121_v49  ;;  %v2808_v24 = vmov 0.0  }
 0x4d1   : > { %v1703_v4 = vrot.slane %v1648_v31, 2  ;;  %v1704_v6 = vrot.slane %v1649_v58, 2  ;;  %2113 = vmatprep.mubr.f32.mxu1 %v2808_v24  ;;  %1796 = vmatprep.mubr.f32.mxu0 %v2808_v24 }
 0x4d2   : > { %1823 = vrot.lane.b32.xlu0 %v3509_v9, %s2799_s17  ;;  %1881 = vrot.lane.b32.xlu1 %v3500_v13, %s4042_s20  ;;  %v2140_v33 = vadd.f32 1e-05, %v2138_v28  ;;  %v2125_v29 = vsub.f32 %v2123_v39, %v2124_v26 }
 0x4d3   : > { %v1721_v17 = vsel %vm1713_vm13, %v1719_v45, %v1704_v6  ;;  %v1720_v19 = vsel %vm1713_vm13, %v1718_v32, %v1703_v4 }
 0x4d4   : > { %v2547_v35 = vpack.c.bf16 %v1721_v17, %v1715_v25  ;;  %v2549_v36 = vpack.c.bf16 %v1720_v19, %v1714_v18  ;;  %2678 = vrsqrt.f32 %v2140_v33  ;;  %v2127_v40 = vadd.f32 1e-05, %v2125_v29 }
 0x4d6   : > { %1807 = vrot.lane.b32.xlu0 %v3509_v9, %s2803_s21  ;;  %1841 = vrot.lane.b32.xlu1 %v3530_v15, %s4039_s29  ;;  %2680 = vrsqrt.f32 %v2127_v40 }
 0x4d7   : > { %2548 = vmatprep.subr.bf16.mxu0 %v2547_v35 }
 0x4d8   : > { %2550 = vmatpush1.bf16.msra.mxu0 %v2549_v36 }
 0x4da   : > { %1855 = vrot.lane.b32.xlu0 %v3509_v9, %s2804_s18  ;;  %1825 = vrot.lane.b32.xlu1 %v3530_v15, %s2799_s17  ;;  %s2807_s17 = smov 111  }
 0x4de   : > { %1871 = vrot.lane.b32.xlu0 %v3509_v9, %s4042_s20  ;;  %1809 = vrot.lane.b32.xlu1 %v3530_v15, %s2803_s21  ;;  %v2679_v14 = vpop.eup %2678 }
 0x4df   : > { %v2142_v53 = vmul.f32 %v2679_v14, %v2139_v16 }
 0x4e0   : > { %v2681_v52 = vpop.eup %2680 }
 0x4e2   : > { %1887 = vrot.lane.b32.xlu0 %v3509_v9, %s4040_s16  ;;  %1857 = vrot.lane.b32.xlu1 %v3530_v15, %s2804_s18 }
 0x4e6   : > { %1903 = vrot.lane.b32.xlu0 %v3509_v9, %s4041_s19  ;;  %1873 = vrot.lane.b32.xlu1 %v3530_v15, %s4042_s20 }
 0x4ea   : > { %1927 = vrot.lane.b32.xlu0 %v3497_v20, %s2807_s17  ;;  %1889 = vrot.lane.b32.xlu1 %v3530_v15, %s4040_s16  ;;  %v2144_v20 = vmul.f32 %v2142_v53, %v2134_v7 }
 0x4ec   : > { %v2145_v61 = vsub.f32 %v2143_v59, %v2144_v20 }
 0x4ee   : > { %1919 = vrot.lane.b32.xlu0 %v3509_v9, %s2807_s17  ;;  %1905 = vrot.lane.b32.xlu1 %v3530_v15, %s4041_s19  ;;  %v2126_v9 = vld [vmem:[%s3986_s7] sm:$0x3] }
 0x4ef   : > { %v2129_v2 = vmul.f32 %v2681_v52, %v2126_v9 }
 0x4f2   : > { %1651 = vrot.lane.b32.xlu0 %v2959_v0, %s2807_s17  ;;  %1929 = vrot.lane.b32.xlu1 %v3500_v13, %s2807_s17  ;;  %v2131_v0 = vmul.f32 %v2129_v2, %v2121_v49  ;;  %v2130_v13 = vld [vmem:[%s3987_s8] sm:$0x3] }
 0x4f4   : > { %v2132_v31 = vsub.f32 %v2130_v13, %v2131_v0 }
 0x4f6   : > { %2162 = vperm.xlu0 %2672, %v2142_v53   ;;  %1921 = vrot.lane.b32.xlu1 %v3530_v15, %s2807_s17 }
 0x4fa   : > { %2169 = vperm.xlu0 %2672, %v2145_v61   ;;  %1653 = vrot.lane.b32.xlu1 %v3441_v57, %s2807_s17 }
 0x4fe   : > { %2148 = vperm.xlu1 %2673, %v2129_v2  }
 0x502   : > { %2155 = vperm.xlu1 %2673, %v2132_v31  }
 0x528   : > { %v1816_v58 = vpop.permute.xlu1 %1815  ;;  %v1848_v45 = vpop.permute.xlu0 %1847 }
 0x52c   : > { %v1818_v32 = vpop.permute.xlu1 %1817  ;;  %v1832_v4 = vpop.permute.xlu0 %1831 }
 0x52d   : > { %v1819_v42 = vsel %vm1500_vm9, %v1816_v58, %v1818_v32  ;;  %v1820_v27 = vsel %vm1500_vm9, %v1818_v32, %v1816_v58 }
 0x52e   : > { %v1821_v29 = vmul.f32 %v1820_v27, %v3599_v51  ;;  %v1822_v40 = vmul.f32 %v1819_v42, %v3608_v46 }
 0x530   : > { %v1850_v6 = vpop.permute.xlu1 %1849  ;;  %v1864_v7 = vpop.permute.xlu0 %1863  ;;  %v1937_v32 = vrot.slane %v1821_v29, 6 }
 0x531   : > { %v1851_v39 = vsel %vm1546_vm7, %v1848_v45, %v1850_v6  ;;  %v1852_v26 = vsel %vm1546_vm7, %v1850_v6, %v1848_v45 }
 0x532   : > { %v1853_v2 = vmul.f32 %v1852_v26, %v3579_v37  ;;  %v1854_v0 = vmul.f32 %v1851_v39, %v3584_v43 }
 0x534   : > { %v1834_v15 = vpop.permute.xlu1 %1833  ;;  %v3735_v47 = vpop.permute.xlu0 %1895  ;;  %v1956_v42 = vrot.slane %v1854_v0, 2 }
 0x535   : > { %v1835_v14 = vsel %vm1523_vm6, %v1832_v4, %v1834_v15  ;;  %v1836_v16 = vsel %vm1523_vm6, %v1834_v15, %v1832_v4  ;;  %v1938_v4 = vrot.slane %v1822_v40, 6 }
 0x536   : > { %v1837_v13 = vmul.f32 %v1836_v16, %v3564_v48  ;;  %v1838_v31 = vmul.f32 %v1835_v14, %v3567_v8 }
 0x538   : > { %v1866_v56 = vpop.permute.xlu1 %1865  ;;  %v3737_v10 = vpop.permute.xlu0 %1911 }
 0x539   : > { %v1867_v27 = vsel %vm1569_vm10, %v1864_v7, %v1866_v56 }
 0x53c   : > { %v3739_v57 = vpop.permute.xlu1 %1897  ;;  %v3741_v25 = vpop.permute.xlu0 %1879 }
 0x540   : > { %v3743_v17 = vpop.permute.xlu1 %1913  ;;  %v1840_v18 = vpop.permute.xlu0 %1839 }
 0x544   : > { %v3745_v19 = vpop.permute.xlu1 %1881  ;;  %v1824_v35 = vpop.permute.xlu0 %1823 }
 0x548   : > { %v1842_v36 = vpop.permute.xlu1 %1841  ;;  %v1808_v38 = vpop.permute.xlu0 %1807 }
 0x549   : > { %v1843_v28 = vsel %vm1546_vm7, %v1840_v18, %v1842_v36  ;;  %v1844_v49 = vsel %vm1546_vm7, %v1842_v36, %v1840_v18  ;;  %v1955_v36 = vrot.slane %v1853_v2, 2 }
 0x54a   : > { %v1845_v41 = vmul.f32 %v1844_v49, %v3579_v37  ;;  %v1846_v33 = vmul.f32 %v1843_v28, %v3584_v43  ;;  %v1868_v28 = vsel %vm1569_vm10, %v1866_v56, %v1864_v7 }
 0x54c   : > { %v1826_v53 = vpop.permute.xlu1 %1825  ;;  %v1856_v20 = vpop.permute.xlu0 %1855  ;;  %v1949_v52 = vrot.slane %v1845_v41, 4  ;;  %v1950_v59 = vrot.slane %v1846_v33, 4 }
 0x54d   : > { %v1827_v9 = vsel %vm1523_vm6, %v1824_v35, %v1826_v53  ;;  %v1828_v61 = vsel %vm1523_vm6, %v1826_v53, %v1824_v35 }
 0x54e   : > { %v1829_v58 = vmul.f32 %v1828_v61, %v3564_v48  ;;  %v1830_v45 = vmul.f32 %v1827_v9, %v3567_v8  ;;  %v2012_v43 = vsel %vm1710_vm12, %v1838_v31, %v1950_v59  ;;  %v2011_v35 = vsel %vm1710_vm12, %v1837_v13, %v1949_v52 }
 0x54f   : > { %v2014_v26 = vsel %vm1713_vm13, %v2012_v43, %v1956_v42  ;;  %v1869_v59 = vmul.f32 %v1868_v28, %v3611_v54  ;;  %v1870_v9 = vmul.f32 %v1867_v27, %v3637_v3  ;;  %v1899_v61 = vsel %vm1613_vm8, %v3735_v47, %v3739_v57 }
 0x550   : > { %v1810_v6 = vpop.permute.xlu1 %1809  ;;  %v1872_v15 = vpop.permute.xlu0 %1871  ;;  %v1943_v49 = vrot.slane %v1829_v58, 2  ;;  %v1944_v41 = vrot.slane %v1830_v45, 2 }
 0x551   : > { %v1811_v18 = vsel %vm1500_vm9, %v1808_v38, %v1810_v6  ;;  %v1812_v37 = vsel %vm1500_vm9, %v1810_v6, %v1808_v38  ;;  %v1968_v6 = vrot.slane %v1870_v9, 4 }
 0x552   : > { %v1813_v48 = vmul.f32 %v1812_v37, %v3599_v51  ;;  %v1814_v8 = vmul.f32 %v1811_v18, %v3608_v46  ;;  %v2013_v51 = vsel %vm1713_vm13, %v2011_v35, %v1955_v36  ;;  %v1901_v18 = vmul.f32 %v1899_v61, %v3588_v44 }
 0x554   : > { %v1858_v33 = vpop.permute.xlu1 %1857  ;;  %v1888_v38 = vpop.permute.xlu0 %1887  ;;  %v2008_v39 = vsel %vm1707_vm4, %v1814_v8, %v1938_v4  ;;  %v2007_v29 = vsel %vm1707_vm4, %v1813_v48, %v1937_v32  ;;  %v1967_v4 = vrot.slane %v1869_v59, 4 }
 0x555   : > { %v1859_v46 = vsel %vm1569_vm10, %v1856_v20, %v1858_v33  ;;  %v1860_v40 = vsel %vm1569_vm10, %v1858_v33, %v1856_v20  ;;  %v2010_v7 = vsel %vm1713_vm13, %v2008_v39, %v1944_v41  ;;  %v2009_v56 = vsel %vm1713_vm13, %v2007_v29, %v1943_v49 }
 0x556   : > { %v1861_v14 = vmul.f32 %v1860_v40, %v3611_v54  ;;  %v1862_v16 = vmul.f32 %v1859_v46, %v3637_v3  ;;  %v2551_v53 = vpack.c.bf16 %v2014_v26, %v2010_v7  ;;  %v2553_v52 = vpack.c.bf16 %v2013_v51, %v2009_v56 }
 0x557   : > { %v1900_v20 = vsel %vm1613_vm8, %v3739_v57, %v3735_v47  ;;  %v1650_v3 = vmul.f32 %v3539_v21, %v3522_v22  ;;  %v1915_v22 = vsel %vm1634_vm11, %v3737_v10, %v3743_v17  ;;  %v1916_v21 = vsel %vm1634_vm11, %v3743_v17, %v3737_v10 }
 0x558   : > { %v1961_v2 = vrot.slane %v1861_v14, 6  ;;  %v1962_v0 = vrot.slane %v1862_v16, 6  ;;  %v1874_v13 = vpop.permute.xlu1 %1873  ;;  %2552 = vmatprep.subr.bf16.mxu1 %v2551_v53  ;;  %v1904_v32 = vpop.permute.xlu0 %1903  ;;  %v1902_v37 = vmul.f32 %v1900_v20, %v3595_v30  ;;  %v1883_v49 = vsel %vm1590_vm5, %v3741_v25, %v3745_v19 }
 0x559   : > { %v1875_v31 = vsel %vm1590_vm5, %v1872_v15, %v1874_v13  ;;  %v1876_v54 = vsel %vm1590_vm5, %v1874_v13, %v1872_v15  ;;  %2554 = vmatpush1.bf16.msra.mxu1 %v2553_v52  ;;  %v1884_v41 = vsel %vm1590_vm5, %v3745_v19, %v3741_v25  ;;  %v1918_v29 = vmul.f32 %v1916_v21, %v3661_v62 }
 0x55a   : > { %v1877_v58 = vmul.f32 %v1875_v31, %v3570_v34  ;;  %v1878_v45 = vmul.f32 %v1876_v54, %v3573_v50  ;;  %v2016_v47 = vsel %vm1707_vm4, %v1956_v42, %v1962_v0  ;;  %v2015_v57 = vsel %vm1707_vm4, %v1955_v36, %v1961_v2 }
 0x55b   : > { %v2018_v48 = vsel %vm1710_vm12, %v2016_v47, %v1968_v6  ;;  %v2017_v8 = vsel %vm1710_vm12, %v2015_v57, %v1967_v4  ;;  %v1885_v19 = vmul.f32 %v1883_v49, %v3570_v34  ;;  %v1886_v46 = vmul.f32 %v1884_v41, %v3573_v50 }
 0x55c   : > { %v1979_v15 = vrot.slane %v1877_v58, 2  ;;  %v1980_v43 = vrot.slane %v1878_v45, 2  ;;  %v1890_v35 = vpop.permute.xlu1 %1889  ;;  %v1928_v39 = vpop.permute.xlu0 %1927  ;;  %v1992_v56 = vrot.slane %v1902_v37, 2  ;;  %v1662_v14 = vrot.slane %v1650_v3, %v3517_v63 }
 0x55d   : > { %v1891_v36 = vsel %vm1613_vm8, %v1888_v38, %v1890_v35  ;;  %v1892_v42 = vsel %vm1613_vm8, %v1890_v35, %v1888_v38  ;;  %v2004_v34 = vrot.slane %v1918_v29, 4 }
 0x55e   : > { %v1893_v27 = vmul.f32 %v1891_v36, %v3588_v44  ;;  %v1894_v28 = vmul.f32 %v1892_v42, %v3595_v30  ;;  %v2022_v10 = vsel %vm1713_vm13, %v3553_v23, %v1980_v43  ;;  %v2021_v17 = vsel %vm1713_vm13, %v3543_v5, %v1979_v15  ;;  %v1803_v36 = vld [vmem:[%s3983_s4] sm:$0x3] }
 0x55f   : > { %v2555_v33 = vpack.c.bf16 %v2022_v10, %v2018_v48  ;;  %v2557_v44 = vpack.c.bf16 %v2021_v17, %v2017_v8  ;;  %v1666_v5 = vrot.slane %v1650_v3, %v3545_v12  ;;  %v1917_v23 = vmul.f32 %v1915_v22, %v3640_v60 }
 0x560   : > { %v1985_v38 = vrot.slane %v1893_v27, 4  ;;  %v1986_v30 = vrot.slane %v1894_v28, 4  ;;  %v1906_v26 = vpop.permute.xlu1 %1905  ;;  %v1991_v12 = vrot.slane %v1901_v18, 2  ;;  %v1486_v27 = vld [vmem:[%s4043_s2] sm:$0x3] }
 0x561   : > { %v1907_v51 = vsel %vm1634_vm11, %v1904_v32, %v1906_v26  ;;  %v1908_v25 = vsel %vm1634_vm11, %v1906_v26, %v1904_v32  ;;  %2556 = vmatprep.subr.bf16.mxu1 %v2555_v33  ;;  %v2003_v61 = vrot.slane %v1917_v23, 4 }
 0x562   : > { %v1909_v40 = vmul.f32 %v1907_v51, %v3640_v60  ;;  %v1910_v7 = vmul.f32 %v1908_v25, %v3661_v62  ;;  %2558 = vmatpush1.bf16.msra.mxu1 %v2557_v44  ;;  %v2024_v59 = vsel %vm1710_vm12, %v1886_v46, %v1986_v30  ;;  %v2023_v9 = vsel %vm1710_vm12, %v1885_v19, %v1985_v38  ;;  %v1920_v62 = vpop.permute.xlu0 %1919 }
 0x563   : > { %v2026_v0 = vsel %vm1713_vm13, %v2024_v59, %v1992_v56  ;;  %v2025_v31 = vsel %vm1713_vm13, %v2023_v9, %v1991_v12  ;;  %v2191_v59 = vld [vmem:[%s3988_s9] sm:$0x3] }
 0x564   : > { %v1997_v16 = vrot.slane %v1909_v40, 6  ;;  %v1998_v53 = vrot.slane %v1910_v7, 6  ;;  %v1930_v52 = vpop.permute.xlu1 %1929 }
 0x565   : > { %v1931_v50 = vsel %vm1655_vm14, %v1928_v39, %v1930_v52  ;;  %v1932_v60 = vsel %vm1655_vm14, %v1930_v52, %v1928_v39 }
 0x566   : > { %v1934_v20 = vmul.f32 %v1932_v60, %v1666_v5  ;;  %v2028_v2 = vsel %vm1707_vm4, %v1992_v56, %v1998_v53  ;;  %v2027_v63 = vsel %vm1707_vm4, %v1991_v12, %v1997_v16  ;;  %v1933_v3 = vmul.f32 %v1931_v50, %v1662_v14  ;;  %v1652_v37 = vpop.permute.xlu0 %1651 }
 0x567   : > { %v2030_v13 = vsel %vm1710_vm12, %v2028_v2, %v2004_v34  ;;  %v2029_v54 = vsel %vm1710_vm12, %v2027_v63, %v2003_v61  ;;  %v2192_v61 = vld [vmem:[%s3989_s10] sm:$0x3] }
 0x568   : > { %v1922_v58 = vpop.permute.xlu1 %1921  ;;  %v2559_v45 = vpack.c.bf16 %v2030_v13, %v2026_v0  ;;  %v2561_v32 = vpack.c.bf16 %v2029_v54, %v2025_v31  ;;  %v2034_v4 = vrot.slane %v1934_v20, 6  ;;  %v2033_v22 = vrot.slane %v1933_v3, 6  ;;  %v2271_v20 = vld [vmem:[%s3990_s11] sm:$0xf] }
 0x569   : > { %v1923_v47 = vsel %vm1655_vm14, %v1920_v62, %v1922_v58  ;;  %v1924_v57 = vsel %vm1655_vm14, %v1922_v58, %v1920_v62 }
 0x56a   : > { %v1925_v6 = vmul.f32 %v1923_v47, %v1662_v14  ;;  %v1926_v18 = vmul.f32 %v1924_v57, %v1666_v5  ;;  %2560 = vmatprep.subr.bf16.mxu1 %v2559_v45  ;;  %v2376_v57 = vrot.slane %v3491_v55, 2 }
 0x56b   : > { %2562 = vmatpush1.bf16.msra.mxu1 %v2561_v32 }
 0x56c   : > { %v1654_v21 = vpop.permute.xlu1 %1653  ;;  %v2038_v15 = vsel %vm1707_vm4, %v1926_v18, %v2034_v4  ;;  %v2037_v8 = vsel %vm1707_vm4, %v1925_v6, %v2033_v22  ;;  %v2377_v4 = vrot.slane %v3493_v1, 2 }
 0x56d   : > { %v1656_v43 = vsel %vm1655_vm14, %v1652_v37, %v1654_v21  ;;  %v1657_v35 = vsel %vm1655_vm14, %v1654_v21, %v1652_v37  ;;  %2503 = vmatprep.subr.msk.mxu1 %vm1713_vm13, %v2038_v15 }
 0x56e   : > { %v1669_v42 = vmul.f32 %v1662_v14, %v1656_v43  ;;  %v1670_v48 = vmul.f32 %v1666_v5, %v1657_v35 }
 0x56f   : > { %2504 = vmatpush1.msk.msra.mxu1 %vm1713_vm13, %v2037_v8 }
 0x570   : > { %2500 = vmatprep.subr.msk.mxu0 %vm1707_vm4, %v1670_v48  ;;  %2505 = vmatmul.mubr.msk.f32.vlgmr.msra.gmra.mrb[0].mxu1 %vm2039_vm15, %v1803_v36 }
 0x571   : > { %2501 = vmatpush1.msk.msra.mxu0 %vm1707_vm4, %v1669_v42 }
 0x572   : > { %2502 = vmatmul.mubr.msk.f32.vlgmr.msra.gmra.mrb[0].mxu0 %vm1722_vm0, %v1486_v27  ;;  %2521 = vmatprep.subr.mxu0 %v2808_v24 }
 0x573   : > { %2523 = vmatprep.mubr.msk.f32.mxu0 %vm2809_vm1, %v2808_v24 }
 0x575   : > { %v2163_v11 = vpop.permute.xlu0 %2162 }
 0x579   : > { %v2170_v41 = vpop.permute.xlu0 %2169 }
 0x57d   : > { %v2149_v28 = vpop.permute.xlu1 %2148 }
 0x581   : > { %v2156_v26 = vpop.permute.xlu1 %2155 }
 0x643   : > { %v2115_v10 = vpop.f32.mrb[0].mxu1 }
 0x644   : > { %v2165_v17 = vmul.f32 %v2163_v11, %v2115_v10  ;;  %v2117_v49 = vpop.f32.mrb[1].mxu1 }
 0x645   : > { %v2166_v33 = vmul.f32 %v2163_v11, %v2117_v49  ;;  %v1798_v44 = vpop.f32.mrb[0].mxu0 }
 0x646   : > { %v2172_v38 = vadd.f32 %v2170_v41, %v2165_v17  ;;  %v2151_v30 = vmul.f32 %v2149_v28, %v1798_v44  ;;  %v1800_v39 = vpop.f32.mrb[1].mxu0 }
 0x647   : > { %v2173_v5 = vadd.f32 %v2170_v41, %v2166_v33  ;;  %v2152_v23 = vmul.f32 %v2149_v28, %v1800_v39 }
 0x648   : > { %v2158_v29 = vadd.f32 %v2156_v26, %v2151_v30  ;;  %v2181_v51 = vsel %vm1707_vm4, %v2172_v38, 0.0 }
 0x649   : > { %v2159_v25 = vadd.f32 %v2156_v26, %v2152_v23  ;;  %v2182_v19 = vsel %vm1707_vm4, %v2173_v5, 0.0 }
 0x64a   : > { %v2183_v46 = vadd.f32 %v2182_v19, %v2181_v51  ;;  %v2174_v40 = vsel %vm1707_vm4, %v2158_v29, 0.0 }
 0x64b   : > { %v2175_v7 = vsel %vm1707_vm4, %v2159_v25, 0.0 }
 0x64c   : > { %2184 = vadd.xlane.f32.xlu0 %v2183_v46  ;;  %v2176_v12 = vadd.f32 %v2175_v7, %v2174_v40 }
 0x64e   : > { %2177 = vadd.xlane.f32.xlu1 %v2176_v12 }
 0x6d9   : > { %v2185_v56 = vpop.xlane.xlu0 %2184 }
 0x6da   : > { %v2186_v14 = vmul.f32 0.00390625, %v2185_v56 }
 0x6db   : > { %v2178_v16 = vpop.xlane.xlu1 %2177 }
 0x6dc   : > { %v2188_v53 = vrot.slane %v2186_v14, 6  ;;  %v2180_v52 = vmul.f32 0.00390625, %v2178_v16 }
 0x6de   : > { %v2190_v9 = vsel %vm1707_vm4, %v2180_v52, %v2188_v53 }
 0x6df   : > { %2522 = vmatpush3.msk.msra.mxu0 %vm1710_vm12, %v2190_v9 }
 0x6e0   : > { %2524 = vmatmul.mubr.msk.f32.vlgmr.msra.gmra.mrb[2].mxu0 %vm2193_vm2, %v2191_v59  ;;  %2526 = vmatprep.subr.mxu0 %v2808_v24 }
 0x6e1   : > { %2528 = vmatprep.mubr.msk.f32.mxu0 %vm2809_vm1, %v2808_v24  ;;  %v2272_v24 = vld [vmem:[%s3991_s12] sm:$0xf] }
 0x7b3   : > { %v2266_v34 = vpop.f32.mrb[2].mxu0 }
 0x7b4   : > { %v2267_v50 = vadd.f32 %v2266_v34, %v2192_v61  ;;  %v2525_v60 = vpop.f32.mrb[3].mxu0 }
 0x7b6   : > { %v2270_v62 = vmax.f32 %v2267_v50, 0.0 }
 0x7b8   : > { %2527 = vmatpush3.msk.msra.mxu0 %vm1707_vm4, %v2270_v62 }
 0x7b9   : > { %2529 = vmatmul.mubr.msk.f32.vlgmr.msra.gmra.mrb[4].mxu0 %vm2273_vm3, %v2271_v20 }
 0x88c   : > { %v2346_v2 = vpop.f32.mrb[4].mxu0 }
 0x88d   : > { %v2347_v63 = vadd.f32 %v2346_v2, %v2272_v24  ;;  %v2530_v0 = vpop.f32.mrb[5].mxu0 }
 0x88f   : > { %v2510_v13 = vmul.f32 -1.442695, %v2347_v63 }
 0x891   : > { %2682 = vpow2.f32 %v2510_v13 }
 0x89b   : > { %v2683_v31 = vpop.eup %2682 }
 0x89c   : > { %v2353_v54 = vadd.f32 1.0, %v2683_v31 }
 0x89e   : > { %2684 = vrcp.f32 %v2353_v54 }
 0x8a8   : > { %v2685_v3 = vpop.eup %2684 }
 0x8a9   : > { %2358 = vperm.xlu0 %2672, %v2685_v3  }
 0x928   : > { %v2359_v58 = vpop.permute.xlu0 %2358 }
 0x929   : > { %v2361_v45 = vmul.f32 %v2359_v58, %v2158_v29  ;;  %v2362_v32 = vmul.f32 %v2359_v58, %v2159_v25  ;;  %v2370_v47 = vrot.slane %v2359_v58, 2 }
 0x92b   : > { %v2363_v6 = vadd.f32 %v2361_v45, %v3491_v55  ;;  %v2364_v18 = vadd.f32 %v2362_v32, %v3493_v1  ;;  %v2372_v37 = vmul.f32 %v2370_v47, %v2172_v38  ;;  %v2373_v22 = vmul.f32 %v2370_v47, %v2173_v5 }
 0x92d   : > { %v2367_v21 = vcombine.low %v2363_v6, %v2364_v18  ;;  %v2380_v15 = vadd.f32 %v2376_v57, %v2372_v37  ;;  %v2381_v43 = vadd.f32 %v2377_v4, %v2373_v22 }
 0x92f   : > { %2369 = vst [vmem:[%s2963_s30] sm:$0x33] %v2367_v21  ;;  %v2384_v35 = vcombine.low %v2380_v15, %v2381_v43 }
 0x931   : > { %v2385_v36 = vrot.slane %v2384_v35, 6 }
 0x933   : > { %2387 = vst [vmem:[%s2963_s30] sm:$0xcc] %v2385_v36 }
 0x934 PF: > { %s2516_s18 = sshll.u32 %s2764_s28, 7  ;;  %s2403_s19 = sshll.u32 %s2963_s30, 4  ;;  %s2404_s19 = int_to_ptr.vmem [resolvable:$true] %s2403_s19 }
 0x935   : > { %s3929_s16 = scalar_lea.hbm %s3992_s13, %s2516_s18  ;;  %s4044_s20 = sand.u32 1, %s2756_s26  }
 0x936   : > { %s2389_s17 = scalar_lea.sflag [#allocation7], %s4044_s20  ;;  %s2686_s21 = scalar_lea.vmem %s2404_s19, 128 }
 0x937   : > { %p2687_p6 = scmp.ne.s32.totalorder %s2404_s19, %s2686_s21  ;;  %s2810_s14 = smov [#allocation6]  }
 0x938   : > { %s2690_s1 = sshll.u32 %s2810_s14, 4  ;;  %s2691_s1 = int_to_ptr.vmem [resolvable:$false] %s2690_s1 }
 0x939   : > { %p2688_p7 = pnand %p2687_p6, %p2933_p3  ;;  %s2692_s2 = scalar_lea.vmem %s2691_s1, 256 }
 0x93a   : > { %p2693_p10 = scmp.lt.s32.totalorder %s2404_s19, %s2691_s1  ;;  %p2694_p11 = scmp.lt.s32.totalorder %s2692_s2, %s2686_s21 }
 0x93b   : > { %p2689_p9 = pneg %p2688_p7 }
 0x93c   : > { %p2695_p12 = por %p2694_p11, %p2693_p10 }
 0x93e   : > { %p2696_p13 = pnand %p2695_p12, %p2689_p9 }
 0x940   : > { %2699 = shalt.err (!%p2696_p13)
}
 0x941   : > { %s2700_s28 = scalar_lea.hbm %s3929_s16, 128  ;;  %s2704_s0 = scalar_lea.hbm %s3992_s13, 256 }
 0x942   : > { %p2701_p0 = scmp.ne.s32.totalorder %s3929_s16, %s2700_s28  ;;  %p2705_p4 = scmp.lt.u32.totalorder %s3929_s16, %s3992_s13 }
 0x943   : > { %p2706_p5 = scmp.lt.u32.totalorder %s2704_s0, %s2700_s28  ;;  %p2708_p7 = scmp.lt.u32.totalorder %s2700_s28, %s3929_s16 }
 0x944   : > { %p2702_p1 = pnand %p2701_p0, %p2933_p3 }
 0x945   : > { %p2707_p6 = por %p2706_p5, %p2705_p4 }
 0x946   : > { %p2703_p2 = pneg %p2702_p1 }
 0x947   : > { %p2709_p9 = por %p2708_p7, %p2707_p6 }
 0x949   : > { %p2710_p10 = pnand %p2709_p9, %p2703_p2 }
 0x94b   : > { %2713 = shalt.err (!%p2710_p10)
}
 0x94c   : > { %2563 = dma.vmem_to_hbm [thread:$0]  (%p2933_p3), %s2404_s19, 128, %s3929_s16, %s2389_s17  }
 0x94d PF: > { %p2569_p11 = scmp.ge.s32.totalorder %s2780_s15, 2  ;;  %s2415_s2 = sand.u32 1, %s2752_s25  }
 0x94e   : > { %s2416_s20 = scalar_lea.sflag [#allocation7], %s2415_s2 }
 0x94f   : > { %p2566_p12 = pnand %p2569_p11, %p2944_p8 }
 0x951   : > { %2747 = dma.done.wait (!%p2566_p12), %s2416_s20, 128  }
 0x952   : > { %2749 = vsyncadd (!%p2566_p12), %s2416_s20, 4294967168  ;;  %s26_s15 = sadd.s32 1, %s2780_s15   ;;  %s4045_s28 = sld [smem:[#allocation9_spill]] }
 0x953   : > { %p23_p13 = scmp.ge.s32.totalorder %s26_s15, 8   ;;  %s4046_s29 = sld [smem:[#allocation10_spill]] }
 0x954   : > { %s4047_s30 = sld [smem:[#allocation11_spill]]  ;;  %s4048_s14 = sld [smem:[#allocation12_spill]] }
 0x955   : > { %s4049_s25 = smov %s2756_s26  ;;  %s4050_s26 = smov %s2760_s27 }
 0x956   : > { %s4051_s27 = smov %s2942_s23  ;;  %25 = sbr.rel (!%p23_p13) target bundleno = 9 (0x9), region = 133 }
 0x95d   :  { %2421 = vsyncpa [#allocation7], 1 }
 0x95e   :  { %2423 = vsyncpa [#allocation7 + $0x1], 1 }

</bundles_post_ra>
